<compile_context>
chip_gen: v7x
topology: tpu7x:2x2x1
jax: 0.10.0
libtpu: 0.0.40
codegen_flags: <defaults>
</compile_context>

<pallas_src>
import functools

import jax
import jax.numpy as jnp
import numpy as np
from jax.experimental import pallas as pl
from jax.experimental.pallas import tpu as pltpu

# Model hyper-parameters (MDNRNN defaults)
NZ = 32
ACTION_LEN = 3
NH = 256
NG = 5                                         # n_mixture
TAU = 0.0
INPUT_SIZE = NZ + ACTION_LEN                   # 35
IN_PAD = 64                                    # z++a padded contracting dim (MXU-friendly)
MDN_OUT = NG * (2 * NZ + 1)                    # 325
MDN_PAD = ((MDN_OUT + 127) // 128) * 128       # 384 (lane-dense output width)


def _round_up(x, m):
    return ((x + m - 1) // m) * m


# --------------------------------------------------------------------------
# Fused kernel: input projection + LSTM recurrence + MDN head, per chunk.
# --------------------------------------------------------------------------
def _mdnrnn_kernel(za_ref, h0_ref, c0_ref, w_in_ref, b_gate_ref, w_hh_ref,
                   w_mdn_ref, b_mdn_ref,
                   raw_ref, hfin_ref, cfin_ref,
                   h_state, c_state, pre_buf, hs_buf,
                   *, seq_len, t_chunk, unroll, masked_tail):
    chunk = pl.program_id(0)
    last = pl.num_programs(0) - 1
    mm_dtype = w_hh_ref.dtype                  # bf16 or f32 matmul operands
    b_pad = h0_ref.shape[0]

    @pl.when(chunk == 0)
    def _():
        h_state[...] = h0_ref[...]
        c_state[...] = c0_ref[...]

    # ---- fused input projection for this chunk (one batched MXU dot) ----
    za = za_ref[...].reshape(t_chunk * b_pad, za_ref.shape[-1])
    pre = jnp.dot(za.astype(mm_dtype), w_in_ref[...],
                  preferred_element_type=jnp.float32) + b_gate_ref[...]
    pre_buf[...] = pre.reshape(t_chunk, b_pad, 4 * NH)

    w_hh = w_hh_ref[...]

    def make_step(masked):
        def step(i, carry):
            h, c = carry
            gates = pre_buf[i] + jnp.dot(h.astype(mm_dtype), w_hh,
                                         preferred_element_type=jnp.float32)
            gi = jax.nn.sigmoid(gates[:, 0 * NH:1 * NH])
            gf = jax.nn.sigmoid(gates[:, 1 * NH:2 * NH])
            gg = jnp.tanh(gates[:, 2 * NH:3 * NH])
            go = jax.nn.sigmoid(gates[:, 3 * NH:4 * NH])
            c_new = gf * c + gi * gg
            h_new = go * jnp.tanh(c_new)
            hs_buf[i] = h_new
            if masked:
                # Only compiled into the tail chunk: freeze the carried state
                # for seq-padding timesteps so h_n/c_n equal the state after
                # timestep seq_len-1 (the padded raw rows are sliced off in
                # the wrapper).
                valid = (chunk * t_chunk + i) < seq_len
                h_new = jnp.where(valid, h_new, h)
                c_new = jnp.where(valid, c_new, c)
            return h_new, c_new
        return step

    def run_chunk(masked):
        h_last, c_last = jax.lax.fori_loop(
            0, t_chunk, make_step(masked),
            (h_state[...], c_state[...]), unroll=unroll)
        h_state[...] = h_last
        c_state[...] = c_last

    if masked_tail:
        @pl.when(chunk != last)
        def _():
            run_chunk(False)

        @pl.when(chunk == last)
        def _():
            run_chunk(True)
    else:
        run_chunk(False)

    # ---- fused MDN head on this chunk's hidden states (kept in VMEM) ----
    hs = hs_buf[...].reshape(t_chunk * b_pad, NH)
    raw = jnp.dot(hs.astype(mm_dtype), w_mdn_ref[...],
                  preferred_element_type=jnp.float32) + b_mdn_ref[...]
    raw_ref[...] = raw.reshape(t_chunk, b_pad, MDN_PAD)

    # Final-state writeback only once (saves the redundant stores per chunk).
    @pl.when(chunk == last)
    def _():
        hfin_ref[...] = h_state[...]
        cfin_ref[...] = c_state[...]


# --------------------------------------------------------------------------
# One-time weight packing (hoisted out of the per-call forward path).
# --------------------------------------------------------------------------
def prepare_params(params, use_bf16=False):
    """Pack MDNRNN weights into the kernel layout (padded/transposed once)."""
    mm = jnp.bfloat16 if use_bf16 else jnp.float32
    w_in = jnp.zeros((IN_PAD, 4 * NH), jnp.float32).at[:INPUT_SIZE, :].set(
        params["w_ih"].astype(jnp.float32).T)
    b_gate = (params["b_ih"] + params["b_hh"]).astype(jnp.float32).reshape(1, 4 * NH)
    w_hh_t = params["w_hh"].astype(jnp.float32).T
    w_mdn_t = jnp.zeros((NH, MDN_PAD), jnp.float32).at[:, :MDN_OUT].set(
        params["w_mdn"].astype(jnp.float32).T)
    b_mdn = jnp.zeros((1, MDN_PAD), jnp.float32).at[:, :MDN_OUT].set(
        params["b_mdn"].astype(jnp.float32))
    return dict(w_in=w_in.astype(mm), b_gate=b_gate, w_hh_t=w_hh_t.astype(mm),
                w_mdn_t=w_mdn_t.astype(mm), b_mdn=b_mdn)


# --------------------------------------------------------------------------
# Forward pass (matches MDNRNN.forward)
# --------------------------------------------------------------------------
def mdnrnn_forward(inpt, action, params=None, hidden_state=None, tau=TAU, *,
                   prepared=None, use_bf16=False, t_chunk=64, unroll=8):
    """inpt: (B, S, NZ), action: (B, S, ACTION_LEN) -> (pi, mean, sigma, (h_n, c_n))."""
    if prepared is None:
        prepared = prepare_params(params, use_bf16=use_bf16)
    mm_dtype = prepared["w_hh_t"].dtype

    B, S, _ = inpt.shape
    base = 16 if mm_dtype == jnp.bfloat16 else 8       # bf16 min sublane tile is 16
    b_pad = _round_up(max(B, 1), base)
    t_chunk = max(1, min(t_chunk, S))
    s_pad = _round_up(S, t_chunk)
    n_chunks = s_pad // t_chunk
    masked_tail = (s_pad != S)

    if hidden_state is None:
        h0 = jnp.zeros((b_pad, NH), jnp.float32)
        c0 = jnp.zeros((b_pad, NH), jnp.float32)
    else:
        h0 = jnp.pad(hidden_state[0][0].astype(jnp.float32), ((0, b_pad - B), (0, 0)))
        c0 = jnp.pad(hidden_state[1][0].astype(jnp.float32), ((0, b_pad - B), (0, 0)))

    # Seq-major, batch-padded, feature-padded (z ++ a ++ 0) input in matmul dtype.
    za = jnp.concatenate([inpt, action], axis=-1).astype(jnp.float32)   # (B, S, 35)
    za = jnp.swapaxes(za, 0, 1)                                         # (S, B, 35)
    za = jnp.pad(za, ((0, s_pad - S), (0, b_pad - B),
                      (0, IN_PAD - INPUT_SIZE))).astype(mm_dtype)       # (s_pad, b_pad, 64)

    kernel = functools.partial(_mdnrnn_kernel, seq_len=S, t_chunk=t_chunk,
                               unroll=unroll, masked_tail=masked_tail)

    raw, h_fin, c_fin = pl.pallas_call(
        kernel,
        out_shape=(
            jax.ShapeDtypeStruct((s_pad, b_pad, MDN_PAD), jnp.float32),  # MDN raw
            jax.ShapeDtypeStruct((b_pad, NH), jnp.float32),              # h_n
            jax.ShapeDtypeStruct((b_pad, NH), jnp.float32),              # c_n
        ),
        grid_spec=pltpu.PrefetchScalarGridSpec(
            num_scalar_prefetch=0,
            grid=(n_chunks,),
            in_specs=[
                pl.BlockSpec((t_chunk, b_pad, IN_PAD), lambda c: (c, 0, 0)),  # z++a chunk
                pl.BlockSpec((b_pad, NH), lambda c: (0, 0)),                  # h0
                pl.BlockSpec((b_pad, NH), lambda c: (0, 0)),                  # c0
                pl.BlockSpec((IN_PAD, 4 * NH), lambda c: (0, 0)),             # W_in^T (padded)
                pl.BlockSpec((1, 4 * NH), lambda c: (0, 0)),                  # b_ih + b_hh
                pl.BlockSpec((NH, 4 * NH), lambda c: (0, 0)),                 # W_hh^T
                pl.BlockSpec((NH, MDN_PAD), lambda c: (0, 0)),                # W_mdn^T (padded)
                pl.BlockSpec((1, MDN_PAD), lambda c: (0, 0)),                 # b_mdn (padded)
            ],
            out_specs=[
                pl.BlockSpec((t_chunk, b_pad, MDN_PAD), lambda c: (c, 0, 0)),
                pl.BlockSpec((b_pad, NH), lambda c: (0, 0)),
                pl.BlockSpec((b_pad, NH), lambda c: (0, 0)),
            ],
            scratch_shapes=[
                pltpu.VMEM((b_pad, NH), jnp.float32),               # carried h
                pltpu.VMEM((b_pad, NH), jnp.float32),               # carried c
                pltpu.VMEM((t_chunk, b_pad, 4 * NH), jnp.float32),  # chunk pre-gates
                pltpu.VMEM((t_chunk, b_pad, NH), jnp.float32),      # chunk hidden states
            ],
        ),
        compiler_params=pltpu.CompilerParams(
            dimension_semantics=("arbitrary",)),
    )(za, h0, c0, prepared["w_in"], prepared["b_gate"], prepared["w_hh_t"],
      prepared["w_mdn_t"], prepared["b_mdn"])

    # TODO(synk): this (S,B)->(B,S) permute of the 384-wide raw tensor stays in
    # XLA; it could be folded into the kernel's output store via an XLU transpose.
    raw_bm = jnp.swapaxes(raw[:S, :B], 0, 1)                        # (B, S, 384)

    mean = raw_bm[..., :NG * NZ]
    sigma = jnp.exp(raw_bm[..., NG * NZ:2 * NG * NZ])
    pi = jax.nn.softmax(raw_bm[..., 2 * NG * NZ:MDN_OUT], axis=-1)
    if tau > 0:                                   # exactly as in the PyTorch spec
        pi = pi / tau
        sigma = sigma * (tau ** 0.5)

    h_n = h_fin[:B][None]                         # (1, B, NH)
    c_n = c_fin[:B][None]
    return pi, mean, sigma, (h_n, c_n)


# --------------------------------------------------------------------------
# Pure-JAX reference (lax.scan) for correctness checking.
# --------------------------------------------------------------------------
def mdnrnn_reference(inpt, action, params, hidden_state=None, tau=TAU):
    B, S, _ = inpt.shape
    if hidden_state is None:
        h = jnp.zeros((B, NH), jnp.float32)
        c = jnp.zeros((B, NH), jnp.float32)
    else:
        h, c = hidden_state[0][0], hidden_state[1][0]
    az = jnp.concatenate([inpt, action], axis=-1)    # (B, S, 35)
    az_t = jnp.swapaxes(az, 0, 1)                    # (S, B, 35)
    w_ih_t, w_hh_t = params["w_ih"].T, params["w_hh"].T
    b = params["b_ih"] + params["b_hh"]

    def step(carry, x):
        h, c = carry
        gates = x @ w_ih_t + h @ w_hh_t + b
        i = jax.nn.sigmoid(gates[:, :NH])
        f = jax.nn.sigmoid(gates[:, NH:2 * NH])
        g = jnp.tanh(gates[:, 2 * NH:3 * NH])
        o = jax.nn.sigmoid(gates[:, 3 * NH:])
        c = f * c + i * g
        h = o * jnp.tanh(c)
        return (h, c), h

    (h_n, c_n), hs = jax.lax.scan(step, (h, c), az_t)
    hs_bf = jnp.swapaxes(hs, 0, 1)                   # (B, S, NH)
    mdn = hs_bf @ params["w_mdn"].T + params["b_mdn"]
    mean = mdn[..., :NG * NZ]
    sigma = jnp.exp(mdn[..., NG * NZ:2 * NG * NZ])
    pi = jax.nn.softmax(mdn[..., -NG:], axis=-1)
    if tau > 0:
        pi = pi / tau
        sigma = sigma * (tau ** 0.5)
    return pi, mean, sigma, (h_n[None], c_n[None])


def init_params(key):
    """Deterministic synthetic parameters (shapes match nn.LSTM / nn.Linear)."""
    ks = jax.random.split(key, 6)
    k = 1.0 / np.sqrt(NH)
    return dict(
        w_ih=jax.random.uniform(ks[0], (4 * NH, INPUT_SIZE), jnp.float32, -k, k),
        w_hh=jax.random.uniform(ks[1], (4 * NH, NH), jnp.float32, -k, k),
        b_ih=jax.random.uniform(ks[2], (4 * NH,), jnp.float32, -k, k),
        b_hh=jax.random.uniform(ks[3], (4 * NH,), jnp.float32, -k, k),
        w_mdn=jax.random.uniform(ks[4], (MDN_OUT, NH), jnp.float32, -k, k),
        b_mdn=jax.random.uniform(ks[5], (MDN_OUT,), jnp.float32, -k, k),
    )


if __name__ == "__main__":
    key = jax.random.PRNGKey(0)
    kp, kz, ka, kh, kc = jax.random.split(key, 5)

    batch, seq = 4, 8
    params = init_params(kp)
    inpt = jax.random.normal(kz, (batch, seq, NZ), jnp.float32)
    action = jax.random.normal(ka, (batch, seq, ACTION_LEN), jnp.float32)

    prepared_f32 = prepare_params(params, use_bf16=False)

    # 1) f32 path, zero initial state, single chunk (t_chunk clamps to seq).
    pi, mean, sigma, (h_n, c_n) = jax.block_until_ready(
        mdnrnn_forward(inpt, action, prepared=prepared_f32))
    assert pi.shape == (batch, seq, NG)
    assert mean.shape == (batch, seq, NG * NZ)
    assert sigma.shape == (batch, seq, NG * NZ)
    assert h_n.shape == (1, batch, NH) and c_n.shape == (1, batch, NH)

    rpi, rmean, rsigma, (rh, rc) = mdnrnn_reference(inpt, action, params)
    for got, want in zip((pi, mean, sigma, h_n, c_n),
                         (rpi, rmean, rsigma, rh, rc)):
        np.testing.assert_allclose(np.asarray(got), np.asarray(want),
                                   rtol=2e-2, atol=2e-2)

    # 2) f32 path with explicit hidden state and t_chunk that does not divide
    #    the sequence length (exercises the masked tail chunk + state carry).
    h0 = 0.1 * jax.random.normal(kh, (1, batch, NH), jnp.float32)
    c0 = 0.1 * jax.random.normal(kc, (1, batch, NH), jnp.float32)
    out2 = jax.block_until_ready(
        mdnrnn_forward(inpt, action, hidden_state=(h0, c0),
                       prepared=prepared_f32, t_chunk=3))
    ref2 = mdnrnn_reference(inpt, action, params, hidden_state=(h0, c0))
    for got, want in zip(out2[:3] + out2[3], ref2[:3] + ref2[3]):
        np.testing.assert_allclose(np.asarray(got), np.asarray(want),
                                   rtol=2e-2, atol=2e-2)

    # 3) bf16 matmul operands (v6e/v7x MXU path); gate math stays f32.
    prepared_bf16 = prepare_params(params, use_bf16=True)
    out3 = jax.block_until_ready(
        mdnrnn_forward(inpt, action, prepared=prepared_bf16))
    for got, want in zip(out3[:3] + out3[3], (rpi, rmean, rsigma, rh, rc)):
        np.testing.assert_allclose(np.asarray(got), np.asarray(want),
                                   rtol=2e-1, atol=2e-1)

    print("KERNEL_OK")
</pallas_src>

<mosaic_0001>
module attributes {stable_mosaic.version = 11 : i64} {
  func.func @_mdnrnn_kernel(%arg0: i32, %arg1: memref<8x8x64xf32, #tpu.memory_space<vmem>>, %arg2: memref<8x256xf32, #tpu.memory_space<vmem>>, %arg3: memref<8x256xf32, #tpu.memory_space<vmem>>, %arg4: memref<64x1024xf32, #tpu.memory_space<vmem>>, %arg5: memref<1x1024xf32, #tpu.memory_space<vmem>>, %arg6: memref<256x1024xf32, #tpu.memory_space<vmem>>, %arg7: memref<256x384xf32, #tpu.memory_space<vmem>>, %arg8: memref<1x384xf32, #tpu.memory_space<vmem>>, %arg9: memref<8x8x384xf32, #tpu.memory_space<vmem>>, %arg10: memref<8x256xf32, #tpu.memory_space<vmem>>, %arg11: memref<8x256xf32, #tpu.memory_space<vmem>>, %arg12: memref<8x256xf32, #tpu.memory_space<vmem>>, %arg13: memref<8x256xf32, #tpu.memory_space<vmem>>, %arg14: memref<8x8x1024xf32, #tpu.memory_space<vmem>>, %arg15: memref<8x8x256xf32, #tpu.memory_space<vmem>>) attributes {dimension_semantics = [#tpu.dimension_semantics<arbitrary>], iteration_bounds = array<i64: 1>, scalar_prefetch = 0 : i64, scratch_operands = 4 : i64, tpu.core_type = #tpu.core_type<tc>, window_params = [{transform_indices = @transform_0, window_bounds = array<i64: 8, 8, 64>}, {pipeline_mode = #tpu.pipeline_mode<synchronous>, transform_indices = @transform_1, window_bounds = array<i64: 8, 256>}, {pipeline_mode = #tpu.pipeline_mode<synchronous>, transform_indices = @transform_2, window_bounds = array<i64: 8, 256>}, {pipeline_mode = #tpu.pipeline_mode<synchronous>, transform_indices = @transform_3, window_bounds = array<i64: 64, 1024>}, {pipeline_mode = #tpu.pipeline_mode<synchronous>, transform_indices = @transform_4, window_bounds = array<i64: 1, 1024>}, {pipeline_mode = #tpu.pipeline_mode<synchronous>, transform_indices = @transform_5, window_bounds = array<i64: 256, 1024>}, {pipeline_mode = #tpu.pipeline_mode<synchronous>, transform_indices = @transform_6, window_bounds = array<i64: 256, 384>}, {pipeline_mode = #tpu.pipeline_mode<synchronous>, transform_indices = @transform_7, window_bounds = array<i64: 1, 384>}, {transform_indices = @transform_8, window_bounds = array<i64: 8, 8, 384>}, {pipeline_mode = #tpu.pipeline_mode<synchronous>, transform_indices = @transform_9, window_bounds = array<i64: 8, 256>}, {pipeline_mode = #tpu.pipeline_mode<synchronous>, transform_indices = @transform_10, window_bounds = array<i64: 8, 256>}]} {
    %c0_i32 = arith.constant 0 : i32
    %0 = arith.cmpi eq, %arg0, %c0_i32 : i32
    %1 = arith.extui %0 : i1 to i32
    %c0_i32_0 = arith.constant 0 : i32
    %2 = arith.cmpi ne, %1, %c0_i32_0 : i32
    scf.if %2 {
      %c0_98 = arith.constant 0 : index
      %c0_99 = arith.constant 0 : index
      %301 = vector.load %arg2[%c0_98, %c0_99] : memref<8x256xf32, #tpu.memory_space<vmem>>, vector<8x256xf32>
      %c0_100 = arith.constant 0 : index
      %c0_101 = arith.constant 0 : index
      %302 = vector.load %arg12[%c0_100, %c0_101] : memref<8x256xf32, #tpu.memory_space<vmem>>, vector<8x256xf32>
      tpu.vector_store %arg12[%c0_100, %c0_101], %301 {strides = array<i32>} : memref<8x256xf32, #tpu.memory_space<vmem>>, vector<8x256xf32>,
      %c0_102 = arith.constant 0 : index
      %c0_103 = arith.constant 0 : index
      %303 = vector.load %arg3[%c0_102, %c0_103] : memref<8x256xf32, #tpu.memory_space<vmem>>, vector<8x256xf32>
      %c0_104 = arith.constant 0 : index
      %c0_105 = arith.constant 0 : index
      %304 = vector.load %arg13[%c0_104, %c0_105] : memref<8x256xf32, #tpu.memory_space<vmem>>, vector<8x256xf32>
      tpu.vector_store %arg13[%c0_104, %c0_105], %303 {strides = array<i32>} : memref<8x256xf32, #tpu.memory_space<vmem>>, vector<8x256xf32>,
    } else {
    }
    %c0 = arith.constant 0 : index
    %c0_1 = arith.constant 0 : index
    %c0_2 = arith.constant 0 : index
    %3 = vector.load %arg1[%c0, %c0_1, %c0_2] : memref<8x8x64xf32, #tpu.memory_space<vmem>>, vector<8x8x64xf32>
    %4 = vector.shape_cast %3 : vector<8x8x64xf32> to vector<64x64xf32>
    %c0_3 = arith.constant 0 : index
    %c0_4 = arith.constant 0 : index
    %5 = vector.load %arg4[%c0_3, %c0_4] : memref<64x1024xf32, #tpu.memory_space<vmem>>, vector<64x1024xf32>
    %cst = arith.constant dense<0.000000e+00> : vector<64x1024xf32>
    %6 = tpu.matmul %4, %5, %cst {dimension_numbers = #tpu.dot_dimension_numbers<[1], [0], [0], [1], [0, 0, 1, 1], [], []>} : vector<64x64xf32>, vector<64x1024xf32>, vector<64x1024xf32> -> vector<64x1024xf32>
    %c0_5 = arith.constant 0 : index
    %c0_6 = arith.constant 0 : index
    %7 = vector.load %arg5[%c0_5, %c0_6] : memref<1x1024xf32, #tpu.memory_space<vmem>>, vector<1x1024xf32>
    %8 = vector.broadcast %7 : vector<1x1024xf32> to vector<64x1024xf32>
    %9 = arith.addf %6, %8 : vector<64x1024xf32>
    %10 = vector.shape_cast %9 : vector<64x1024xf32> to vector<8x8x1024xf32>
    %c0_7 = arith.constant 0 : index
    %c0_8 = arith.constant 0 : index
    %c0_9 = arith.constant 0 : index
    %11 = vector.load %arg14[%c0_7, %c0_8, %c0_9] : memref<8x8x1024xf32, #tpu.memory_space<vmem>>, vector<8x8x1024xf32>
    tpu.vector_store %arg14[%c0_7, %c0_8, %c0_9], %10 {strides = array<i32>} : memref<8x8x1024xf32, #tpu.memory_space<vmem>>, vector<8x8x1024xf32>,
    %c0_10 = arith.constant 0 : index
    %c0_11 = arith.constant 0 : index
    %12 = vector.load %arg6[%c0_10, %c0_11] : memref<256x1024xf32, #tpu.memory_space<vmem>>, vector<256x1024xf32>
    %c0_12 = arith.constant 0 : index
    %c0_13 = arith.constant 0 : index
    %13 = vector.load %arg12[%c0_12, %c0_13] : memref<8x256xf32, #tpu.memory_space<vmem>>, vector<8x256xf32>
    %c0_14 = arith.constant 0 : index
    %c0_15 = arith.constant 0 : index
    %14 = vector.load %arg13[%c0_14, %c0_15] : memref<8x256xf32, #tpu.memory_space<vmem>>, vector<8x256xf32>
    %c0_i32_16 = arith.constant 0 : i32
    %15 = arith.index_cast %c0_i32_16 : i32 to index
    %c0_17 = arith.constant 0 : index
    %c0_18 = arith.constant 0 : index
    %16 = vector.load %arg14[%15, %c0_17, %c0_18] : memref<8x8x1024xf32, #tpu.memory_space<vmem>>, vector<1x8x1024xf32>
    %17 = vector.shape_cast %16 : vector<1x8x1024xf32> to vector<8x1024xf32>
    %cst_19 = arith.constant dense<0.000000e+00> : vector<8x1024xf32>
    %18 = tpu.matmul %13, %12, %cst_19 {dimension_numbers = #tpu.dot_dimension_numbers<[1], [0], [0], [1], [0, 0, 1, 1], [], []>} : vector<8x256xf32>, vector<256x1024xf32>, vector<8x1024xf32> -> vector<8x1024xf32>
    %19 = arith.addf %17, %18 : vector<8x1024xf32>
    %20 = vector.extract_strided_slice %19 {offsets = [0, 0], sizes = [8, 256], strides = [1, 1]} : vector<8x1024xf32> to vector<8x256xf32>
    %21 = arith.negf %20 : vector<8x256xf32>
    %22 = math.exp %21 : vector<8x256xf32>
    %cst_20 = arith.constant 1.000000e+00 : f32
    %23 = vector.broadcast %cst_20 : f32 to vector<8x256xf32>
    %24 = arith.addf %23, %22 : vector<8x256xf32>
    %25 = arith.divf %23, %24 : vector<8x256xf32>
    %26 = vector.extract_strided_slice %19 {offsets = [0, 256], sizes = [8, 256], strides = [1, 1]} : vector<8x1024xf32> to vector<8x256xf32>
    %27 = arith.negf %26 : vector<8x256xf32>
    %28 = math.exp %27 : vector<8x256xf32>
    %cst_21 = arith.constant 1.000000e+00 : f32
    %29 = vector.broadcast %cst_21 : f32 to vector<8x256xf32>
    %30 = arith.addf %29, %28 : vector<8x256xf32>
    %31 = arith.divf %29, %30 : vector<8x256xf32>
    %32 = vector.extract_strided_slice %19 {offsets = [0, 512], sizes = [8, 256], strides = [1, 1]} : vector<8x1024xf32> to vector<8x256xf32>
    %33 = math.tanh %32 : vector<8x256xf32>
    %34 = vector.extract_strided_slice %19 {offsets = [0, 768], sizes = [8, 256], strides = [1, 1]} : vector<8x1024xf32> to vector<8x256xf32>
    %35 = arith.negf %34 : vector<8x256xf32>
    %36 = math.exp %35 : vector<8x256xf32>
    %cst_22 = arith.constant 1.000000e+00 : f32
    %37 = vector.broadcast %cst_22 : f32 to vector<8x256xf32>
    %38 = arith.addf %37, %36 : vector<8x256xf32>
    %39 = arith.divf %37, %38 : vector<8x256xf32>
    %40 = arith.mulf %31, %14 : vector<8x256xf32>
    %41 = arith.mulf %25, %33 : vector<8x256xf32>
    %42 = arith.addf %40, %41 : vector<8x256xf32>
    %43 = math.tanh %42 : vector<8x256xf32>
    %44 = arith.mulf %39, %43 : vector<8x256xf32>
    %45 = arith.index_cast %c0_i32_16 : i32 to index
    %c0_23 = arith.constant 0 : index
    %c0_24 = arith.constant 0 : index
    %46 = vector.load %arg15[%45, %c0_23, %c0_24] : memref<8x8x256xf32, #tpu.memory_space<vmem>>, vector<1x8x256xf32>
    %47 = vector.shape_cast %46 : vector<1x8x256xf32> to vector<8x256xf32>
    %48 = vector.shape_cast %44 : vector<8x256xf32> to vector<1x8x256xf32>
    tpu.vector_store %arg15[%45, %c0_23, %c0_24], %48 {strides = array<i32>} : memref<8x8x256xf32, #tpu.memory_space<vmem>>, vector<1x8x256xf32>,
    %c1_i32 = arith.constant 1 : i32
    %49 = arith.index_cast %c1_i32 : i32 to index
    %c0_25 = arith.constant 0 : index
    %c0_26 = arith.constant 0 : index
    %50 = vector.load %arg14[%49, %c0_25, %c0_26] : memref<8x8x1024xf32, #tpu.memory_space<vmem>>, vector<1x8x1024xf32>
    %51 = vector.shape_cast %50 : vector<1x8x1024xf32> to vector<8x1024xf32>
    %cst_27 = arith.constant dense<0.000000e+00> : vector<8x1024xf32>
    %52 = tpu.matmul %44, %12, %cst_27 {dimension_numbers = #tpu.dot_dimension_numbers<[1], [0], [0], [1], [0, 0, 1, 1], [], []>} : vector<8x256xf32>, vector<256x1024xf32>, vector<8x1024xf32> -> vector<8x1024xf32>
    %53 = arith.addf %51, %52 : vector<8x1024xf32>
    %54 = vector.extract_strided_slice %53 {offsets = [0, 0], sizes = [8, 256], strides = [1, 1]} : vector<8x1024xf32> to vector<8x256xf32>
    %55 = arith.negf %54 : vector<8x256xf32>
    %56 = math.exp %55 : vector<8x256xf32>
    %cst_28 = arith.constant 1.000000e+00 : f32
    %57 = vector.broadcast %cst_28 : f32 to vector<8x256xf32>
    %58 = arith.addf %57, %56 : vector<8x256xf32>
    %59 = arith.divf %57, %58 : vector<8x256xf32>
    %60 = vector.extract_strided_slice %53 {offsets = [0, 256], sizes = [8, 256], strides = [1, 1]} : vector<8x1024xf32> to vector<8x256xf32>
    %61 = arith.negf %60 : vector<8x256xf32>
    %62 = math.exp %61 : vector<8x256xf32>
    %cst_29 = arith.constant 1.000000e+00 : f32
    %63 = vector.broadcast %cst_29 : f32 to vector<8x256xf32>
    %64 = arith.addf %63, %62 : vector<8x256xf32>
    %65 = arith.divf %63, %64 : vector<8x256xf32>
    %66 = vector.extract_strided_slice %53 {offsets = [0, 512], sizes = [8, 256], strides = [1, 1]} : vector<8x1024xf32> to vector<8x256xf32>
    %67 = math.tanh %66 : vector<8x256xf32>
    %68 = vector.extract_strided_slice %53 {offsets = [0, 768], sizes = [8, 256], strides = [1, 1]} : vector<8x1024xf32> to vector<8x256xf32>
    %69 = arith.negf %68 : vector<8x256xf32>
    %70 = math.exp %69 : vector<8x256xf32>
    %cst_30 = arith.constant 1.000000e+00 : f32
    %71 = vector.broadcast %cst_30 : f32 to vector<8x256xf32>
    %72 = arith.addf %71, %70 : vector<8x256xf32>
    %73 = arith.divf %71, %72 : vector<8x256xf32>
    %74 = arith.mulf %65, %42 : vector<8x256xf32>
    %75 = arith.mulf %59, %67 : vector<8x256xf32>
    %76 = arith.addf %74, %75 : vector<8x256xf32>
    %77 = math.tanh %76 : vector<8x256xf32>
    %78 = arith.mulf %73, %77 : vector<8x256xf32>
    %79 = arith.index_cast %c1_i32 : i32 to index
    %c0_31 = arith.constant 0 : index
    %c0_32 = arith.constant 0 : index
    %80 = vector.load %arg15[%79, %c0_31, %c0_32] : memref<8x8x256xf32, #tpu.memory_space<vmem>>, vector<1x8x256xf32>
    %81 = vector.shape_cast %80 : vector<1x8x256xf32> to vector<8x256xf32>
    %82 = vector.shape_cast %78 : vector<8x256xf32> to vector<1x8x256xf32>
    tpu.vector_store %arg15[%79, %c0_31, %c0_32], %82 {strides = array<i32>} : memref<8x8x256xf32, #tpu.memory_space<vmem>>, vector<1x8x256xf32>,
    %c2_i32 = arith.constant 2 : i32
    %83 = arith.index_cast %c2_i32 : i32 to index
    %c0_33 = arith.constant 0 : index
    %c0_34 = arith.constant 0 : index
    %84 = vector.load %arg14[%83, %c0_33, %c0_34] : memref<8x8x1024xf32, #tpu.memory_space<vmem>>, vector<1x8x1024xf32>
    %85 = vector.shape_cast %84 : vector<1x8x1024xf32> to vector<8x1024xf32>
    %cst_35 = arith.constant dense<0.000000e+00> : vector<8x1024xf32>
    %86 = tpu.matmul %78, %12, %cst_35 {dimension_numbers = #tpu.dot_dimension_numbers<[1], [0], [0], [1], [0, 0, 1, 1], [], []>} : vector<8x256xf32>, vector<256x1024xf32>, vector<8x1024xf32> -> vector<8x1024xf32>
    %87 = arith.addf %85, %86 : vector<8x1024xf32>
    %88 = vector.extract_strided_slice %87 {offsets = [0, 0], sizes = [8, 256], strides = [1, 1]} : vector<8x1024xf32> to vector<8x256xf32>
    %89 = arith.negf %88 : vector<8x256xf32>
    %90 = math.exp %89 : vector<8x256xf32>
    %cst_36 = arith.constant 1.000000e+00 : f32
    %91 = vector.broadcast %cst_36 : f32 to vector<8x256xf32>
    %92 = arith.addf %91, %90 : vector<8x256xf32>
    %93 = arith.divf %91, %92 : vector<8x256xf32>
    %94 = vector.extract_strided_slice %87 {offsets = [0, 256], sizes = [8, 256], strides = [1, 1]} : vector<8x1024xf32> to vector<8x256xf32>
    %95 = arith.negf %94 : vector<8x256xf32>
    %96 = math.exp %95 : vector<8x256xf32>
    %cst_37 = arith.constant 1.000000e+00 : f32
    %97 = vector.broadcast %cst_37 : f32 to vector<8x256xf32>
    %98 = arith.addf %97, %96 : vector<8x256xf32>
    %99 = arith.divf %97, %98 : vector<8x256xf32>
    %100 = vector.extract_strided_slice %87 {offsets = [0, 512], sizes = [8, 256], strides = [1, 1]} : vector<8x1024xf32> to vector<8x256xf32>
    %101 = math.tanh %100 : vector<8x256xf32>
    %102 = vector.extract_strided_slice %87 {offsets = [0, 768], sizes = [8, 256], strides = [1, 1]} : vector<8x1024xf32> to vector<8x256xf32>
    %103 = arith.negf %102 : vector<8x256xf32>
    %104 = math.exp %103 : vector<8x256xf32>
    %cst_38 = arith.constant 1.000000e+00 : f32
    %105 = vector.broadcast %cst_38 : f32 to vector<8x256xf32>
    %106 = arith.addf %105, %104 : vector<8x256xf32>
    %107 = arith.divf %105, %106 : vector<8x256xf32>
    %108 = arith.mulf %99, %76 : vector<8x256xf32>
    %109 = arith.mulf %93, %101 : vector<8x256xf32>
    %110 = arith.addf %108, %109 : vector<8x256xf32>
    %111 = math.tanh %110 : vector<8x256xf32>
    %112 = arith.mulf %107, %111 : vector<8x256xf32>
    %113 = arith.index_cast %c2_i32 : i32 to index
    %c0_39 = arith.constant 0 : index
    %c0_40 = arith.constant 0 : index
    %114 = vector.load %arg15[%113, %c0_39, %c0_40] : memref<8x8x256xf32, #tpu.memory_space<vmem>>, vector<1x8x256xf32>
    %115 = vector.shape_cast %114 : vector<1x8x256xf32> to vector<8x256xf32>
    %116 = vector.shape_cast %112 : vector<8x256xf32> to vector<1x8x256xf32>
    tpu.vector_store %arg15[%113, %c0_39, %c0_40], %116 {strides = array<i32>} : memref<8x8x256xf32, #tpu.memory_space<vmem>>, vector<1x8x256xf32>,
    %c3_i32 = arith.constant 3 : i32
    %117 = arith.index_cast %c3_i32 : i32 to index
    %c0_41 = arith.constant 0 : index
    %c0_42 = arith.constant 0 : index
    %118 = vector.load %arg14[%117, %c0_41, %c0_42] : memref<8x8x1024xf32, #tpu.memory_space<vmem>>, vector<1x8x1024xf32>
    %119 = vector.shape_cast %118 : vector<1x8x1024xf32> to vector<8x1024xf32>
    %cst_43 = arith.constant dense<0.000000e+00> : vector<8x1024xf32>
    %120 = tpu.matmul %112, %12, %cst_43 {dimension_numbers = #tpu.dot_dimension_numbers<[1], [0], [0], [1], [0, 0, 1, 1], [], []>} : vector<8x256xf32>, vector<256x1024xf32>, vector<8x1024xf32> -> vector<8x1024xf32>
    %121 = arith.addf %119, %120 : vector<8x1024xf32>
    %122 = vector.extract_strided_slice %121 {offsets = [0, 0], sizes = [8, 256], strides = [1, 1]} : vector<8x1024xf32> to vector<8x256xf32>
    %123 = arith.negf %122 : vector<8x256xf32>
    %124 = math.exp %123 : vector<8x256xf32>
    %cst_44 = arith.constant 1.000000e+00 : f32
    %125 = vector.broadcast %cst_44 : f32 to vector<8x256xf32>
    %126 = arith.addf %125, %124 : vector<8x256xf32>
    %127 = arith.divf %125, %126 : vector<8x256xf32>
    %128 = vector.extract_strided_slice %121 {offsets = [0, 256], sizes = [8, 256], strides = [1, 1]} : vector<8x1024xf32> to vector<8x256xf32>
    %129 = arith.negf %128 : vector<8x256xf32>
    %130 = math.exp %129 : vector<8x256xf32>
    %cst_45 = arith.constant 1.000000e+00 : f32
    %131 = vector.broadcast %cst_45 : f32 to vector<8x256xf32>
    %132 = arith.addf %131, %130 : vector<8x256xf32>
    %133 = arith.divf %131, %132 : vector<8x256xf32>
    %134 = vector.extract_strided_slice %121 {offsets = [0, 512], sizes = [8, 256], strides = [1, 1]} : vector<8x1024xf32> to vector<8x256xf32>
    %135 = math.tanh %134 : vector<8x256xf32>
    %136 = vector.extract_strided_slice %121 {offsets = [0, 768], sizes = [8, 256], strides = [1, 1]} : vector<8x1024xf32> to vector<8x256xf32>
    %137 = arith.negf %136 : vector<8x256xf32>
    %138 = math.exp %137 : vector<8x256xf32>
    %cst_46 = arith.constant 1.000000e+00 : f32
    %139 = vector.broadcast %cst_46 : f32 to vector<8x256xf32>
    %140 = arith.addf %139, %138 : vector<8x256xf32>
    %141 = arith.divf %139, %140 : vector<8x256xf32>
    %142 = arith.mulf %133, %110 : vector<8x256xf32>
    %143 = arith.mulf %127, %135 : vector<8x256xf32>
    %144 = arith.addf %142, %143 : vector<8x256xf32>
    %145 = math.tanh %144 : vector<8x256xf32>
    %146 = arith.mulf %141, %145 : vector<8x256xf32>
    %147 = arith.index_cast %c3_i32 : i32 to index
    %c0_47 = arith.constant 0 : index
    %c0_48 = arith.constant 0 : index
    %148 = vector.load %arg15[%147, %c0_47, %c0_48] : memref<8x8x256xf32, #tpu.memory_space<vmem>>, vector<1x8x256xf32>
    %149 = vector.shape_cast %148 : vector<1x8x256xf32> to vector<8x256xf32>
    %150 = vector.shape_cast %146 : vector<8x256xf32> to vector<1x8x256xf32>
    tpu.vector_store %arg15[%147, %c0_47, %c0_48], %150 {strides = array<i32>} : memref<8x8x256xf32, #tpu.memory_space<vmem>>, vector<1x8x256xf32>,
    %c4_i32 = arith.constant 4 : i32
    %151 = arith.index_cast %c4_i32 : i32 to index
    %c0_49 = arith.constant 0 : index
    %c0_50 = arith.constant 0 : index
    %152 = vector.load %arg14[%151, %c0_49, %c0_50] : memref<8x8x1024xf32, #tpu.memory_space<vmem>>, vector<1x8x1024xf32>
    %153 = vector.shape_cast %152 : vector<1x8x1024xf32> to vector<8x1024xf32>
    %cst_51 = arith.constant dense<0.000000e+00> : vector<8x1024xf32>
    %154 = tpu.matmul %146, %12, %cst_51 {dimension_numbers = #tpu.dot_dimension_numbers<[1], [0], [0], [1], [0, 0, 1, 1], [], []>} : vector<8x256xf32>, vector<256x1024xf32>, vector<8x1024xf32> -> vector<8x1024xf32>
    %155 = arith.addf %153, %154 : vector<8x1024xf32>
    %156 = vector.extract_strided_slice %155 {offsets = [0, 0], sizes = [8, 256], strides = [1, 1]} : vector<8x1024xf32> to vector<8x256xf32>
    %157 = arith.negf %156 : vector<8x256xf32>
    %158 = math.exp %157 : vector<8x256xf32>
    %cst_52 = arith.constant 1.000000e+00 : f32
    %159 = vector.broadcast %cst_52 : f32 to vector<8x256xf32>
    %160 = arith.addf %159, %158 : vector<8x256xf32>
    %161 = arith.divf %159, %160 : vector<8x256xf32>
    %162 = vector.extract_strided_slice %155 {offsets = [0, 256], sizes = [8, 256], strides = [1, 1]} : vector<8x1024xf32> to vector<8x256xf32>
    %163 = arith.negf %162 : vector<8x256xf32>
    %164 = math.exp %163 : vector<8x256xf32>
    %cst_53 = arith.constant 1.000000e+00 : f32
    %165 = vector.broadcast %cst_53 : f32 to vector<8x256xf32>
    %166 = arith.addf %165, %164 : vector<8x256xf32>
    %167 = arith.divf %165, %166 : vector<8x256xf32>
    %168 = vector.extract_strided_slice %155 {offsets = [0, 512], sizes = [8, 256], strides = [1, 1]} : vector<8x1024xf32> to vector<8x256xf32>
    %169 = math.tanh %168 : vector<8x256xf32>
    %170 = vector.extract_strided_slice %155 {offsets = [0, 768], sizes = [8, 256], strides = [1, 1]} : vector<8x1024xf32> to vector<8x256xf32>
    %171 = arith.negf %170 : vector<8x256xf32>
    %172 = math.exp %171 : vector<8x256xf32>
    %cst_54 = arith.constant 1.000000e+00 : f32
    %173 = vector.broadcast %cst_54 : f32 to vector<8x256xf32>
    %174 = arith.addf %173, %172 : vector<8x256xf32>
    %175 = arith.divf %173, %174 : vector<8x256xf32>
    %176 = arith.mulf %167, %144 : vector<8x256xf32>
    %177 = arith.mulf %161, %169 : vector<8x256xf32>
    %178 = arith.addf %176, %177 : vector<8x256xf32>
    %179 = math.tanh %178 : vector<8x256xf32>
    %180 = arith.mulf %175, %179 : vector<8x256xf32>
    %181 = arith.index_cast %c4_i32 : i32 to index
    %c0_55 = arith.constant 0 : index
    %c0_56 = arith.constant 0 : index
    %182 = vector.load %arg15[%181, %c0_55, %c0_56] : memref<8x8x256xf32, #tpu.memory_space<vmem>>, vector<1x8x256xf32>
    %183 = vector.shape_cast %182 : vector<1x8x256xf32> to vector<8x256xf32>
    %184 = vector.shape_cast %180 : vector<8x256xf32> to vector<1x8x256xf32>
    tpu.vector_store %arg15[%181, %c0_55, %c0_56], %184 {strides = array<i32>} : memref<8x8x256xf32, #tpu.memory_space<vmem>>, vector<1x8x256xf32>,
    %c5_i32 = arith.constant 5 : i32
    %185 = arith.index_cast %c5_i32 : i32 to index
    %c0_57 = arith.constant 0 : index
    %c0_58 = arith.constant 0 : index
    %186 = vector.load %arg14[%185, %c0_57, %c0_58] : memref<8x8x1024xf32, #tpu.memory_space<vmem>>, vector<1x8x1024xf32>
    %187 = vector.shape_cast %186 : vector<1x8x1024xf32> to vector<8x1024xf32>
    %cst_59 = arith.constant dense<0.000000e+00> : vector<8x1024xf32>
    %188 = tpu.matmul %180, %12, %cst_59 {dimension_numbers = #tpu.dot_dimension_numbers<[1], [0], [0], [1], [0, 0, 1, 1], [], []>} : vector<8x256xf32>, vector<256x1024xf32>, vector<8x1024xf32> -> vector<8x1024xf32>
    %189 = arith.addf %187, %188 : vector<8x1024xf32>
    %190 = vector.extract_strided_slice %189 {offsets = [0, 0], sizes = [8, 256], strides = [1, 1]} : vector<8x1024xf32> to vector<8x256xf32>
    %191 = arith.negf %190 : vector<8x256xf32>
    %192 = math.exp %191 : vector<8x256xf32>
    %cst_60 = arith.constant 1.000000e+00 : f32
    %193 = vector.broadcast %cst_60 : f32 to vector<8x256xf32>
    %194 = arith.addf %193, %192 : vector<8x256xf32>
    %195 = arith.divf %193, %194 : vector<8x256xf32>
    %196 = vector.extract_strided_slice %189 {offsets = [0, 256], sizes = [8, 256], strides = [1, 1]} : vector<8x1024xf32> to vector<8x256xf32>
    %197 = arith.negf %196 : vector<8x256xf32>
    %198 = math.exp %197 : vector<8x256xf32>
    %cst_61 = arith.constant 1.000000e+00 : f32
    %199 = vector.broadcast %cst_61 : f32 to vector<8x256xf32>
    %200 = arith.addf %199, %198 : vector<8x256xf32>
    %201 = arith.divf %199, %200 : vector<8x256xf32>
    %202 = vector.extract_strided_slice %189 {offsets = [0, 512], sizes = [8, 256], strides = [1, 1]} : vector<8x1024xf32> to vector<8x256xf32>
    %203 = math.tanh %202 : vector<8x256xf32>
    %204 = vector.extract_strided_slice %189 {offsets = [0, 768], sizes = [8, 256], strides = [1, 1]} : vector<8x1024xf32> to vector<8x256xf32>
    %205 = arith.negf %204 : vector<8x256xf32>
    %206 = math.exp %205 : vector<8x256xf32>
    %cst_62 = arith.constant 1.000000e+00 : f32
    %207 = vector.broadcast %cst_62 : f32 to vector<8x256xf32>
    %208 = arith.addf %207, %206 : vector<8x256xf32>
    %209 = arith.divf %207, %208 : vector<8x256xf32>
    %210 = arith.mulf %201, %178 : vector<8x256xf32>
    %211 = arith.mulf %195, %203 : vector<8x256xf32>
    %212 = arith.addf %210, %211 : vector<8x256xf32>
    %213 = math.tanh %212 : vector<8x256xf32>
    %214 = arith.mulf %209, %213 : vector<8x256xf32>
    %215 = arith.index_cast %c5_i32 : i32 to index
    %c0_63 = arith.constant 0 : index
    %c0_64 = arith.constant 0 : index
    %216 = vector.load %arg15[%215, %c0_63, %c0_64] : memref<8x8x256xf32, #tpu.memory_space<vmem>>, vector<1x8x256xf32>
    %217 = vector.shape_cast %216 : vector<1x8x256xf32> to vector<8x256xf32>
    %218 = vector.shape_cast %214 : vector<8x256xf32> to vector<1x8x256xf32>
    tpu.vector_store %arg15[%215, %c0_63, %c0_64], %218 {strides = array<i32>} : memref<8x8x256xf32, #tpu.memory_space<vmem>>, vector<1x8x256xf32>,
    %c6_i32 = arith.constant 6 : i32
    %219 = arith.index_cast %c6_i32 : i32 to index
    %c0_65 = arith.constant 0 : index
    %c0_66 = arith.constant 0 : index
    %220 = vector.load %arg14[%219, %c0_65, %c0_66] : memref<8x8x1024xf32, #tpu.memory_space<vmem>>, vector<1x8x1024xf32>
    %221 = vector.shape_cast %220 : vector<1x8x1024xf32> to vector<8x1024xf32>
    %cst_67 = arith.constant dense<0.000000e+00> : vector<8x1024xf32>
    %222 = tpu.matmul %214, %12, %cst_67 {dimension_numbers = #tpu.dot_dimension_numbers<[1], [0], [0], [1], [0, 0, 1, 1], [], []>} : vector<8x256xf32>, vector<256x1024xf32>, vector<8x1024xf32> -> vector<8x1024xf32>
    %223 = arith.addf %221, %222 : vector<8x1024xf32>
    %224 = vector.extract_strided_slice %223 {offsets = [0, 0], sizes = [8, 256], strides = [1, 1]} : vector<8x1024xf32> to vector<8x256xf32>
    %225 = arith.negf %224 : vector<8x256xf32>
    %226 = math.exp %225 : vector<8x256xf32>
    %cst_68 = arith.constant 1.000000e+00 : f32
    %227 = vector.broadcast %cst_68 : f32 to vector<8x256xf32>
    %228 = arith.addf %227, %226 : vector<8x256xf32>
    %229 = arith.divf %227, %228 : vector<8x256xf32>
    %230 = vector.extract_strided_slice %223 {offsets = [0, 256], sizes = [8, 256], strides = [1, 1]} : vector<8x1024xf32> to vector<8x256xf32>
    %231 = arith.negf %230 : vector<8x256xf32>
    %232 = math.exp %231 : vector<8x256xf32>
    %cst_69 = arith.constant 1.000000e+00 : f32
    %233 = vector.broadcast %cst_69 : f32 to vector<8x256xf32>
    %234 = arith.addf %233, %232 : vector<8x256xf32>
    %235 = arith.divf %233, %234 : vector<8x256xf32>
    %236 = vector.extract_strided_slice %223 {offsets = [0, 512], sizes = [8, 256], strides = [1, 1]} : vector<8x1024xf32> to vector<8x256xf32>
    %237 = math.tanh %236 : vector<8x256xf32>
    %238 = vector.extract_strided_slice %223 {offsets = [0, 768], sizes = [8, 256], strides = [1, 1]} : vector<8x1024xf32> to vector<8x256xf32>
    %239 = arith.negf %238 : vector<8x256xf32>
    %240 = math.exp %239 : vector<8x256xf32>
    %cst_70 = arith.constant 1.000000e+00 : f32
    %241 = vector.broadcast %cst_70 : f32 to vector<8x256xf32>
    %242 = arith.addf %241, %240 : vector<8x256xf32>
    %243 = arith.divf %241, %242 : vector<8x256xf32>
    %244 = arith.mulf %235, %212 : vector<8x256xf32>
    %245 = arith.mulf %229, %237 : vector<8x256xf32>
    %246 = arith.addf %244, %245 : vector<8x256xf32>
    %247 = math.tanh %246 : vector<8x256xf32>
    %248 = arith.mulf %243, %247 : vector<8x256xf32>
    %249 = arith.index_cast %c6_i32 : i32 to index
    %c0_71 = arith.constant 0 : index
    %c0_72 = arith.constant 0 : index
    %250 = vector.load %arg15[%249, %c0_71, %c0_72] : memref<8x8x256xf32, #tpu.memory_space<vmem>>, vector<1x8x256xf32>
    %251 = vector.shape_cast %250 : vector<1x8x256xf32> to vector<8x256xf32>
    %252 = vector.shape_cast %248 : vector<8x256xf32> to vector<1x8x256xf32>
    tpu.vector_store %arg15[%249, %c0_71, %c0_72], %252 {strides = array<i32>} : memref<8x8x256xf32, #tpu.memory_space<vmem>>, vector<1x8x256xf32>,
    %c7_i32 = arith.constant 7 : i32
    %253 = arith.index_cast %c7_i32 : i32 to index
    %c0_73 = arith.constant 0 : index
    %c0_74 = arith.constant 0 : index
    %254 = vector.load %arg14[%253, %c0_73, %c0_74] : memref<8x8x1024xf32, #tpu.memory_space<vmem>>, vector<1x8x1024xf32>
    %255 = vector.shape_cast %254 : vector<1x8x1024xf32> to vector<8x1024xf32>
    %cst_75 = arith.constant dense<0.000000e+00> : vector<8x1024xf32>
    %256 = tpu.matmul %248, %12, %cst_75 {dimension_numbers = #tpu.dot_dimension_numbers<[1], [0], [0], [1], [0, 0, 1, 1], [], []>} : vector<8x256xf32>, vector<256x1024xf32>, vector<8x1024xf32> -> vector<8x1024xf32>
    %257 = arith.addf %255, %256 : vector<8x1024xf32>
    %258 = vector.extract_strided_slice %257 {offsets = [0, 0], sizes = [8, 256], strides = [1, 1]} : vector<8x1024xf32> to vector<8x256xf32>
    %259 = arith.negf %258 : vector<8x256xf32>
    %260 = math.exp %259 : vector<8x256xf32>
    %cst_76 = arith.constant 1.000000e+00 : f32
    %261 = vector.broadcast %cst_76 : f32 to vector<8x256xf32>
    %262 = arith.addf %261, %260 : vector<8x256xf32>
    %263 = arith.divf %261, %262 : vector<8x256xf32>
    %264 = vector.extract_strided_slice %257 {offsets = [0, 256], sizes = [8, 256], strides = [1, 1]} : vector<8x1024xf32> to vector<8x256xf32>
    %265 = arith.negf %264 : vector<8x256xf32>
    %266 = math.exp %265 : vector<8x256xf32>
    %cst_77 = arith.constant 1.000000e+00 : f32
    %267 = vector.broadcast %cst_77 : f32 to vector<8x256xf32>
    %268 = arith.addf %267, %266 : vector<8x256xf32>
    %269 = arith.divf %267, %268 : vector<8x256xf32>
    %270 = vector.extract_strided_slice %257 {offsets = [0, 512], sizes = [8, 256], strides = [1, 1]} : vector<8x1024xf32> to vector<8x256xf32>
    %271 = math.tanh %270 : vector<8x256xf32>
    %272 = vector.extract_strided_slice %257 {offsets = [0, 768], sizes = [8, 256], strides = [1, 1]} : vector<8x1024xf32> to vector<8x256xf32>
    %273 = arith.negf %272 : vector<8x256xf32>
    %274 = math.exp %273 : vector<8x256xf32>
    %cst_78 = arith.constant 1.000000e+00 : f32
    %275 = vector.broadcast %cst_78 : f32 to vector<8x256xf32>
    %276 = arith.addf %275, %274 : vector<8x256xf32>
    %277 = arith.divf %275, %276 : vector<8x256xf32>
    %278 = arith.mulf %269, %246 : vector<8x256xf32>
    %279 = arith.mulf %263, %271 : vector<8x256xf32>
    %280 = arith.addf %278, %279 : vector<8x256xf32>
    %281 = math.tanh %280 : vector<8x256xf32>
    %282 = arith.mulf %277, %281 : vector<8x256xf32>
    %283 = arith.index_cast %c7_i32 : i32 to index
    %c0_79 = arith.constant 0 : index
    %c0_80 = arith.constant 0 : index
    %284 = vector.load %arg15[%283, %c0_79, %c0_80] : memref<8x8x256xf32, #tpu.memory_space<vmem>>, vector<1x8x256xf32>
    %285 = vector.shape_cast %284 : vector<1x8x256xf32> to vector<8x256xf32>
    %286 = vector.shape_cast %282 : vector<8x256xf32> to vector<1x8x256xf32>
    tpu.vector_store %arg15[%283, %c0_79, %c0_80], %286 {strides = array<i32>} : memref<8x8x256xf32, #tpu.memory_space<vmem>>, vector<1x8x256xf32>,
    %c8_i32 = arith.constant 8 : i32
    %c0_81 = arith.constant 0 : index
    %c0_82 = arith.constant 0 : index
    %287 = vector.load %arg12[%c0_81, %c0_82] : memref<8x256xf32, #tpu.memory_space<vmem>>, vector<8x256xf32>
    tpu.vector_store %arg12[%c0_81, %c0_82], %282 {strides = array<i32>} : memref<8x256xf32, #tpu.memory_space<vmem>>, vector<8x256xf32>,
    %c0_83 = arith.constant 0 : index
    %c0_84 = arith.constant 0 : index
    %288 = vector.load %arg13[%c0_83, %c0_84] : memref<8x256xf32, #tpu.memory_space<vmem>>, vector<8x256xf32>
    tpu.vector_store %arg13[%c0_83, %c0_84], %280 {strides = array<i32>} : memref<8x256xf32, #tpu.memory_space<vmem>>, vector<8x256xf32>,
    %c0_85 = arith.constant 0 : index
    %c0_86 = arith.constant 0 : index
    %c0_87 = arith.constant 0 : index
    %289 = vector.load %arg15[%c0_85, %c0_86, %c0_87] : memref<8x8x256xf32, #tpu.memory_space<vmem>>, vector<8x8x256xf32>
    %290 = vector.shape_cast %289 : vector<8x8x256xf32> to vector<64x256xf32>
    %c0_88 = arith.constant 0 : index
    %c0_89 = arith.constant 0 : index
    %291 = vector.load %arg7[%c0_88, %c0_89] : memref<256x384xf32, #tpu.memory_space<vmem>>, vector<256x384xf32>
    %cst_90 = arith.constant dense<0.000000e+00> : vector<64x384xf32>
    %292 = tpu.matmul %290, %291, %cst_90 {dimension_numbers = #tpu.dot_dimension_numbers<[1], [0], [0], [1], [0, 0, 1, 1], [], []>} : vector<64x256xf32>, vector<256x384xf32>, vector<64x384xf32> -> vector<64x384xf32>
    %c0_91 = arith.constant 0 : index
    %c0_92 = arith.constant 0 : index
    %293 = vector.load %arg8[%c0_91, %c0_92] : memref<1x384xf32, #tpu.memory_space<vmem>>, vector<1x384xf32>
    %294 = vector.broadcast %293 : vector<1x384xf32> to vector<64x384xf32>
    %295 = arith.addf %292, %294 : vector<64x384xf32>
    %296 = vector.shape_cast %295 : vector<64x384xf32> to vector<8x8x384xf32>
    %c0_93 = arith.constant 0 : index
    %c0_94 = arith.constant 0 : index
    %c0_95 = arith.constant 0 : index
    %297 = vector.load %arg9[%c0_93, %c0_94, %c0_95] : memref<8x8x384xf32, #tpu.memory_space<vmem>>, vector<8x8x384xf32>
    tpu.vector_store %arg9[%c0_93, %c0_94, %c0_95], %296 {strides = array<i32>} : memref<8x8x384xf32, #tpu.memory_space<vmem>>, vector<8x8x384xf32>,
    %c0_i32_96 = arith.constant 0 : i32
    %298 = arith.cmpi eq, %arg0, %c0_i32_96 : i32
    %299 = arith.extui %298 : i1 to i32
    %c0_i32_97 = arith.constant 0 : i32
    %300 = arith.cmpi ne, %299, %c0_i32_97 : i32
    scf.if %300 {
      %c0_98 = arith.constant 0 : index
      %c0_99 = arith.constant 0 : index
      %301 = vector.load %arg12[%c0_98, %c0_99] : memref<8x256xf32, #tpu.memory_space<vmem>>, vector<8x256xf32>
      %c0_100 = arith.constant 0 : index
      %c0_101 = arith.constant 0 : index
      %302 = vector.load %arg10[%c0_100, %c0_101] : memref<8x256xf32, #tpu.memory_space<vmem>>, vector<8x256xf32>
      tpu.vector_store %arg10[%c0_100, %c0_101], %301 {strides = array<i32>} : memref<8x256xf32, #tpu.memory_space<vmem>>, vector<8x256xf32>,
      %c0_102 = arith.constant 0 : index
      %c0_103 = arith.constant 0 : index
      %303 = vector.load %arg13[%c0_102, %c0_103] : memref<8x256xf32, #tpu.memory_space<vmem>>, vector<8x256xf32>
      %c0_104 = arith.constant 0 : index
      %c0_105 = arith.constant 0 : index
      %304 = vector.load %arg11[%c0_104, %c0_105] : memref<8x256xf32, #tpu.memory_space<vmem>>, vector<8x256xf32>
      tpu.vector_store %arg11[%c0_104, %c0_105], %303 {strides = array<i32>} : memref<8x256xf32, #tpu.memory_space<vmem>>, vector<8x256xf32>,
    } else {
    }
    return
  }
  func.func @transform_0(%arg0: i32) -> (i32, i32, i32) {
    %c0_i32 = arith.constant 0 : i32
    %c0_i32_0 = arith.constant 0 : i32
    %c0_i32_1 = arith.constant 0 : i32
    return %arg0, %c0_i32, %c0_i32_0 : i32, i32, i32
  }
  func.func @transform_1(%arg0: i32) -> (i32, i32) {
    %c0_i32 = arith.constant 0 : i32
    %c0_i32_0 = arith.constant 0 : i32
    %c0_i32_1 = arith.constant 0 : i32
    return %c0_i32, %c0_i32_0 : i32, i32
  }
  func.func @transform_2(%arg0: i32) -> (i32, i32) {
    %c0_i32 = arith.constant 0 : i32
    %c0_i32_0 = arith.constant 0 : i32
    %c0_i32_1 = arith.constant 0 : i32
    return %c0_i32, %c0_i32_0 : i32, i32
  }
  func.func @transform_3(%arg0: i32) -> (i32, i32) {
    %c0_i32 = arith.constant 0 : i32
    %c0_i32_0 = arith.constant 0 : i32
    %c0_i32_1 = arith.constant 0 : i32
    return %c0_i32, %c0_i32_0 : i32, i32
  }
  func.func @transform_4(%arg0: i32) -> (i32, i32) {
    %c0_i32 = arith.constant 0 : i32
    %c0_i32_0 = arith.constant 0 : i32
    %c0_i32_1 = arith.constant 0 : i32
    return %c0_i32, %c0_i32_0 : i32, i32
  }
  func.func @transform_5(%arg0: i32) -> (i32, i32) {
    %c0_i32 = arith.constant 0 : i32
    %c0_i32_0 = arith.constant 0 : i32
    %c0_i32_1 = arith.constant 0 : i32
    return %c0_i32, %c0_i32_0 : i32, i32
  }
  func.func @transform_6(%arg0: i32) -> (i32, i32) {
    %c0_i32 = arith.constant 0 : i32
    %c0_i32_0 = arith.constant 0 : i32
    %c0_i32_1 = arith.constant 0 : i32
    return %c0_i32, %c0_i32_0 : i32, i32
  }
  func.func @transform_7(%arg0: i32) -> (i32, i32) {
    %c0_i32 = arith.constant 0 : i32
    %c0_i32_0 = arith.constant 0 : i32
    %c0_i32_1 = arith.constant 0 : i32
    return %c0_i32, %c0_i32_0 : i32, i32
  }
  func.func @transform_8(%arg0: i32) -> (i32, i32, i32) {
    %c0_i32 = arith.constant 0 : i32
    %c0_i32_0 = arith.constant 0 : i32
    %c0_i32_1 = arith.constant 0 : i32
    return %arg0, %c0_i32, %c0_i32_0 : i32, i32, i32
  }
  func.func @transform_9(%arg0: i32) -> (i32, i32) {
    %c0_i32 = arith.constant 0 : i32
    %c0_i32_0 = arith.constant 0 : i32
    %c0_i32_1 = arith.constant 0 : i32
    return %c0_i32, %c0_i32_0 : i32, i32
  }
  func.func @transform_10(%arg0: i32) -> (i32, i32) {
    %c0_i32 = arith.constant 0 : i32
    %c0_i32_0 = arith.constant 0 : i32
    %c0_i32_1 = arith.constant 0 : i32
    return %c0_i32, %c0_i32_0 : i32, i32
  }
}

</mosaic_0001>

<bundles_post_ra>
// kernel: tpu_custom_call.1
= control target key start
LH: loop header
LB: loop body
LE: loop exit
PB: predicated region body
PF: predicated region fallthrough
CT: control target
= control target key end

     0   :  { %16 = vsyncpa [#allocation7], 0  ;;  %s9180_s0 = inlined_call_operand.hbm [shape: f32[8,8,64], index: 0, kind: input, shape index: {}]   ;;  %s9181_s1 = inlined_call_operand.hbm [shape: f32[8,256], index: 1, kind: input, shape index: {}]   ;;  %s9182_s2 = inlined_call_operand.hbm [shape: f32[8,256], index: 2, kind: input, shape index: {}]   ;;  %s9183_s3 = inlined_call_operand.hbm [shape: f32[64,1024], index: 3, kind: input, shape index: {}]   ;;  %s9184_s4 = inlined_call_operand.vmem [shape: f32[1,1024], index: 4, kind: input, shape index: {}]   ;;  %s9185_s5 = inlined_call_operand.hbm [shape: f32[256,1024], index: 5, kind: input, shape index: {}]   ;;  %s9186_s6 = inlined_call_operand.hbm [shape: f32[256,384], index: 6, kind: input, shape index: {}]   ;;  %s9187_s7 = inlined_call_operand.vmem [shape: f32[1,384], index: 7, kind: input, shape index: {}]   ;;  %s9188_s8 = inlined_call_operand.hbm [shape: f32[8,8,384], index: 8, kind: output, shape index: {0}]   ;;  %s9189_s9 = inlined_call_operand.hbm [shape: f32[8,256], index: 9, kind: output, shape index: {1}]   ;;  %s9190_s10 = inlined_call_operand.hbm [shape: f32[8,256], index: 10, kind: output, shape index: {2}]  }
   0x1   :  { %17 = vsyncpa [#allocation10], 0 }
   0x2   :  { %18 = vsyncpa [#allocation13], 0 }
   0x3   :  { %19 = vsyncpa [#allocation16], 0 }
   0x4   :  { %20 = vsyncpa [#allocation8], 0 }
   0x5   :  { %21 = vsyncpa [#allocation19], 0  ;;  %s7248_s13 = smov [#allocation9]   ;;  %s7249_s15 = smov [#allocation12]  }
   0x6   :  { %s40_s14 = sshll.u32 %s7248_s13, 4  ;;  %s59_s16 = sshll.u32 %s7249_s15, 4  ;;  %s41_s14 = int_to_ptr.vmem [resolvable:$true] %s40_s14  ;;  %s7319_s16 = int_to_ptr.vmem [resolvable:$true] %s59_s16 }
   0x7   :  { %s7038_s19 = scalar_lea.hbm %s9181_s1, 256 }
   0x8   :  { %p7039_p0 = scmp.ne.s32.totalorder %s9181_s1, %s7038_s19  ;;  %p7042_p1 = scmp.lt.u32.totalorder %s7038_s19, %s9181_s1 }
   0xa   :  { %p7044_p2 = pnand %p7042_p1, %p7039_p0 }
   0xc   :  { %7047 = shalt.err (!%p7044_p2)
}
   0xd   :  { %s7048_s24 = scalar_lea.vmem %s41_s14, 256  ;;  %p7053_p4 = scmp.lt.s32.totalorder %s41_s14, %s41_s14 }
   0xe   :  { %p7049_p3 = scmp.ne.s32.totalorder %s41_s14, %s7048_s24  ;;  %p7054_p5 = scmp.lt.s32.totalorder %s7048_s24, %s7048_s24 }
  0x10   :  { %p7055_p6 = por %p7054_p5, %p7053_p4 }
  0x12   :  { %p7056_p7 = pnand %p7055_p6, %p7049_p3 }
  0x14   :  { %7059 = shalt.err (!%p7056_p7)
}
  0x15   :  { %43 = dma.hbm_to_vmem [thread:$0]  %s9181_s1, 256, %s41_s14, [#allocation10]  }
  0x16   :  { %s7060_s29 = scalar_lea.hbm %s9183_s3, 8192 }
  0x17   :  { %p7061_p8 = scmp.ne.s32.totalorder %s9183_s3, %s7060_s29  ;;  %p7064_p9 = scmp.lt.u32.totalorder %s7060_s29, %s9183_s3 }
  0x19   :  { %p7066_p10 = pnand %p7064_p9, %p7061_p8 }
  0x1b   :  { %7069 = shalt.err (!%p7066_p10)
}
  0x1c   :  { %s7070_s15 = scalar_lea.vmem %s7319_s16, 8192  ;;  %p7075_p12 = scmp.lt.s32.totalorder %s7319_s16, %s7319_s16 }
  0x1d   :  { %p7071_p11 = scmp.ne.s32.totalorder %s7319_s16, %s7070_s15  ;;  %p7076_p13 = scmp.lt.s32.totalorder %s7070_s15, %s7070_s15 }
  0x1f   :  { %p7077_p0 = por %p7076_p13, %p7075_p12 }
  0x21   :  { %p7078_p1 = pnand %p7077_p0, %p7071_p11 }
  0x23   :  { %7081 = shalt.err (!%p7078_p1)
}
  0x24   :  { %s7250_s1 = smov 1024   ;;  %s7251_s14 = smov 64  }
  0x25   :  { %65 = dma.hbm_to_vmem [thread:$0]  %s9183_s3, 8192, %s7319_s16, [#allocation13], %s7250_s1, %s7250_s1, %s7251_s14  }
  0x26   :  { %s7252_s19 = smov [#allocation6]   ;;  %s7082_s23 = scalar_lea.hbm %s9180_s0, 1024 }
  0x27   :  { %s27_s20 = sshll.u32 %s7252_s19, 4  ;;  %p7083_p2 = scmp.ne.s32.totalorder %s9180_s0, %s7082_s23  ;;  %s28_s20 = int_to_ptr.vmem [resolvable:$true] %s27_s20 }
  0x28   :  { %p7086_p3 = scmp.lt.u32.totalorder %s7082_s23, %s9180_s0 }
  0x2a   :  { %p7088_p4 = pnand %p7086_p3, %p7083_p2 }
  0x2c   :  { %7091 = shalt.err (!%p7088_p4)
}
  0x2d   :  { %s7092_s28 = scalar_lea.vmem %s28_s20, 1024  ;;  %p7097_p6 = scmp.lt.s32.totalorder %s28_s20, %s28_s20 }
  0x2e   :  { %p7093_p5 = scmp.ne.s32.totalorder %s28_s20, %s7092_s28  ;;  %p7098_p7 = scmp.lt.s32.totalorder %s7092_s28, %s7092_s28 }
  0x30   :  { %p7099_p8 = por %p7098_p7, %p7097_p6 }
  0x32   :  { %p7100_p9 = pnand %p7099_p8, %p7093_p5 }
  0x34   :  { %7103 = shalt.err (!%p7100_p9)
}
  0x35   :  { %s7253_s3 = smov 128   ;;  %s7254_s16 = smov 8  }
  0x36   :  { %33 = dma.hbm_to_vmem [thread:$0]  %s9180_s0, 1024, %s28_s20, [#allocation7], %s7253_s3, %s7253_s3, %s7254_s16  }
  0x37   :  { %s7255_s11 = smov [#allocation11]   ;;  %s7256_s13 = smov [#allocation14]  }
  0x38   :  { %s50_s12 = sshll.u32 %s7255_s11, 4  ;;  %s73_s15 = sshll.u32 %s7256_s13, 4  ;;  %s51_s12 = int_to_ptr.vmem [resolvable:$true] %s50_s12  ;;  %s74_s15 = int_to_ptr.vmem [resolvable:$true] %s73_s15 }
  0x39   :  { %s7104_s19 = scalar_lea.hbm %s9182_s2, 256 }
  0x3a   :  { %p7105_p10 = scmp.ne.s32.totalorder %s9182_s2, %s7104_s19  ;;  %p7108_p11 = scmp.lt.u32.totalorder %s7104_s19, %s9182_s2 }
  0x3c   :  { %p7110_p12 = pnand %p7108_p11, %p7105_p10 }
  0x3e   :  { %7113 = shalt.err (!%p7110_p12)
}
  0x3f   :  { %s7114_s0 = scalar_lea.vmem %s51_s12, 256  ;;  %p7119_p0 = scmp.lt.s32.totalorder %s51_s12, %s51_s12 }
  0x40   :  { %p7115_p13 = scmp.ne.s32.totalorder %s51_s12, %s7114_s0  ;;  %p7120_p1 = scmp.lt.s32.totalorder %s7114_s0, %s7114_s0 }
  0x42   :  { %p7121_p2 = por %p7120_p1, %p7119_p0 }
  0x44   :  { %p7122_p3 = pnand %p7121_p2, %p7115_p13 }
  0x46   :  { %7125 = shalt.err (!%p7122_p3)
}
  0x47   :  { %53 = dma.hbm_to_vmem [thread:$0]  %s9182_s2, 256, %s51_s12, [#allocation10]  }
  0x48   :  { %s7126_s28 = scalar_lea.hbm %s9185_s5, 32768 }
  0x49   :  { %p7127_p4 = scmp.ne.s32.totalorder %s9185_s5, %s7126_s28  ;;  %p7130_p5 = scmp.lt.u32.totalorder %s7126_s28, %s9185_s5 }
  0x4b   :  { %p7132_p6 = pnand %p7130_p5, %p7127_p4 }
  0x4d   :  { %7135 = shalt.err (!%p7132_p6)
}
  0x4e   :  { %s7136_s11 = scalar_lea.vmem %s74_s15, 32768  ;;  %p7141_p8 = scmp.lt.s32.totalorder %s74_s15, %s74_s15 }
  0x4f   :  { %p7137_p7 = scmp.ne.s32.totalorder %s74_s15, %s7136_s11  ;;  %p7142_p9 = scmp.lt.s32.totalorder %s7136_s11, %s7136_s11 }
  0x51   :  { %p7143_p10 = por %p7142_p9, %p7141_p8 }
  0x53   :  { %p7144_p11 = pnand %p7143_p10, %p7137_p7 }
  0x55   :  { %7147 = shalt.err (!%p7144_p11)
}
  0x56   :  { %79 = dma.hbm_to_vmem [thread:$0]  %s9185_s5, 32768, %s74_s15, [#allocation13], %s7250_s1, %s7250_s1, %s7251_s14  }
  0x57   :  { %s7257_s13 = smov [#allocation15]   ;;  %s7148_s21 = scalar_lea.hbm %s9186_s6, 12288 }
  0x58   :  { %s85_s17 = sshll.u32 %s7257_s13, 4  ;;  %p7149_p12 = scmp.ne.s32.totalorder %s9186_s6, %s7148_s21  ;;  %s86_s17 = int_to_ptr.vmem [resolvable:$true] %s85_s17 }
  0x59   :  { %p7152_p13 = scmp.lt.u32.totalorder %s7148_s21, %s9186_s6 }
  0x5b   :  { %p7154_p0 = pnand %p7152_p13, %p7149_p12 }
  0x5d   :  { %7157 = shalt.err (!%p7154_p0)
}
  0x5e   :  { %s7158_s20 = scalar_lea.vmem %s86_s17, 12288  ;;  %p7163_p2 = scmp.lt.s32.totalorder %s86_s17, %s86_s17 }
  0x5f   :  { %p7159_p1 = scmp.ne.s32.totalorder %s86_s17, %s7158_s20  ;;  %p7164_p3 = scmp.lt.s32.totalorder %s7158_s20, %s7158_s20 }
  0x61   :  { %p7165_p4 = por %p7164_p3, %p7163_p2 }
  0x63   :  { %p7166_p5 = pnand %p7165_p4, %p7159_p1 }
  0x65   :  { %7169 = shalt.err (!%p7166_p5)
}
  0x66   :  { %s7258_s5 = smov 384   ;;  %s7259_s1 = smov 24  }
  0x67   :  { %91 = dma.hbm_to_vmem [thread:$0]  %s9186_s6, 12288, %s86_s17, [#allocation16], %s7258_s5, %s7258_s5, %s7259_s1  }
  0x68   :  { %7236 = dma.done.wait [#allocation7], 1024  }
  0x69   :  { %7237 = vsyncadd [#allocation7], 4294966272 }
  0x6a   :  { %7238 = dma.done.wait [#allocation10], 512  }
  0x6b   :  { %7239 = vsyncadd [#allocation10], 4294966784 }
  0x6c   :  { %7240 = dma.done.wait [#allocation13], 40960  }
  0x6d   :  { %7241 = vsyncadd [#allocation13], 4294926336 }
  0x6e   :  { %7242 = dma.done.wait [#allocation16], 12288  }
  0x6f   :  { %7243 = vsyncadd [#allocation16], 4294955008  ;;  %v9191_v0 = vmov 0.0   ;;  %v133_v1 = vld [vmem:[#allocation12 + $0x8] sm:$0xff]  ;;  %v132_v3 = vld [vmem:[#allocation12] sm:$0xff]  ;;  %vm238_vm0 = vcmask 523264  }
  0x70   :  { %351 = vmatprep.mubr.f32.mxu1 %v9191_v0  ;;  %327 = vmatprep.mubr.f32.mxu0 %v9191_v0  ;;  %v141_v2 = vld [vmem:[#allocation12 + $0x48] sm:$0xff]  ;;  %v140_v5 = vld [vmem:[#allocation12 + $0x40] sm:$0xff]  ;;  %v135_v24 = vld [vmem:[#allocation12 + $0x18] sm:$0xff] }
  0x71   :  { %v4422_v4 = vpack.c.bf16 %v141_v2, %v133_v1  ;;  %v149_v6 = vld [vmem:[#allocation12 + $0x88] sm:$0xff]  ;;  %v4424_v8 = vpack.c.bf16 %v140_v5, %v132_v3  ;;  %v148_v10 = vld [vmem:[#allocation12 + $0x80] sm:$0xff]  ;;  %v143_v25 = vld [vmem:[#allocation12 + $0x58] sm:$0xff] }
  0x72   :  { %v157_v7 = vld [vmem:[#allocation12 + $0xc8] sm:$0xff]  ;;  %v156_v11 = vld [vmem:[#allocation12 + $0xc0] sm:$0xff]  ;;  %v134_v29 = vld [vmem:[#allocation12 + $0x10] sm:$0xff]  ;;  %v4438_v30 = vpack.c.bf16 %v143_v25, %v135_v24 }
  0x73   :  { %v4426_v9 = vpack.c.bf16 %v157_v7, %v149_v6  ;;  %v165_v12 = vld [vmem:[#allocation12 + $0x108] sm:$0xff]  ;;  %4423 = vmatprep.subr.bf16.mxu0 %v4422_v4  ;;  %6630 = vmatprep.subr.bf16.mxu1 %v4422_v4  ;;  %v4428_v14 = vpack.c.bf16 %v156_v11, %v148_v10  ;;  %v164_v16 = vld [vmem:[#allocation12 + $0x100] sm:$0xff]  ;;  %v142_v32 = vld [vmem:[#allocation12 + $0x50] sm:$0xff] }
  0x74   :  { %v173_v13 = vld [vmem:[#allocation12 + $0x148] sm:$0xff]  ;;  %4425 = vmatpush1.bf16.msra.mxu0 %v4424_v8  ;;  %6634 = vmatpush1.bf16.msra.mxu1 %v4424_v8  ;;  %v172_v17 = vld [vmem:[#allocation12 + $0x140] sm:$0xff]  ;;  %v151_v35 = vld [vmem:[#allocation12 + $0x98] sm:$0xff]  ;;  %v4440_v41 = vpack.c.bf16 %v142_v32, %v134_v29 }
  0x75   :  { %4427 = vmatprep.subr.bf16.mxu0 %v4426_v9  ;;  %6631 = vmatprep.subr.bf16.mxu1 %v4426_v9  ;;  %v4430_v15 = vpack.c.bf16 %v173_v13, %v165_v12  ;;  %v181_v18 = vld [vmem:[#allocation12 + $0x188] sm:$0xff]  ;;  %v4432_v20 = vpack.c.bf16 %v172_v17, %v164_v16  ;;  %v180_v22 = vld [vmem:[#allocation12 + $0x180] sm:$0xff]  ;;  %v159_v36 = vld [vmem:[#allocation12 + $0xd8] sm:$0xff] }
  0x76   :  { %v189_v19 = vld [vmem:[#allocation12 + $0x1c8] sm:$0xff]  ;;  %v188_v23 = vld [vmem:[#allocation12 + $0x1c0] sm:$0xff]  ;;  %v150_v43 = vld [vmem:[#allocation12 + $0x90] sm:$0xff]  ;;  %v4442_v47 = vpack.c.bf16 %v159_v36, %v151_v35 }
  0x77   :  { %v4434_v21 = vpack.c.bf16 %v189_v19, %v181_v18  ;;  %v137_v26 = vld [vmem:[#allocation12 + $0x28] sm:$0xff]  ;;  %v4436_v28 = vpack.c.bf16 %v188_v23, %v180_v22  ;;  %v136_v33 = vld [vmem:[#allocation12 + $0x20] sm:$0xff]  ;;  %v158_v44 = vld [vmem:[#allocation12 + $0xd0] sm:$0xff] }
  0x78   :  { %4429 = vmatpush1.bf16.msra.mxu0 %v4428_v14  ;;  %6635 = vmatpush1.bf16.msra.mxu1 %v4428_v14  ;;  %v145_v27 = vld [vmem:[#allocation12 + $0x68] sm:$0xff]  ;;  %v144_v34 = vld [vmem:[#allocation12 + $0x60] sm:$0xff]  ;;  %v167_v49 = vld [vmem:[#allocation12 + $0x118] sm:$0xff]  ;;  %v4444_v55 = vpack.c.bf16 %v158_v44, %v150_v43 }
  0x79   :  { %4431 = vmatprep.subr.bf16.mxu0 %v4430_v15  ;;  %6632 = vmatprep.subr.bf16.mxu1 %v4430_v15  ;;  %v4454_v31 = vpack.c.bf16 %v145_v27, %v137_v26  ;;  %v153_v37 = vld [vmem:[#allocation12 + $0xa8] sm:$0xff]  ;;  %v7409_v39 = vld [vmem:[#allocation6 + $0x20] sm:$0xff]  ;;  %v4456_v42 = vpack.c.bf16 %v144_v34, %v136_v33  ;;  %v175_v50 = vld [vmem:[#allocation12 + $0x158] sm:$0xff] }
  0x7a   :  { %v161_v38 = vld [vmem:[#allocation12 + $0xe8] sm:$0xff]  ;;  %v7411_v40 = vld [vmem:[#allocation6] sm:$0xff]  ;;  %v166_v57 = vld [vmem:[#allocation12 + $0x110] sm:$0xff]  ;;  %v4446_v61 = vpack.c.bf16 %v175_v50, %v167_v49 }
  0x7b   :  { %v152_v45 = vld [vmem:[#allocation12 + $0xa0] sm:$0xff]  ;;  %v4458_v48 = vpack.c.bf16 %v161_v38, %v153_v37  ;;  %v169_v51 = vld [vmem:[#allocation12 + $0x128] sm:$0xff]  ;;  %v174_v58 = vld [vmem:[#allocation12 + $0x150] sm:$0xff] }
  0x7c   :  { %4433 = vmatpush1.bf16.msra.mxu0 %v4432_v20  ;;  %6636 = vmatpush1.bf16.msra.mxu1 %v4432_v20  ;;  %v160_v46 = vld [vmem:[#allocation12 + $0xe0] sm:$0xff]  ;;  %v177_v52 = vld [vmem:[#allocation12 + $0x168] sm:$0xff]  ;;  %v183_v63 = vld [vmem:[#allocation12 + $0x198] sm:$0xff]  ;;  %v4448_v6 = vpack.c.bf16 %v174_v58, %v166_v57 }
  0x7d   :  { %4435 = vmatprep.subr.bf16.mxu0 %v4434_v21  ;;  %6633 = vmatprep.subr.bf16.mxu1 %v4434_v21  ;;  %v7417_v53 = vld [vmem:[#allocation6 + $0x28] sm:$0xff]  ;;  %v4460_v56 = vpack.c.bf16 %v160_v46, %v152_v45  ;;  %v168_v59 = vld [vmem:[#allocation12 + $0x120] sm:$0xff]  ;;  %v4462_v62 = vpack.c.bf16 %v177_v52, %v169_v51  ;;  %v191_v1 = vld [vmem:[#allocation12 + $0x1d8] sm:$0xff] }
  0x7e   :  { %v7419_v54 = vld [vmem:[#allocation6 + $0x8] sm:$0xff]  ;;  %v176_v60 = vld [vmem:[#allocation12 + $0x160] sm:$0xff]  ;;  %v7427_v4 = vld [vmem:[#allocation6 + $0x30] sm:$0xff]  ;;  %v4450_v12 = vpack.c.bf16 %v191_v1, %v183_v63 }
  0x7f   :  { %v185_v2 = vld [vmem:[#allocation12 + $0x1a8] sm:$0xff]  ;;  %v7429_v5 = vld [vmem:[#allocation6 + $0x10] sm:$0xff]  ;;  %v4464_v7 = vpack.c.bf16 %v176_v60, %v168_v59  ;;  %v184_v10 = vld [vmem:[#allocation12 + $0x1a0] sm:$0xff] }
  0x80   :  { %4437 = vmatpush1.bf16.msra.mxu0 %v4436_v28  ;;  %6637 = vmatpush1.bf16.msra.mxu1 %v4436_v28  ;;  %v193_v3 = vld [vmem:[#allocation12 + $0x1e8] sm:$0xff]  ;;  %v182_v8 = vld [vmem:[#allocation12 + $0x190] sm:$0xff]  ;;  %v192_v11 = vld [vmem:[#allocation12 + $0x1e0] sm:$0xff] }
  0x81   :  { %4439 = vmatprep.subr.bf16.mxu1 %v4438_v30  ;;  %4455 = vmatprep.subr.bf16.mxu0 %v4454_v31  ;;  %v190_v9 = vld [vmem:[#allocation12 + $0x1d0] sm:$0xff]  ;;  %v4466_v13 = vpack.c.bf16 %v193_v3, %v185_v2  ;;  %v139_v14 = vld [vmem:[#allocation12 + $0x38] sm:$0xff]  ;;  %v780_v16 = vld [vmem:[#allocation14 + $0x8] sm:$0xff]  ;;  %v4468_v21 = vpack.c.bf16 %v192_v11, %v184_v10 }
  0x82   :  { %v147_v15 = vld [vmem:[#allocation12 + $0x78] sm:$0xff]  ;;  %v788_v17 = vld [vmem:[#allocation14 + $0x48] sm:$0xff]  ;;  %v4452_v20 = vpack.c.bf16 %v190_v9, %v182_v8  ;;  %v138_v22 = vld [vmem:[#allocation12 + $0x30] sm:$0xff] }
  0x83   :  { %4290 = vmatmul.mubr.msk.f32.vlgmr.msra.gmra.mrb[0].mxu1 %vm238_vm0, %v7409_v39  ;;  %4286 = vmatmul.mubr.msk.f32.vlgmr.msra.gmra.mrb[0].mxu0 %vm238_vm0, %v7411_v40  ;;  %v7437_v18 = vld [vmem:[#allocation6 + $0x38] sm:$0xff]  ;;  %v146_v23 = vld [vmem:[#allocation12 + $0x70] sm:$0xff]  ;;  %v779_v24 = vld [vmem:[#allocation14] sm:$0xff]  ;;  %v4470_v26 = vpack.c.bf16 %v147_v15, %v139_v14  ;;  %v7443_v27 = vpack.c.bf16 %v788_v17, %v780_v16 }
  0x84   :  { %4441 = vmatpush1.bf16.msra.mxu1 %v4440_v41  ;;  %4457 = vmatpush1.bf16.msra.mxu0 %v4456_v42  ;;  %v7439_v19 = vld [vmem:[#allocation6 + $0x18] sm:$0xff]  ;;  %v787_v25 = vld [vmem:[#allocation14 + $0x40] sm:$0xff]  ;;  %v796_v28 = vld [vmem:[#allocation14 + $0x88] sm:$0xff]  ;;  %v4472_v32 = vpack.c.bf16 %v146_v23, %v138_v22 }
  0x85   :  { %357 = vmatprep.mubr.f32.mxu1 %v9191_v0  ;;  %333 = vmatprep.mubr.f32.mxu0 %v9191_v0  ;;  %9502 = vst [vmem:[#allocation27_spill] sm:$0xff] %v7443_v27  ;;  %v804_v29 = vld [vmem:[#allocation14 + $0xc8] sm:$0xff]  ;;  %v155_v30 = vld [vmem:[#allocation12 + $0xb8] sm:$0xff]  ;;  %v7449_v33 = vpack.c.bf16 %v787_v25, %v779_v24  ;;  %v795_v35 = vld [vmem:[#allocation14 + $0x80] sm:$0xff] }
  0x86   :  { %4443 = vmatprep.subr.bf16.mxu1 %v4442_v47  ;;  %4459 = vmatprep.subr.bf16.mxu0 %v4458_v48  ;;  %v163_v31 = vld [vmem:[#allocation12 + $0xf8] sm:$0xff]  ;;  %v7453_v34 = vpack.c.bf16 %v804_v29, %v796_v28  ;;  %v803_v36 = vld [vmem:[#allocation14 + $0xc0] sm:$0xff]  ;;  %v812_v37 = vld [vmem:[#allocation14 + $0x108] sm:$0xff] }
  0x87   :  { %4291 = vmatmul.mubr.msk.f32.gmra.mrb[2].mxu1 %vm238_vm0, %v7417_v53  ;;  %4287 = vmatmul.mubr.msk.f32.gmra.mrb[2].mxu0 %vm238_vm0, %v7419_v54  ;;  %9503 = vst [vmem:[#allocation28_spill] sm:$0xff] %v7449_v33  ;;  %v4474_v38 = vpack.c.bf16 %v163_v31, %v155_v30  ;;  %v820_v41 = vld [vmem:[#allocation14 + $0x148] sm:$0xff]  ;;  %v154_v42 = vld [vmem:[#allocation12 + $0xb0] sm:$0xff]  ;;  %v171_v44 = vld [vmem:[#allocation12 + $0x138] sm:$0xff]  ;;  %v7461_v46 = vpack.c.bf16 %v803_v36, %v795_v35 }
  0x88   :  { %4445 = vmatpush1.bf16.msra.mxu1 %v4444_v55  ;;  %4461 = vmatpush1.bf16.msra.mxu0 %v4460_v56  ;;  %9504 = vst [vmem:[#allocation29_spill] sm:$0xff] %v7453_v34  ;;  %v162_v43 = vld [vmem:[#allocation12 + $0xf0] sm:$0xff]  ;;  %v179_v45 = vld [vmem:[#allocation12 + $0x178] sm:$0xff]  ;;  %v7465_v47 = vpack.c.bf16 %v820_v41, %v812_v37  ;;  %v811_v49 = vld [vmem:[#allocation14 + $0x100] sm:$0xff] }
  0x89   :  { %363 = vmatprep.mubr.f32.mxu1 %v9191_v0  ;;  %339 = vmatprep.mubr.f32.mxu0 %v9191_v0  ;;  %9505 = vst [vmem:[#allocation30_spill] sm:$0xff] %v7461_v46  ;;  %v4476_v48 = vpack.c.bf16 %v162_v43, %v154_v42  ;;  %v819_v50 = vld [vmem:[#allocation14 + $0x140] sm:$0xff]  ;;  %v828_v51 = vld [vmem:[#allocation14 + $0x188] sm:$0xff]  ;;  %v4478_v55 = vpack.c.bf16 %v179_v45, %v171_v44  ;;  %v170_v56 = vld [vmem:[#allocation12 + $0x130] sm:$0xff] }
  0x8a   :  { %4447 = vmatprep.subr.bf16.mxu1 %v4446_v61  ;;  %4463 = vmatprep.subr.bf16.mxu0 %v4462_v62  ;;  %9506 = vst [vmem:[#allocation31_spill] sm:$0xff] %v7465_v47  ;;  %v836_v52 = vld [vmem:[#allocation14 + $0x1c8] sm:$0xff]  ;;  %v178_v57 = vld [vmem:[#allocation12 + $0x170] sm:$0xff]  ;;  %v187_v58 = vld [vmem:[#allocation12 + $0x1b8] sm:$0xff]  ;;  %v7474_v60 = vpack.c.bf16 %v819_v50, %v811_v49 }
  0x8b   :  { %4292 = vmatmul.mubr.msk.f32.gmra.mrb[4].mxu1 %vm238_vm0, %v7427_v4  ;;  %4288 = vmatmul.mubr.msk.f32.gmra.mrb[4].mxu0 %vm238_vm0, %v7429_v5  ;;  %v195_v59 = vld [vmem:[#allocation12 + $0x1f8] sm:$0xff]  ;;  %v7477_v61 = vpack.c.bf16 %v836_v52, %v828_v51  ;;  %v827_v62 = vld [vmem:[#allocation14 + $0x180] sm:$0xff]  ;;  %v844_v1 = vld [vmem:[#allocation14 + $0x208] sm:$0xff]  ;;  %v4480_v2 = vpack.c.bf16 %v178_v57, %v170_v56 }
  0x8c   :  { %4449 = vmatpush1.bf16.msra.mxu1 %v4448_v6  ;;  %4465 = vmatpush1.bf16.msra.mxu0 %v4464_v7  ;;  %9507 = vst [vmem:[#allocation32_spill] sm:$0xff] %v7474_v60  ;;  %v835_v63 = vld [vmem:[#allocation14 + $0x1c0] sm:$0xff]  ;;  %v852_v3 = vld [vmem:[#allocation14 + $0x248] sm:$0xff]  ;;  %v4482_v6 = vpack.c.bf16 %v195_v59, %v187_v58  ;;  %v186_v7 = vld [vmem:[#allocation12 + $0x1b0] sm:$0xff] }
  0x8d   :  { %369 = vmatprep.mubr.f32.mxu1 %v9191_v0  ;;  %345 = vmatprep.mubr.f32.mxu0 %v9191_v0  ;;  %9508 = vst [vmem:[#allocation33_spill] sm:$0xff] %v7477_v61  ;;  %v194_v8 = vld [vmem:[#allocation12 + $0x1f0] sm:$0xff]  ;;  %v782_v9 = vld [vmem:[#allocation14 + $0x18] sm:$0xff]  ;;  %v7486_v11 = vpack.c.bf16 %v835_v63, %v827_v62  ;;  %v851_v14 = vld [vmem:[#allocation14 + $0x240] sm:$0xff] }
  0x8e   :  { %4451 = vmatprep.subr.bf16.mxu1 %v4450_v12  ;;  %4467 = vmatprep.subr.bf16.mxu0 %v4466_v13  ;;  %v790_v10 = vld [vmem:[#allocation14 + $0x58] sm:$0xff]  ;;  %v7489_v12 = vpack.c.bf16 %v852_v3, %v844_v1  ;;  %v843_v13 = vld [vmem:[#allocation14 + $0x200] sm:$0xff]  ;;  %v4484_v15 = vpack.c.bf16 %v194_v8, %v186_v7  ;;  %v860_v16 = vld [vmem:[#allocation14 + $0x288] sm:$0xff] }
  0x8f   :  { %4293 = vmatmul.mubr.msk.f32.gmra.mrb[6].mxu1 %vm238_vm0, %v7437_v18  ;;  %4289 = vmatmul.mubr.msk.f32.gmra.mrb[6].mxu0 %vm238_vm0, %v7439_v19  ;;  %9509 = vst [vmem:[#allocation34_spill] sm:$0xff] %v7486_v11  ;;  %v868_v17 = vld [vmem:[#allocation14 + $0x2c8] sm:$0xff]  ;;  %v859_v23 = vld [vmem:[#allocation14 + $0x280] sm:$0xff]  ;;  %v781_v45 = vld [vmem:[#allocation14 + $0x10] sm:$0xff] }
  0x90   :  { %4453 = vmatpush1.bf16.msra.mxu1 %v4452_v20  ;;  %4469 = vmatpush1.bf16.msra.mxu0 %v4468_v21  ;;  %9510 = vst [vmem:[#allocation35_spill] sm:$0xff] %v7489_v12  ;;  %v7491_v20 = vpack.c.bf16 %v790_v10, %v782_v9  ;;  %v7500_v21 = vpack.c.bf16 %v851_v14, %v843_v13  ;;  %v867_v24 = vld [vmem:[#allocation14 + $0x2c0] sm:$0xff]  ;;  %v876_v25 = vld [vmem:[#allocation14 + $0x308] sm:$0xff]  ;;  %v798_v52 = vld [vmem:[#allocation14 + $0x98] sm:$0xff] }
  0x91   :  { %440 = vmatprep.mubr.f32.mxu1 %v9191_v0  ;;  %553 = vmatprep.mubr.f32.mxu0 %v9191_v0  ;;  %v7503_v22 = vpack.c.bf16 %v868_v17, %v860_v16  ;;  %v7513_v28 = vpack.c.bf16 %v867_v24, %v859_v23  ;;  %v875_v30 = vld [vmem:[#allocation14 + $0x300] sm:$0xff]  ;;  %v900_v35 = vld [vmem:[#allocation14 + $0x3c8] sm:$0xff]  ;;  %v797_v63 = vld [vmem:[#allocation14 + $0x90] sm:$0xff] }
  0x92   :  { %4471 = vmatprep.subr.bf16.mxu1 %v4470_v26  ;;  %4487 = vmatprep.subr.bf16.mxu0 %v7443_v27  ;;  %9511 = vst [vmem:[#allocation36_spill] sm:$0xff] %v7491_v20  ;;  %9512 = vst [vmem:[#allocation37_spill] sm:$0xff] %v7500_v21  ;;  %v884_v26 = vld [vmem:[#allocation14 + $0x348] sm:$0xff]  ;;  %v883_v31 = vld [vmem:[#allocation14 + $0x340] sm:$0xff] }
  0x93   :  { %4294 = vmatmul.mubr.msk.f32.vlgmr.msra.gmra.mrb[8].mxu1 %vm238_vm0, %v7411_v40  ;;  %4302 = vmatmul.mubr.msk.f32.vlgmr.msra.gmra.mrb[8].mxu0 %vm238_vm0, %v7411_v40  ;;  %9513 = vst [vmem:[#allocation38_spill] sm:$0xff] %v7503_v22  ;;  %9514 = vst [vmem:[#allocation39_spill] sm:$0xff] %v7513_v28  ;;  %v7516_v29 = vpack.c.bf16 %v884_v26, %v876_v25  ;;  %v7525_v36 = vpack.c.bf16 %v883_v31, %v875_v30  ;;  %v899_v41 = vld [vmem:[#allocation14 + $0x3c0] sm:$0xff]  ;;  %v908_v42 = vld [vmem:[#allocation14 + $0x408] sm:$0xff] }
  0x94   :  { %4473 = vmatpush1.bf16.msra.mxu1 %v4472_v32  ;;  %4489 = vmatpush1.bf16.msra.mxu0 %v7449_v33  ;;  %v892_v32 = vld [vmem:[#allocation14 + $0x388] sm:$0xff]  ;;  %v907_v49 = vld [vmem:[#allocation14 + $0x400] sm:$0xff]  ;;  %v805_v1 = vld [vmem:[#allocation14 + $0xd0] sm:$0xff] }
  0x95   :  { %446 = vmatprep.mubr.f32.mxu1 %v9191_v0  ;;  %4491 = vmatprep.subr.bf16.mxu0 %v7453_v34  ;;  %9515 = vst [vmem:[#allocation40_spill] sm:$0xff] %v7516_v29  ;;  %9516 = vst [vmem:[#allocation41_spill] sm:$0xff] %v7525_v36  ;;  %v7528_v37 = vpack.c.bf16 %v900_v35, %v892_v32  ;;  %v916_v43 = vld [vmem:[#allocation14 + $0x448] sm:$0xff]  ;;  %v915_v51 = vld [vmem:[#allocation14 + $0x440] sm:$0xff]  ;;  %v7565_v14 = vpack.c.bf16 %v805_v1, %v797_v63 }
  0x96   :  { %4475 = vmatprep.subr.bf16.mxu1 %v4474_v38  ;;  %559 = vmatprep.mubr.f32.mxu0 %v9191_v0  ;;  %v891_v38 = vld [vmem:[#allocation14 + $0x380] sm:$0xff]  ;;  %v7540_v50 = vpack.c.bf16 %v916_v43, %v908_v42  ;;  %v924_v56 = vld [vmem:[#allocation14 + $0x488] sm:$0xff]  ;;  %v7553_v62 = vpack.c.bf16 %v915_v51, %v907_v49  ;;  %v814_v8 = vld [vmem:[#allocation14 + $0x118] sm:$0xff] }
  0x97   :  { %4295 = vmatmul.mubr.msk.f32.gmra.mrb[10].mxu1 %vm238_vm0, %v7419_v54  ;;  %4303 = vmatmul.mubr.msk.f32.gmra.mrb[10].mxu0 %vm238_vm0, %v7419_v54  ;;  %9517 = vst [vmem:[#allocation42_spill] sm:$0xff] %v7528_v37  ;;  %v7537_v44 = vpack.c.bf16 %v899_v41, %v891_v38  ;;  %v932_v57 = vld [vmem:[#allocation14 + $0x4c8] sm:$0xff]  ;;  %v931_v7 = vld [vmem:[#allocation14 + $0x4c0] sm:$0xff]  ;;  %v822_v9 = vld [vmem:[#allocation14 + $0x158] sm:$0xff] }
  0x98   :  { %4493 = vmatpush1.bf16.msra.mxu0 %v7461_v46  ;;  %452 = vmatprep.mubr.f32.mxu1 %v9191_v0  ;;  %9519 = vst [vmem:[#allocation44_spill] sm:$0xff] %v7540_v50  ;;  %v7543_v58 = vld [vmem:[#allocation9 + $0x8] sm:$0xff]  ;;  %9521 = vst [vmem:[#allocation46_spill] sm:$0xff] %v7553_v62  ;;  %v7558_v3 = vpack.c.bf16 %v932_v57, %v924_v56  ;;  %v813_v16 = vld [vmem:[#allocation14 + $0x110] sm:$0xff]  ;;  %v7571_v23 = vpack.c.bf16 %v822_v9, %v814_v8 }
  0x99   :  { %4495 = vmatprep.subr.bf16.mxu0 %v7465_v47  ;;  %4477 = vmatpush1.bf16.msra.mxu1 %v4476_v48  ;;  %9518 = vst [vmem:[#allocation43_spill] sm:$0xff] %v7537_v44  ;;  %v789_v48 = vld [vmem:[#allocation14 + $0x50] sm:$0xff]  ;;  %v940_v10 = vld [vmem:[#allocation14 + $0x508] sm:$0xff]  ;;  %9524 = vst [vmem:[#allocation49_spill] sm:$0xff] %v7565_v14 }
  0x9a   :  { %4479 = vmatprep.subr.bf16.mxu1 %v4478_v55  ;;  %565 = vmatprep.mubr.f32.mxu0 %v9191_v0  ;;  %v806_v55 = vld [vmem:[#allocation14 + $0xd8] sm:$0xff]  ;;  %v7551_v59 = vpack.c.bf16 %v789_v48, %v781_v45  ;;  %9523 = vst [vmem:[#allocation48_spill] sm:$0xff] %v7558_v3  ;;  %v948_v13 = vld [vmem:[#allocation14 + $0x548] sm:$0xff]  ;;  %v821_v17 = vld [vmem:[#allocation14 + $0x150] sm:$0xff] }
  0x9b   :  { %4296 = vmatmul.mubr.msk.f32.gmra.mrb[12].mxu1 %vm238_vm0, %v7429_v5  ;;  %4304 = vmatmul.mubr.msk.f32.gmra.mrb[12].mxu0 %vm238_vm0, %v7429_v5  ;;  %9526 = vst [vmem:[#allocation51_spill] sm:$0xff] %v7571_v23  ;;  %v7573_v24 = vpack.c.bf16 %v948_v13, %v940_v10  ;;  %v939_v25 = vld [vmem:[#allocation14 + $0x500] sm:$0xff]  ;;  %v830_v26 = vld [vmem:[#allocation14 + $0x198] sm:$0xff]  ;;  %v956_v31 = vld [vmem:[#allocation14 + $0x588] sm:$0xff]  ;;  %v7580_v35 = vpack.c.bf16 %v821_v17, %v813_v16 }
  0x9c   :  { %4497 = vmatpush1.bf16.msra.mxu0 %v7474_v60  ;;  %458 = vmatprep.mubr.f32.mxu1 %v9191_v0  ;;  %9520 = vst [vmem:[#allocation45_spill] sm:$0xff] %v7551_v59  ;;  %v838_v30 = vld [vmem:[#allocation14 + $0x1d8] sm:$0xff]  ;;  %v964_v32 = vld [vmem:[#allocation14 + $0x5c8] sm:$0xff]  ;;  %v829_v41 = vld [vmem:[#allocation14 + $0x190] sm:$0xff] }
  0x9d   :  { %4499 = vmatprep.subr.bf16.mxu0 %v7477_v61  ;;  %4481 = vmatpush1.bf16.msra.mxu1 %v4480_v2  ;;  %v7556_v2 = vpack.c.bf16 %v806_v55, %v798_v52  ;;  %9527 = vst [vmem:[#allocation52_spill] sm:$0xff] %v7573_v24  ;;  %9528 = vst [vmem:[#allocation53_spill] sm:$0xff] %v7580_v35  ;;  %v837_v42 = vld [vmem:[#allocation14 + $0x1d0] sm:$0xff]  ;;  %v7586_v43 = vpack.c.bf16 %v838_v30, %v830_v26  ;;  %v955_v48 = vld [vmem:[#allocation14 + $0x580] sm:$0xff] }
  0x9e   :  { %4483 = vmatprep.subr.bf16.mxu1 %v4482_v6  ;;  %571 = vmatprep.mubr.f32.mxu0 %v9191_v0  ;;  %v923_v6 = vld [vmem:[#allocation14 + $0x480] sm:$0xff]  ;;  %v7588_v45 = vpack.c.bf16 %v964_v32, %v956_v31  ;;  %v846_v49 = vld [vmem:[#allocation14 + $0x218] sm:$0xff]  ;;  %v972_v52 = vld [vmem:[#allocation14 + $0x608] sm:$0xff]  ;;  %v7595_v56 = vpack.c.bf16 %v837_v42, %v829_v41 }
  0x9f   :  { %4297 = vmatmul.mubr.msk.f32.gmra.mrb[14].mxu1 %vm238_vm0, %v7439_v19  ;;  %4305 = vmatmul.mubr.msk.f32.gmra.mrb[14].mxu0 %vm238_vm0, %v7439_v19  ;;  %9522 = vst [vmem:[#allocation47_spill] sm:$0xff] %v7556_v2  ;;  %9530 = vst [vmem:[#allocation55_spill] sm:$0xff] %v7586_v43  ;;  %v854_v51 = vld [vmem:[#allocation14 + $0x258] sm:$0xff]  ;;  %v980_v55 = vld [vmem:[#allocation14 + $0x648] sm:$0xff] }
  0xa0   :  { %4501 = vmatpush1.bf16.msra.mxu0 %v7486_v11  ;;  %464 = vmatprep.mubr.f32.mxu1 %v9191_v0  ;;  %9531 = vst [vmem:[#allocation56_spill] sm:$0xff] %v7588_v45  ;;  %9532 = vst [vmem:[#allocation57_spill] sm:$0xff] %v7595_v56  ;;  %v845_v63 = vld [vmem:[#allocation14 + $0x210] sm:$0xff]  ;;  %v971_v8 = vld [vmem:[#allocation14 + $0x600] sm:$0xff] }
  0xa1   :  { %4503 = vmatprep.subr.bf16.mxu0 %v7489_v12  ;;  %4485 = vmatpush1.bf16.msra.mxu1 %v4484_v15  ;;  %v7567_v15 = vpack.c.bf16 %v931_v7, %v923_v6  ;;  %v853_v1 = vld [vmem:[#allocation14 + $0x250] sm:$0xff]  ;;  %v7601_v6 = vpack.c.bf16 %v854_v51, %v846_v49  ;;  %v7603_v7 = vpack.c.bf16 %v980_v55, %v972_v52  ;;  %v862_v9 = vld [vmem:[#allocation14 + $0x298] sm:$0xff]  ;;  %v988_v13 = vld [vmem:[#allocation14 + $0x688] sm:$0xff] }
  0xa2   :  { %4551 = vmatprep.subr.bf16.mxu1 %v7491_v20  ;;  %577 = vmatprep.mubr.f32.mxu0 %v9191_v0  ;;  %v870_v10 = vld [vmem:[#allocation14 + $0x2d8] sm:$0xff]  ;;  %v996_v16 = vld [vmem:[#allocation14 + $0x6c8] sm:$0xff]  ;;  %v7610_v17 = vpack.c.bf16 %v853_v1, %v845_v63  ;;  %v869_v26 = vld [vmem:[#allocation14 + $0x2d0] sm:$0xff] }
  0xa3   :  { %4298 = vmatmul.mubr.msk.f32.gmra.mrb[16].mxu1 %vm238_vm0, %v7409_v39  ;;  %4306 = vmatmul.mubr.msk.f32.gmra.mrb[16].mxu0 %vm238_vm0, %v7409_v39  ;;  %9525 = vst [vmem:[#allocation50_spill] sm:$0xff] %v7567_v15  ;;  %9534 = vst [vmem:[#allocation59_spill] sm:$0xff] %v7601_v6  ;;  %v7616_v30 = vpack.c.bf16 %v870_v10, %v862_v9  ;;  %v7618_v31 = vpack.c.bf16 %v996_v16, %v988_v13  ;;  %v987_v32 = vld [vmem:[#allocation14 + $0x680] sm:$0xff]  ;;  %v878_v41 = vld [vmem:[#allocation14 + $0x318] sm:$0xff] }
  0xa4   :  { %4505 = vmatpush1.bf16.msra.mxu0 %v7500_v21  ;;  %470 = vmatprep.mubr.f32.mxu1 %v9191_v0  ;;  %9535 = vst [vmem:[#allocation60_spill] sm:$0xff] %v7603_v7  ;;  %9536 = vst [vmem:[#allocation61_spill] sm:$0xff] %v7610_v17  ;;  %v886_v42 = vld [vmem:[#allocation14 + $0x358] sm:$0xff]  ;;  %v877_v52 = vld [vmem:[#allocation14 + $0x310] sm:$0xff] }
  0xa5   :  { %4507 = vmatprep.subr.bf16.mxu0 %v7503_v22  ;;  %583 = vmatprep.mubr.f32.mxu0 %v9191_v0  ;;  %9538 = vst [vmem:[#allocation63_spill] sm:$0xff] %v7616_v30  ;;  %9539 = vst [vmem:[#allocation64_spill] sm:$0xff] %v7618_v31  ;;  %v885_v55 = vld [vmem:[#allocation14 + $0x350] sm:$0xff]  ;;  %v7631_v63 = vpack.c.bf16 %v886_v42, %v878_v41  ;;  %v902_v9 = vld [vmem:[#allocation14 + $0x3d8] sm:$0xff] }
  0xa6   :  { %v1020_v10 = vld [vmem:[#allocation14 + $0x788] sm:$0xff]  ;;  %v7640_v16 = vpack.c.bf16 %v885_v55, %v877_v52  ;;  %v1019_v42 = vld [vmem:[#allocation14 + $0x780] sm:$0xff]  ;;  %v9548_v52 = vmov 0.0  }
  0xa7   :  { %4299 = vmatmul.mubr.msk.f32.gmra.mrb[18].mxu1 %vm238_vm0, %v7417_v53  ;;  %4307 = vmatmul.mubr.msk.f32.gmra.mrb[18].mxu0 %vm238_vm0, %v7417_v53  ;;  %9542 = vst [vmem:[#allocation67_spill] sm:$0xff] %v7631_v63  ;;  %v1028_v13 = vld [vmem:[#allocation14 + $0x7c8] sm:$0xff] }
  0xa8   :  { %4509 = vmatpush1.bf16.msra.mxu0 %v7513_v28  ;;  %476 = vmatprep.mubr.f32.mxu1 %v9191_v0  ;;  %9544 = vst [vmem:[#allocation69_spill] sm:$0xff] %v7640_v16  ;;  %v7648_v41 = vpack.c.bf16 %v1028_v13, %v1020_v10  ;;  %v783_v13 = vld [vmem:[#allocation14 + $0x20] sm:$0xff] }
  0xa9   :  { %4511 = vmatprep.subr.bf16.mxu0 %v7516_v29  ;;  %589 = vmatprep.mubr.f32.mxu0 %v9191_v0 }
  0xaa   :  { %9547 = vst [vmem:[#allocation72_spill] sm:$0xff] %v7648_v41 }
  0xab   :  { %4300 = vmatmul.mubr.msk.f32.gmra.mrb[20].mxu1 %vm238_vm0, %v7427_v4  ;;  %4308 = vmatmul.mubr.msk.f32.gmra.mrb[20].mxu0 %vm238_vm0, %v7427_v4 }
  0xac   :  { %4513 = vmatpush1.bf16.msra.mxu0 %v7525_v36  ;;  %482 = vmatprep.mubr.f32.mxu1 %v9191_v0 }
  0xad   :  { %4515 = vmatprep.subr.bf16.mxu0 %v7528_v37  ;;  %595 = vmatprep.mubr.f32.mxu0 %v9191_v0 }
  0xaf   :  { %4301 = vmatmul.mubr.msk.f32.gmra.mrb[22].mxu1 %vm238_vm0, %v7437_v18  ;;  %4309 = vmatmul.mubr.msk.f32.gmra.mrb[22].mxu0 %vm238_vm0, %v7437_v18 }
  0xb0   :  { %4517 = vmatpush1.bf16.msra.mxu0 %v7537_v44  ;;  %666 = vmatprep.mubr.f32.mxu1 %v9191_v0 }
  0xb1   :  { %4519 = vmatprep.subr.bf16.mxu0 %v7540_v50  ;;  %1111 = vmatprep.mubr.f32.mxu0 %v7543_v58 }
  0xb3   :  { %4310 = vmatmul.mubr.msk.f32.vlgmr.msra.gmra.mrb[24].mxu1 %vm238_vm0, %v7411_v40  ;;  %v947_v40 = vld [vmem:[#allocation14 + $0x540] sm:$0xff] }
  0xb4   :  { %4553 = vmatpush1.bf16.msra.mxu1 %v7551_v59  ;;  %4521 = vmatpush1.bf16.msra.mxu0 %v7553_v62  ;;  %v7582_v38 = vpack.c.bf16 %v947_v40, %v939_v25  ;;  %v861_v40 = vld [vmem:[#allocation14 + $0x290] sm:$0xff] }
  0xb5   :  { %4555 = vmatprep.subr.bf16.mxu1 %v7556_v2  ;;  %4523 = vmatprep.subr.bf16.mxu0 %v7558_v3  ;;  %v7625_v49 = vpack.c.bf16 %v869_v26, %v861_v40  ;;  %v893_v26 = vld [vmem:[#allocation14 + $0x390] sm:$0xff] }
  0xb6   :  { %672 = vmatprep.mubr.f32.mxu1 %v9191_v0  ;;  %9529 = vst [vmem:[#allocation54_spill] sm:$0xff] %v7582_v38 }
  0xb7   :  { %4311 = vmatmul.mubr.msk.f32.gmra.mrb[26].mxu1 %vm238_vm0, %v7419_v54  ;;  %v963_v54 = vld [vmem:[#allocation14 + $0x5c0] sm:$0xff]  ;;  %9540 = vst [vmem:[#allocation65_spill] sm:$0xff] %v7625_v49 }
  0xb8   :  { %4557 = vmatpush1.bf16.msra.mxu1 %v7565_v14  ;;  %4525 = vmatpush1.bf16.msra.mxu0 %v7567_v15  ;;  %v7597_v57 = vpack.c.bf16 %v963_v54, %v955_v48  ;;  %v1004_v48 = vld [vmem:[#allocation14 + $0x708] sm:$0xff] }
  0xb9   :  { %4559 = vmatprep.subr.bf16.mxu1 %v7571_v23  ;;  %4527 = vmatprep.subr.bf16.mxu0 %v7573_v24  ;;  %v1012_v54 = vld [vmem:[#allocation14 + $0x748] sm:$0xff] }
  0xba   :  { %678 = vmatprep.mubr.f32.mxu1 %v9191_v0  ;;  %9533 = vst [vmem:[#allocation58_spill] sm:$0xff] %v7597_v57  ;;  %v7633_v1 = vpack.c.bf16 %v1012_v54, %v1004_v48  ;;  %v910_v48 = vld [vmem:[#allocation14 + $0x418] sm:$0xff] }
  0xbb   :  { %4312 = vmatmul.mubr.msk.f32.gmra.mrb[28].mxu1 %vm238_vm0, %v7429_v5  ;;  %v979_v5 = vld [vmem:[#allocation14 + $0x640] sm:$0xff]  ;;  %v918_v54 = vld [vmem:[#allocation14 + $0x458] sm:$0xff] }
  0xbc   :  { %4561 = vmatpush1.bf16.msra.mxu1 %v7580_v35  ;;  %4529 = vmatpush1.bf16.msra.mxu0 %v7582_v38  ;;  %v7612_v25 = vpack.c.bf16 %v979_v5, %v971_v8  ;;  %9543 = vst [vmem:[#allocation68_spill] sm:$0xff] %v7633_v1  ;;  %v1003_v8 = vld [vmem:[#allocation14 + $0x700] sm:$0xff]  ;;  %v894_v5 = vld [vmem:[#allocation14 + $0x398] sm:$0xff] }
  0xbd   :  { %4563 = vmatprep.subr.bf16.mxu1 %v7586_v43  ;;  %4531 = vmatprep.subr.bf16.mxu0 %v7588_v45 }
  0xbe   :  { %684 = vmatprep.mubr.f32.mxu1 %v9191_v0  ;;  %9537 = vst [vmem:[#allocation62_spill] sm:$0xff] %v7612_v25 }
  0xbf   :  { %4313 = vmatmul.mubr.msk.f32.gmra.mrb[30].mxu1 %vm238_vm0, %v7439_v19  ;;  %v995_v19 = vld [vmem:[#allocation14 + $0x6c0] sm:$0xff] }
  0xc0   :  { %4565 = vmatpush1.bf16.msra.mxu1 %v7595_v56  ;;  %4533 = vmatpush1.bf16.msra.mxu0 %v7597_v57  ;;  %v7627_v51 = vpack.c.bf16 %v995_v19, %v987_v32  ;;  %v901_v32 = vld [vmem:[#allocation14 + $0x3d0] sm:$0xff]  ;;  %v7646_v19 = vpack.c.bf16 %v902_v9, %v894_v5  ;;  %v7661_v9 = vpack.c.bf16 %v918_v54, %v910_v48  ;;  %v807_v54 = vld [vmem:[#allocation14 + $0xe0] sm:$0xff] }
  0xc1   :  { %4567 = vmatprep.subr.bf16.mxu1 %v7601_v6  ;;  %4535 = vmatprep.subr.bf16.mxu0 %v7603_v7  ;;  %v7655_v55 = vpack.c.bf16 %v901_v32, %v893_v26  ;;  %v917_v5 = vld [vmem:[#allocation14 + $0x450] sm:$0xff]  ;;  %v7670_v26 = vld [vmem:[#allocation9] sm:$0xff] }
  0xc2   :  { %690 = vmatprep.mubr.f32.mxu1 %v9191_v0  ;;  %9541 = vst [vmem:[#allocation66_spill] sm:$0xff] %v7627_v51  ;;  %9546 = vst [vmem:[#allocation71_spill] sm:$0xff] %v7646_v19 }
  0xc3   :  { %4314 = vmatmul.mubr.msk.f32.gmra.mrb[32].mxu1 %vm238_vm0, %v7409_v39  ;;  %v1011_v39 = vld [vmem:[#allocation14 + $0x740] sm:$0xff]  ;;  %9549 = vst [vmem:[#allocation73_spill] sm:$0xff] %v7655_v55  ;;  %9551 = vst [vmem:[#allocation75_spill] sm:$0xff] %v7661_v9 }
  0xc4   :  { %4569 = vmatpush1.bf16.msra.mxu1 %v7610_v17  ;;  %4537 = vmatpush1.bf16.msra.mxu0 %v7612_v25  ;;  %v7642_v40 = vpack.c.bf16 %v1011_v39, %v1003_v8  ;;  %v909_v39 = vld [vmem:[#allocation14 + $0x410] sm:$0xff] }
  0xc5   :  { %4571 = vmatprep.subr.bf16.mxu1 %v7616_v30  ;;  %4539 = vmatprep.subr.bf16.mxu0 %v7618_v31  ;;  %v7672_v32 = vpack.c.bf16 %v917_v5, %v909_v39 }
  0xc6   :  { %696 = vmatprep.mubr.f32.mxu1 %v9191_v0  ;;  %9545 = vst [vmem:[#allocation70_spill] sm:$0xff] %v7642_v40  ;;  %v784_v0 = vld [vmem:[#allocation14 + $0x28] sm:$0xff] }
  0xc7   :  { %4315 = vmatmul.mubr.msk.f32.gmra.mrb[34].mxu1 %vm238_vm0, %v7417_v53  ;;  %v1027_v53 = vld [vmem:[#allocation14 + $0x7c0] sm:$0xff]  ;;  %9553 = vst [vmem:[#allocation77_spill] sm:$0xff] %v7672_v32 }
  0xc8   :  { %4573 = vmatpush1.bf16.msra.mxu1 %v7625_v49  ;;  %4541 = vmatpush1.bf16.msra.mxu0 %v7627_v51  ;;  %v792_v51 = vld [vmem:[#allocation14 + $0x68] sm:$0xff]  ;;  %v7657_v8 = vpack.c.bf16 %v1027_v53, %v1019_v42  ;;  %v933_v42 = vld [vmem:[#allocation14 + $0x4d0] sm:$0xff] }
  0xc9   :  { %4575 = vmatprep.subr.bf16.mxu1 %v7631_v63  ;;  %4543 = vmatprep.subr.bf16.mxu0 %v7633_v1  ;;  %v7663_v10 = vpack.c.bf16 %v792_v51, %v784_v0  ;;  %v926_v1 = vld [vmem:[#allocation14 + $0x498] sm:$0xff]  ;;  %v800_v63 = vld [vmem:[#allocation14 + $0xa8] sm:$0xff]  ;;  %v925_v51 = vld [vmem:[#allocation14 + $0x490] sm:$0xff] }
  0xca   :  { %702 = vmatprep.mubr.f32.mxu1 %v9548_v52  ;;  %9550 = vst [vmem:[#allocation74_spill] sm:$0xff] %v7657_v8  ;;  %v7686_v39 = vpack.c.bf16 %v933_v42, %v925_v51 }
  0xcb   :  { %4316 = vmatmul.mubr.msk.f32.gmra.mrb[36].mxu1 %vm238_vm0, %v7427_v4  ;;  %9552 = vst [vmem:[#allocation76_spill] sm:$0xff] %v7663_v10  ;;  %v791_v4 = vld [vmem:[#allocation14 + $0x60] sm:$0xff] }
  0xcc   :  { %4577 = vmatpush1.bf16.msra.mxu1 %v7640_v16  ;;  %4545 = vmatpush1.bf16.msra.mxu0 %v7642_v40  ;;  %v934_v16 = vld [vmem:[#allocation14 + $0x4d8] sm:$0xff]  ;;  %v808_v40 = vld [vmem:[#allocation14 + $0xe8] sm:$0xff]  ;;  %v7674_v0 = vpack.c.bf16 %v791_v4, %v783_v13  ;;  %9557 = vst [vmem:[#allocation81_spill] sm:$0xff] %v7686_v39  ;;  %v815_v13 = vld [vmem:[#allocation14 + $0x120] sm:$0xff] }
  0xcd   :  { %4579 = vmatprep.subr.bf16.mxu1 %v7646_v19  ;;  %4547 = vmatprep.subr.bf16.mxu0 %v7648_v41  ;;  %v7678_v53 = vpack.c.bf16 %v934_v16, %v926_v1  ;;  %v7680_v48 = vpack.c.bf16 %v808_v40, %v800_v63  ;;  %v824_v41 = vld [vmem:[#allocation14 + $0x168] sm:$0xff]  ;;  %v941_v63 = vld [vmem:[#allocation14 + $0x510] sm:$0xff]  ;;  %v823_v4 = vld [vmem:[#allocation14 + $0x160] sm:$0xff] }
  0xce   :  { %708 = vmatprep.mubr.f32.mxu1 %v9548_v52  ;;  %9554 = vst [vmem:[#allocation78_spill] sm:$0xff] %v7674_v0  ;;  %v942_v52 = vld [vmem:[#allocation14 + $0x518] sm:$0xff]  ;;  %v949_v16 = vld [vmem:[#allocation14 + $0x550] sm:$0xff]  ;;  %v7701_v42 = vpack.c.bf16 %v823_v4, %v815_v13 }
  0xcf   :  { %4317 = vmatmul.mubr.msk.f32.gmra.mrb[38].mxu1 %vm238_vm0, %v7437_v18  ;;  %9555 = vst [vmem:[#allocation79_spill] sm:$0xff] %v7678_v53  ;;  %9556 = vst [vmem:[#allocation80_spill] sm:$0xff] %v7680_v48  ;;  %v799_v18 = vld [vmem:[#allocation14 + $0xa0] sm:$0xff]  ;;  %v7699_v51 = vpack.c.bf16 %v949_v16, %v941_v63  ;;  %v973_v13 = vld [vmem:[#allocation14 + $0x610] sm:$0xff] }
  0xd0   :  { %4581 = vmatpush1.bf16.msra.mxu1 %v7655_v55  ;;  %4549 = vmatpush1.bf16.msra.mxu0 %v7657_v8  ;;  %v950_v8 = vld [vmem:[#allocation14 + $0x558] sm:$0xff]  ;;  %v816_v55 = vld [vmem:[#allocation14 + $0x128] sm:$0xff]  ;;  %v7688_v1 = vpack.c.bf16 %v807_v54, %v799_v18  ;;  %9562 = vst [vmem:[#allocation86_spill] sm:$0xff] %v7701_v42  ;;  %v965_v18 = vld [vmem:[#allocation14 + $0x5d0] sm:$0xff] }
  0xd1   :  { %4583 = vmatprep.subr.bf16.mxu1 %v7661_v9  ;;  %4615 = vmatprep.subr.bf16.mxu0 %v7663_v10  ;;  %v7692_v40 = vpack.c.bf16 %v950_v8, %v942_v52  ;;  %v7694_v5 = vpack.c.bf16 %v824_v41, %v816_v55  ;;  %v958_v10 = vld [vmem:[#allocation14 + $0x598] sm:$0xff]  ;;  %v832_v9 = vld [vmem:[#allocation14 + $0x1a8] sm:$0xff]  ;;  %9561 = vst [vmem:[#allocation85_spill] sm:$0xff] %v7699_v51  ;;  %v957_v8 = vld [vmem:[#allocation14 + $0x590] sm:$0xff] }
  0xd2   :  { %1182 = vmatprep.mubr.f32.mxu1 %v7543_v58  ;;  %9558 = vst [vmem:[#allocation82_spill] sm:$0xff] %v7688_v1  ;;  %v831_v54 = vld [vmem:[#allocation14 + $0x1a0] sm:$0xff]  ;;  %v7711_v63 = vpack.c.bf16 %v965_v18, %v957_v8  ;;  %v981_v4 = vld [vmem:[#allocation14 + $0x650] sm:$0xff] }
  0xd3   :  { %1112 = vmatmul.mubr.f32.vlgmr.msra.gmra.mrb[0].mxu0 %v7670_v26  ;;  %9559 = vst [vmem:[#allocation83_spill] sm:$0xff] %v7692_v40  ;;  %9560 = vst [vmem:[#allocation84_spill] sm:$0xff] %v7694_v5  ;;  %v839_v52 = vld [vmem:[#allocation14 + $0x1e0] sm:$0xff]  ;;  %v7723_v8 = vpack.c.bf16 %v981_v4, %v973_v13 }
  0xd4   :  { %4585 = vmatpush1.bf16.msra.mxu1 %v7672_v32  ;;  %4617 = vmatpush1.bf16.msra.mxu0 %v7674_v0  ;;  %v966_v32 = vld [vmem:[#allocation14 + $0x5d8] sm:$0xff]  ;;  %v840_v0 = vld [vmem:[#allocation14 + $0x1e8] sm:$0xff]  ;;  %9565 = vst [vmem:[#allocation89_spill] sm:$0xff] %v7711_v63  ;;  %v7713_v16 = vpack.c.bf16 %v839_v52, %v831_v54  ;;  %v989_v54 = vld [vmem:[#allocation14 + $0x690] sm:$0xff] }
  0xd5   :  { %4587 = vmatprep.subr.bf16.mxu1 %v7678_v53  ;;  %4619 = vmatprep.subr.bf16.mxu0 %v7680_v48  ;;  %v7705_v41 = vpack.c.bf16 %v966_v32, %v958_v10  ;;  %v7707_v55 = vpack.c.bf16 %v840_v0, %v832_v9  ;;  %v974_v48 = vld [vmem:[#allocation14 + $0x618] sm:$0xff]  ;;  %v848_v53 = vld [vmem:[#allocation14 + $0x228] sm:$0xff]  ;;  %v847_v32 = vld [vmem:[#allocation14 + $0x220] sm:$0xff]  ;;  %9569 = vst [vmem:[#allocation93_spill] sm:$0xff] %v7723_v8 }
  0xd6   :  { %1253 = vmatprep.mubr.f32.mxu0 %v7543_v58  ;;  %9566 = vst [vmem:[#allocation90_spill] sm:$0xff] %v7713_v16  ;;  %v855_v0 = vld [vmem:[#allocation14 + $0x260] sm:$0xff]  ;;  %v997_v52 = vld [vmem:[#allocation14 + $0x6d0] sm:$0xff] }
  0xd7   :  { %9563 = vst [vmem:[#allocation87_spill] sm:$0xff] %v7705_v41  ;;  %9564 = vst [vmem:[#allocation88_spill] sm:$0xff] %v7707_v55  ;;  %v7725_v18 = vpack.c.bf16 %v855_v0, %v847_v32  ;;  %v7735_v13 = vpack.c.bf16 %v997_v52, %v989_v54  ;;  %v1005_v32 = vld [vmem:[#allocation14 + $0x710] sm:$0xff] }
  0xd8   :  { %4589 = vmatpush1.bf16.msra.mxu1 %v7686_v39  ;;  %4621 = vmatpush1.bf16.msra.mxu0 %v7688_v1  ;;  %v982_v39 = vld [vmem:[#allocation14 + $0x658] sm:$0xff]  ;;  %v856_v1 = vld [vmem:[#allocation14 + $0x268] sm:$0xff]  ;;  %v1013_v0 = vld [vmem:[#allocation14 + $0x750] sm:$0xff] }
  0xd9   :  { %4591 = vmatprep.subr.bf16.mxu1 %v7692_v40  ;;  %4623 = vmatprep.subr.bf16.mxu0 %v7694_v5  ;;  %v7717_v9 = vpack.c.bf16 %v982_v39, %v974_v48  ;;  %v7719_v10 = vpack.c.bf16 %v856_v1, %v848_v53  ;;  %v990_v5 = vld [vmem:[#allocation14 + $0x698] sm:$0xff]  ;;  %v864_v40 = vld [vmem:[#allocation14 + $0x2a8] sm:$0xff]  ;;  %9570 = vst [vmem:[#allocation94_spill] sm:$0xff] %v7725_v18  ;;  %v863_v39 = vld [vmem:[#allocation14 + $0x2a0] sm:$0xff] }
  0xda   :  { %v871_v1 = vld [vmem:[#allocation14 + $0x2e0] sm:$0xff]  ;;  %9573 = vst [vmem:[#allocation97_spill] sm:$0xff] %v7735_v13  ;;  %v7747_v54 = vpack.c.bf16 %v1013_v0, %v1005_v32 }
  0xdb   :  { %9567 = vst [vmem:[#allocation91_spill] sm:$0xff] %v7717_v9  ;;  %9568 = vst [vmem:[#allocation92_spill] sm:$0xff] %v7719_v10  ;;  %v7737_v4 = vpack.c.bf16 %v871_v1, %v863_v39  ;;  %v1021_v39 = vld [vmem:[#allocation14 + $0x790] sm:$0xff] }
  0xdc   :  { %4593 = vmatpush1.bf16.msra.mxu1 %v7699_v51  ;;  %4625 = vmatpush1.bf16.msra.mxu0 %v7701_v42  ;;  %v998_v51 = vld [vmem:[#allocation14 + $0x6d8] sm:$0xff]  ;;  %v872_v42 = vld [vmem:[#allocation14 + $0x2e8] sm:$0xff]  ;;  %9577 = vst [vmem:[#allocation101_spill] sm:$0xff] %v7747_v54  ;;  %v1029_v1 = vld [vmem:[#allocation14 + $0x7d0] sm:$0xff] }
  0xdd   :  { %4595 = vmatprep.subr.bf16.mxu1 %v7705_v41  ;;  %4627 = vmatprep.subr.bf16.mxu0 %v7707_v55  ;;  %v7729_v53 = vpack.c.bf16 %v998_v51, %v990_v5  ;;  %v7731_v48 = vpack.c.bf16 %v872_v42, %v864_v40  ;;  %v1006_v55 = vld [vmem:[#allocation14 + $0x718] sm:$0xff]  ;;  %v880_v41 = vld [vmem:[#allocation14 + $0x328] sm:$0xff]  ;;  %9574 = vst [vmem:[#allocation98_spill] sm:$0xff] %v7737_v4  ;;  %v879_v51 = vld [vmem:[#allocation14 + $0x320] sm:$0xff] }
  0xde   :  { %v887_v42 = vld [vmem:[#allocation14 + $0x360] sm:$0xff]  ;;  %v7759_v32 = vpack.c.bf16 %v1029_v1, %v1021_v39 }
  0xdf   :  { %9571 = vst [vmem:[#allocation95_spill] sm:$0xff] %v7729_v53  ;;  %9572 = vst [vmem:[#allocation96_spill] sm:$0xff] %v7731_v48  ;;  %v7749_v52 = vpack.c.bf16 %v887_v42, %v879_v51  ;;  %v785_v51 = vld [vmem:[#allocation14 + $0x30] sm:$0xff] }
  0xe0   :  { %4597 = vmatpush1.bf16.msra.mxu1 %v7711_v63  ;;  %4629 = vmatpush1.bf16.msra.mxu0 %v7713_v16  ;;  %v1014_v63 = vld [vmem:[#allocation14 + $0x758] sm:$0xff]  ;;  %v888_v16 = vld [vmem:[#allocation14 + $0x368] sm:$0xff]  ;;  %9581 = vst [vmem:[#allocation105_spill] sm:$0xff] %v7759_v32  ;;  %v793_v42 = vld [vmem:[#allocation14 + $0x70] sm:$0xff] }
  0xe1   :  { %4599 = vmatprep.subr.bf16.mxu1 %v7717_v9  ;;  %4631 = vmatprep.subr.bf16.mxu0 %v7719_v10  ;;  %v7741_v40 = vpack.c.bf16 %v1014_v63, %v1006_v55  ;;  %v7743_v5 = vpack.c.bf16 %v888_v16, %v880_v41  ;;  %v1022_v10 = vld [vmem:[#allocation14 + $0x798] sm:$0xff]  ;;  %v896_v9 = vld [vmem:[#allocation14 + $0x3a8] sm:$0xff]  ;;  %9578 = vst [vmem:[#allocation102_spill] sm:$0xff] %v7749_v52  ;;  %v895_v63 = vld [vmem:[#allocation14 + $0x3a0] sm:$0xff] }
  0xe2   :  { %v903_v16 = vld [vmem:[#allocation14 + $0x3e0] sm:$0xff]  ;;  %v7771_v39 = vpack.c.bf16 %v793_v42, %v785_v51 }
  0xe3   :  { %9575 = vst [vmem:[#allocation99_spill] sm:$0xff] %v7741_v40  ;;  %9576 = vst [vmem:[#allocation100_spill] sm:$0xff] %v7743_v5  ;;  %v7761_v0 = vpack.c.bf16 %v903_v16, %v895_v63  ;;  %v801_v63 = vld [vmem:[#allocation14 + $0xb0] sm:$0xff] }
  0xe4   :  { %4601 = vmatpush1.bf16.msra.mxu1 %v7723_v8  ;;  %4633 = vmatpush1.bf16.msra.mxu0 %v7725_v18  ;;  %v1030_v8 = vld [vmem:[#allocation14 + $0x7d8] sm:$0xff]  ;;  %v904_v18 = vld [vmem:[#allocation14 + $0x3e8] sm:$0xff]  ;;  %9585 = vst [vmem:[#allocation109_spill] sm:$0xff] %v7771_v39  ;;  %v809_v16 = vld [vmem:[#allocation14 + $0xf0] sm:$0xff] }
  0xe5   :  { %4603 = vmatprep.subr.bf16.mxu1 %v7729_v53  ;;  %4635 = vmatprep.subr.bf16.mxu0 %v7731_v48  ;;  %v7753_v41 = vpack.c.bf16 %v1030_v8, %v1022_v10  ;;  %v7755_v55 = vpack.c.bf16 %v904_v18, %v896_v9  ;;  %v786_v48 = vld [vmem:[#allocation14 + $0x38] sm:$0xff]  ;;  %v912_v53 = vld [vmem:[#allocation14 + $0x428] sm:$0xff]  ;;  %9582 = vst [vmem:[#allocation106_spill] sm:$0xff] %v7761_v0  ;;  %v911_v8 = vld [vmem:[#allocation14 + $0x420] sm:$0xff] }
  0xe6   :  { %v919_v18 = vld [vmem:[#allocation14 + $0x460] sm:$0xff]  ;;  %v7784_v51 = vpack.c.bf16 %v809_v16, %v801_v63 }
  0xe7   :  { %9579 = vst [vmem:[#allocation103_spill] sm:$0xff] %v7753_v41  ;;  %9580 = vst [vmem:[#allocation104_spill] sm:$0xff] %v7755_v55  ;;  %v7773_v1 = vpack.c.bf16 %v919_v18, %v911_v8  ;;  %v943_v8 = vld [vmem:[#allocation14 + $0x520] sm:$0xff] }
  0xe8   :  { %4605 = vmatpush1.bf16.msra.mxu1 %v7735_v13  ;;  %4637 = vmatpush1.bf16.msra.mxu0 %v7737_v4  ;;  %v794_v13 = vld [vmem:[#allocation14 + $0x78] sm:$0xff]  ;;  %v920_v4 = vld [vmem:[#allocation14 + $0x468] sm:$0xff]  ;;  %9588 = vst [vmem:[#allocation112_spill] sm:$0xff] %v7784_v51  ;;  %v951_v18 = vld [vmem:[#allocation14 + $0x560] sm:$0xff] }
  0xe9   :  { %4607 = vmatprep.subr.bf16.mxu1 %v7741_v40  ;;  %4639 = vmatprep.subr.bf16.mxu0 %v7743_v5  ;;  %v7765_v9 = vpack.c.bf16 %v794_v13, %v786_v48  ;;  %v7767_v10 = vpack.c.bf16 %v920_v4, %v912_v53  ;;  %v802_v5 = vld [vmem:[#allocation14 + $0xb8] sm:$0xff]  ;;  %v928_v40 = vld [vmem:[#allocation14 + $0x4a8] sm:$0xff]  ;;  %9586 = vst [vmem:[#allocation110_spill] sm:$0xff] %v7773_v1  ;;  %v927_v13 = vld [vmem:[#allocation14 + $0x4a0] sm:$0xff] }
  0xea   :  { %v935_v4 = vld [vmem:[#allocation14 + $0x4e0] sm:$0xff]  ;;  %v7799_v16 = vpack.c.bf16 %v951_v18, %v943_v8  ;;  %v849_v8 = vld [vmem:[#allocation14 + $0x230] sm:$0xff] }
  0xeb   :  { %9583 = vst [vmem:[#allocation107_spill] sm:$0xff] %v7765_v9  ;;  %9584 = vst [vmem:[#allocation108_spill] sm:$0xff] %v7767_v10  ;;  %v7786_v42 = vpack.c.bf16 %v935_v4, %v927_v13  ;;  %v959_v13 = vld [vmem:[#allocation14 + $0x5a0] sm:$0xff]  ;;  %v850_v4 = vld [vmem:[#allocation14 + $0x238] sm:$0xff] }
  0xec   :  { %4609 = vmatpush1.bf16.msra.mxu1 %v7747_v54  ;;  %4641 = vmatpush1.bf16.msra.mxu0 %v7749_v52  ;;  %v810_v54 = vld [vmem:[#allocation14 + $0xf8] sm:$0xff]  ;;  %v936_v52 = vld [vmem:[#allocation14 + $0x4e8] sm:$0xff]  ;;  %9593 = vst [vmem:[#allocation117_spill] sm:$0xff] %v7799_v16  ;;  %v857_v18 = vld [vmem:[#allocation14 + $0x270] sm:$0xff] }
  0xed   :  { %4611 = vmatprep.subr.bf16.mxu1 %v7753_v41  ;;  %4643 = vmatprep.subr.bf16.mxu0 %v7755_v55  ;;  %v7777_v53 = vpack.c.bf16 %v810_v54, %v802_v5  ;;  %v7779_v48 = vpack.c.bf16 %v936_v52, %v928_v40  ;;  %v818_v55 = vld [vmem:[#allocation14 + $0x138] sm:$0xff]  ;;  %v944_v41 = vld [vmem:[#allocation14 + $0x528] sm:$0xff]  ;;  %9589 = vst [vmem:[#allocation113_spill] sm:$0xff] %v7786_v42  ;;  %v817_v5 = vld [vmem:[#allocation14 + $0x130] sm:$0xff] }
  0xee   :  { %v825_v54 = vld [vmem:[#allocation14 + $0x170] sm:$0xff] }
  0xef   :  { %9587 = vst [vmem:[#allocation111_spill] sm:$0xff] %v7779_v48  ;;  %v7797_v63 = vpack.c.bf16 %v825_v54, %v817_v5 }
  0xf0   :  { %4613 = vmatpush1.bf16.msra.mxu1 %v7759_v32  ;;  %4645 = vmatpush1.bf16.msra.mxu0 %v7761_v0  ;;  %v826_v32 = vld [vmem:[#allocation14 + $0x178] sm:$0xff]  ;;  %v952_v0 = vld [vmem:[#allocation14 + $0x568] sm:$0xff] }
  0xf1   :  { %4679 = vmatprep.subr.bf16.mxu1 %v7765_v9  ;;  %4647 = vmatprep.subr.bf16.mxu0 %v7767_v10  ;;  %v7790_v40 = vpack.c.bf16 %v826_v32, %v818_v55  ;;  %v7792_v52 = vpack.c.bf16 %v952_v0, %v944_v41  ;;  %v834_v10 = vld [vmem:[#allocation14 + $0x1b8] sm:$0xff]  ;;  %v960_v9 = vld [vmem:[#allocation14 + $0x5a8] sm:$0xff]  ;;  %9592 = vst [vmem:[#allocation116_spill] sm:$0xff] %v7797_v63  ;;  %v833_v55 = vld [vmem:[#allocation14 + $0x1b0] sm:$0xff] }
  0xf2   :  { %v841_v32 = vld [vmem:[#allocation14 + $0x1f0] sm:$0xff] }
  0xf3   :  { %1183 = vmatmul.mubr.f32.vlgmr.msra.gmra.mrb[8].mxu1 %v7670_v26  ;;  %9590 = vst [vmem:[#allocation114_spill] sm:$0xff] %v7790_v40  ;;  %9591 = vst [vmem:[#allocation115_spill] sm:$0xff] %v7792_v52  ;;  %v7809_v5 = vpack.c.bf16 %v841_v32, %v833_v55  ;;  %v7821_v55 = vpack.c.bf16 %v857_v18, %v849_v8 }
  0xf4   :  { %4681 = vmatpush1.bf16.msra.mxu1 %v7771_v39  ;;  %4649 = vmatpush1.bf16.msra.mxu0 %v7773_v1  ;;  %v842_v39 = vld [vmem:[#allocation14 + $0x1f8] sm:$0xff]  ;;  %v968_v1 = vld [vmem:[#allocation14 + $0x5e8] sm:$0xff] }
  0xf5   :  { %4683 = vmatprep.subr.bf16.mxu1 %v7777_v53  ;;  %4651 = vmatprep.subr.bf16.mxu0 %v7779_v48  ;;  %v7803_v41 = vpack.c.bf16 %v842_v39, %v834_v10  ;;  %v7805_v0 = vpack.c.bf16 %v968_v1, %v960_v9  ;;  %v858_v48 = vld [vmem:[#allocation14 + $0x278] sm:$0xff]  ;;  %9596 = vst [vmem:[#allocation120_spill] sm:$0xff] %v7809_v5  ;;  %v975_v39 = vld [vmem:[#allocation14 + $0x620] sm:$0xff]  ;;  %9600 = vst [vmem:[#allocation124_spill] sm:$0xff] %v7821_v55 }
  0xf6   :  { %1324 = vmatprep.mubr.f32.mxu1 %v7543_v58  ;;  %v967_v58 = vld [vmem:[#allocation14 + $0x5e0] sm:$0xff]  ;;  %v7815_v9 = vpack.c.bf16 %v858_v48, %v850_v4 }
  0xf7   :  { %9594 = vst [vmem:[#allocation118_spill] sm:$0xff] %v7803_v41  ;;  %9595 = vst [vmem:[#allocation119_spill] sm:$0xff] %v7805_v0  ;;  %v7811_v54 = vpack.c.bf16 %v967_v58, %v959_v13  ;;  %v983_v1 = vld [vmem:[#allocation14 + $0x660] sm:$0xff]  ;;  %v865_v13 = vld [vmem:[#allocation14 + $0x2b0] sm:$0xff] }
  0xf8   :  { %4685 = vmatpush1.bf16.msra.mxu1 %v7784_v51  ;;  %4653 = vmatpush1.bf16.msra.mxu0 %v7786_v42  ;;  %v976_v51 = vld [vmem:[#allocation14 + $0x628] sm:$0xff]  ;;  %9598 = vst [vmem:[#allocation122_spill] sm:$0xff] %v7815_v9  ;;  %v7823_v32 = vpack.c.bf16 %v983_v1, %v975_v39  ;;  %v873_v58 = vld [vmem:[#allocation14 + $0x2f0] sm:$0xff]  ;;  %v999_v4 = vld [vmem:[#allocation14 + $0x6e0] sm:$0xff] }
  0xf9   :  { %4687 = vmatprep.subr.bf16.mxu1 %v7790_v40  ;;  %4655 = vmatprep.subr.bf16.mxu0 %v7792_v52  ;;  %v984_v42 = vld [vmem:[#allocation14 + $0x668] sm:$0xff]  ;;  %9597 = vst [vmem:[#allocation121_spill] sm:$0xff] %v7811_v54  ;;  %v866_v52 = vld [vmem:[#allocation14 + $0x2b8] sm:$0xff]  ;;  %v7833_v8 = vpack.c.bf16 %v873_v58, %v865_v13  ;;  %v881_v39 = vld [vmem:[#allocation14 + $0x330] sm:$0xff] }
  0xfa   :  { %v7817_v10 = vpack.c.bf16 %v984_v42, %v976_v51  ;;  %v992_v40 = vld [vmem:[#allocation14 + $0x6a8] sm:$0xff]  ;;  %9601 = vst [vmem:[#allocation125_spill] sm:$0xff] %v7823_v32  ;;  %v991_v42 = vld [vmem:[#allocation14 + $0x6a0] sm:$0xff]  ;;  %v889_v1 = vld [vmem:[#allocation14 + $0x370] sm:$0xff] }
  0xfb   :  { %9604 = vst [vmem:[#allocation128_spill] sm:$0xff] %v7833_v8  ;;  %v7835_v18 = vpack.c.bf16 %v999_v4, %v991_v42  ;;  %v7845_v13 = vpack.c.bf16 %v889_v1, %v881_v39  ;;  %v897_v42 = vld [vmem:[#allocation14 + $0x3b0] sm:$0xff]  ;;  %v1031_v4 = vld [vmem:[#allocation14 + $0x7e0] sm:$0xff] }
  0xfc   :  { %4689 = vmatpush1.bf16.msra.mxu1 %v7797_v63  ;;  %4657 = vmatpush1.bf16.msra.mxu0 %v7799_v16  ;;  %9599 = vst [vmem:[#allocation123_spill] sm:$0xff] %v7817_v10  ;;  %v874_v63 = vld [vmem:[#allocation14 + $0x2f8] sm:$0xff]  ;;  %v1000_v16 = vld [vmem:[#allocation14 + $0x6e8] sm:$0xff] }
  0xfd   :  { %4691 = vmatprep.subr.bf16.mxu1 %v7803_v41  ;;  %4659 = vmatprep.subr.bf16.mxu0 %v7805_v0  ;;  %v7827_v48 = vpack.c.bf16 %v874_v63, %v866_v52  ;;  %v7829_v51 = vpack.c.bf16 %v1000_v16, %v992_v40  ;;  %v882_v0 = vld [vmem:[#allocation14 + $0x338] sm:$0xff]  ;;  %v1008_v41 = vld [vmem:[#allocation14 + $0x728] sm:$0xff]  ;;  %9605 = vst [vmem:[#allocation129_spill] sm:$0xff] %v7835_v18  ;;  %v1007_v63 = vld [vmem:[#allocation14 + $0x720] sm:$0xff] }
  0xfe   :  { %v1015_v16 = vld [vmem:[#allocation14 + $0x760] sm:$0xff]  ;;  %9608 = vst [vmem:[#allocation132_spill] sm:$0xff] %v7845_v13 }
  0xff   :  { %9602 = vst [vmem:[#allocation126_spill] sm:$0xff] %v7827_v48  ;;  %9603 = vst [vmem:[#allocation127_spill] sm:$0xff] %v7829_v51  ;;  %v7847_v58 = vpack.c.bf16 %v1015_v16, %v1007_v63  ;;  %v938_v63 = vld [vmem:[#allocation14 + $0x4f8] sm:$0xff] }
 0x100   :  { %4693 = vmatpush1.bf16.msra.mxu1 %v7809_v5  ;;  %4661 = vmatpush1.bf16.msra.mxu0 %v7811_v54  ;;  %v890_v5 = vld [vmem:[#allocation14 + $0x378] sm:$0xff]  ;;  %v1016_v54 = vld [vmem:[#allocation14 + $0x768] sm:$0xff] }
 0x101   :  { %4695 = vmatprep.subr.bf16.mxu1 %v7815_v9  ;;  %4663 = vmatprep.subr.bf16.mxu0 %v7817_v10  ;;  %v7839_v40 = vpack.c.bf16 %v890_v5, %v882_v0  ;;  %v7841_v52 = vpack.c.bf16 %v1016_v54, %v1008_v41  ;;  %v898_v10 = vld [vmem:[#allocation14 + $0x3b8] sm:$0xff]  ;;  %v1024_v9 = vld [vmem:[#allocation14 + $0x7a8] sm:$0xff]  ;;  %9609 = vst [vmem:[#allocation133_spill] sm:$0xff] %v7847_v58  ;;  %v905_v5 = vld [vmem:[#allocation14 + $0x3f0] sm:$0xff] }
 0x102   :  { %v1023_v54 = vld [vmem:[#allocation14 + $0x7a0] sm:$0xff]  ;;  %v7857_v39 = vpack.c.bf16 %v905_v5, %v897_v42  ;;  %v929_v5 = vld [vmem:[#allocation14 + $0x4b0] sm:$0xff] }
 0x103   :  { %9606 = vst [vmem:[#allocation130_spill] sm:$0xff] %v7839_v40  ;;  %9607 = vst [vmem:[#allocation131_spill] sm:$0xff] %v7841_v52  ;;  %v7859_v1 = vpack.c.bf16 %v1031_v4, %v1023_v54  ;;  %v937_v54 = vld [vmem:[#allocation14 + $0x4f0] sm:$0xff] }
 0x104   :  { %4697 = vmatpush1.bf16.msra.mxu1 %v7821_v55  ;;  %4665 = vmatpush1.bf16.msra.mxu0 %v7823_v32  ;;  %v906_v55 = vld [vmem:[#allocation14 + $0x3f8] sm:$0xff]  ;;  %v1032_v32 = vld [vmem:[#allocation14 + $0x7e8] sm:$0xff]  ;;  %9612 = vst [vmem:[#allocation136_spill] sm:$0xff] %v7857_v39  ;;  %v7875_v4 = vpack.c.bf16 %v937_v54, %v929_v5  ;;  %v961_v54 = vld [vmem:[#allocation14 + $0x5b0] sm:$0xff] }
 0x105   :  { %4699 = vmatprep.subr.bf16.mxu1 %v7827_v48  ;;  %4667 = vmatprep.subr.bf16.mxu0 %v7829_v51  ;;  %v7851_v41 = vpack.c.bf16 %v906_v55, %v898_v10  ;;  %v7853_v0 = vpack.c.bf16 %v1032_v32, %v1024_v9  ;;  %v914_v51 = vld [vmem:[#allocation14 + $0x438] sm:$0xff]  ;;  %9613 = vst [vmem:[#allocation137_spill] sm:$0xff] %v7859_v1  ;;  %v913_v9 = vld [vmem:[#allocation14 + $0x430] sm:$0xff] }
 0x106   :  { %v921_v55 = vld [vmem:[#allocation14 + $0x470] sm:$0xff]  ;;  %v930_v32 = vld [vmem:[#allocation14 + $0x4b8] sm:$0xff]  ;;  %9617 = vst [vmem:[#allocation141_spill] sm:$0xff] %v7875_v4 }
 0x107   :  { %9610 = vst [vmem:[#allocation134_spill] sm:$0xff] %v7851_v41  ;;  %9611 = vst [vmem:[#allocation135_spill] sm:$0xff] %v7853_v0  ;;  %v7867_v16 = vpack.c.bf16 %v921_v55, %v913_v9  ;;  %v7870_v42 = vpack.c.bf16 %v938_v63, %v930_v32  ;;  %v945_v55 = vld [vmem:[#allocation14 + $0x530] sm:$0xff]  ;;  %v962_v63 = vld [vmem:[#allocation14 + $0x5b8] sm:$0xff] }
 0x108   :  { %4701 = vmatpush1.bf16.msra.mxu1 %v7833_v8  ;;  %4669 = vmatpush1.bf16.msra.mxu0 %v7835_v18  ;;  %v922_v8 = vld [vmem:[#allocation14 + $0x478] sm:$0xff]  ;;  %v953_v32 = vld [vmem:[#allocation14 + $0x570] sm:$0xff] }
 0x109   :  { %4703 = vmatprep.subr.bf16.mxu1 %v7839_v40  ;;  %4671 = vmatprep.subr.bf16.mxu0 %v7841_v52  ;;  %v7863_v10 = vpack.c.bf16 %v922_v8, %v914_v51  ;;  %9615 = vst [vmem:[#allocation139_spill] sm:$0xff] %v7867_v16  ;;  %9616 = vst [vmem:[#allocation140_spill] sm:$0xff] %v7870_v42  ;;  %v946_v51 = vld [vmem:[#allocation14 + $0x538] sm:$0xff] }
 0x10a   :  { %v954_v8 = vld [vmem:[#allocation14 + $0x578] sm:$0xff] }
 0x10b   :  { %9614 = vst [vmem:[#allocation138_spill] sm:$0xff] %v7863_v10  ;;  %v7879_v9 = vpack.c.bf16 %v954_v8, %v946_v51  ;;  %v978_v51 = vld [vmem:[#allocation14 + $0x638] sm:$0xff] }
 0x10c   :  { %4705 = vmatpush1.bf16.msra.mxu1 %v7845_v13  ;;  %4673 = vmatpush1.bf16.msra.mxu0 %v7847_v58  ;;  %v986_v8 = vld [vmem:[#allocation14 + $0x678] sm:$0xff] }
 0x10d   :  { %4707 = vmatprep.subr.bf16.mxu1 %v7851_v41  ;;  %4675 = vmatprep.subr.bf16.mxu0 %v7853_v0  ;;  %9618 = vst [vmem:[#allocation142_spill] sm:$0xff] %v7879_v9 }
 0x110   :  { %4709 = vmatpush1.bf16.msra.mxu1 %v7857_v39  ;;  %4677 = vmatpush1.bf16.msra.mxu0 %v7859_v1  ;;  %v7883_v1 = vpack.c.bf16 %v953_v32, %v945_v55  ;;  %v7895_v55 = vpack.c.bf16 %v986_v8, %v978_v51  ;;  %v977_v32 = vld [vmem:[#allocation14 + $0x630] sm:$0xff]  ;;  %v1010_v51 = vld [vmem:[#allocation14 + $0x738] sm:$0xff] }
 0x111   :  { %4711 = vmatprep.subr.bf16.mxu1 %v7863_v10  ;;  %4743 = vmatprep.subr.bf16.mxu0 %v7443_v27  ;;  %v970_v27 = vld [vmem:[#allocation14 + $0x5f8] sm:$0xff] }
 0x112   :  { %9619 = vst [vmem:[#allocation143_spill] sm:$0xff] %v7883_v1  ;;  %v7887_v5 = vpack.c.bf16 %v970_v27, %v962_v63  ;;  %9622 = vst [vmem:[#allocation146_spill] sm:$0xff] %v7895_v55  ;;  %v994_v27 = vld [vmem:[#allocation14 + $0x6b8] sm:$0xff] }
 0x113   :  { %1254 = vmatmul.mubr.f32.vlgmr.msra.gmra.mrb[8].mxu0 %v7670_v26  ;;  %v1002_v63 = vld [vmem:[#allocation14 + $0x6f8] sm:$0xff] }
 0x114   :  { %4713 = vmatpush1.bf16.msra.mxu1 %v7867_v16  ;;  %4745 = vmatpush1.bf16.msra.mxu0 %v7449_v33  ;;  %9620 = vst [vmem:[#allocation144_spill] sm:$0xff] %v7887_v5  ;;  %v969_v33 = vld [vmem:[#allocation14 + $0x5f0] sm:$0xff]  ;;  %v1018_v8 = vld [vmem:[#allocation14 + $0x778] sm:$0xff] }
 0x115   :  { %4715 = vmatprep.subr.bf16.mxu1 %v7870_v42  ;;  %4747 = vmatprep.subr.bf16.mxu0 %v7453_v34  ;;  %v7891_v34 = vpack.c.bf16 %v969_v33, %v961_v54  ;;  %v7903_v33 = vpack.c.bf16 %v1002_v63, %v994_v27  ;;  %v993_v54 = vld [vmem:[#allocation14 + $0x6b0] sm:$0xff]  ;;  %v1026_v27 = vld [vmem:[#allocation14 + $0x7b8] sm:$0xff] }
 0x116   :  { %v1034_v63 = vld [vmem:[#allocation14 + $0x7f8] sm:$0xff] }
 0x117   :  { %9621 = vst [vmem:[#allocation145_spill] sm:$0xff] %v7891_v34  ;;  %9624 = vst [vmem:[#allocation148_spill] sm:$0xff] %v7903_v33 }
 0x118   :  { %4717 = vmatpush1.bf16.msra.mxu1 %v7875_v4  ;;  %4749 = vmatpush1.bf16.msra.mxu0 %v7461_v46  ;;  %v985_v46 = vld [vmem:[#allocation14 + $0x670] sm:$0xff] }
 0x119   :  { %4719 = vmatprep.subr.bf16.mxu1 %v7879_v9  ;;  %4751 = vmatprep.subr.bf16.mxu0 %v7465_v47  ;;  %v7899_v47 = vpack.c.bf16 %v985_v46, %v977_v32  ;;  %v7911_v46 = vpack.c.bf16 %v1018_v8, %v1010_v51  ;;  %v1009_v32 = vld [vmem:[#allocation14 + $0x730] sm:$0xff] }
 0x11a   :  { %v9633_v8 = vld [vmem:[#allocation69_spill] sm:$0xff] }
 0x11b   :  { %9623 = vst [vmem:[#allocation147_spill] sm:$0xff] %v7899_v47  ;;  %9626 = vst [vmem:[#allocation150_spill] sm:$0xff] %v7911_v46 }
 0x11c   :  { %4721 = vmatpush1.bf16.msra.mxu1 %v7883_v1  ;;  %4753 = vmatpush1.bf16.msra.mxu0 %v7474_v60  ;;  %v1001_v60 = vld [vmem:[#allocation14 + $0x6f0] sm:$0xff] }
 0x11d   :  { %4723 = vmatprep.subr.bf16.mxu1 %v7887_v5  ;;  %4755 = vmatprep.subr.bf16.mxu0 %v7477_v61  ;;  %v7907_v61 = vpack.c.bf16 %v1001_v60, %v993_v54  ;;  %v7919_v60 = vpack.c.bf16 %v1034_v63, %v1026_v27  ;;  %v1025_v54 = vld [vmem:[#allocation14 + $0x7b0] sm:$0xff]  ;;  %v9635_v27 = vld [vmem:[#allocation72_spill] sm:$0xff] }
 0x11e   :  { %v9636_v63 = vld [vmem:[#allocation73_spill] sm:$0xff] }
 0x11f   :  { %9625 = vst [vmem:[#allocation149_spill] sm:$0xff] %v7907_v61  ;;  %9628 = vst [vmem:[#allocation152_spill] sm:$0xff] %v7919_v60 }
 0x120   :  { %4725 = vmatpush1.bf16.msra.mxu1 %v7891_v34  ;;  %4757 = vmatpush1.bf16.msra.mxu0 %v7486_v11  ;;  %v1017_v11 = vld [vmem:[#allocation14 + $0x770] sm:$0xff] }
 0x121   :  { %4727 = vmatprep.subr.bf16.mxu1 %v7895_v55  ;;  %4759 = vmatprep.subr.bf16.mxu0 %v7489_v12  ;;  %v7915_v12 = vpack.c.bf16 %v1017_v11, %v1009_v32  ;;  %v9630_v11 = vld [vmem:[#allocation66_spill] sm:$0xff] }
 0x122   :  { %v9634_v32 = vld [vmem:[#allocation70_spill] sm:$0xff] }
 0x123   :  { %9627 = vst [vmem:[#allocation151_spill] sm:$0xff] %v7915_v12 }
 0x124   :  { %4729 = vmatpush1.bf16.msra.mxu1 %v7899_v47  ;;  %4761 = vmatpush1.bf16.msra.mxu0 %v7500_v21  ;;  %v1033_v21 = vld [vmem:[#allocation14 + $0x7f0] sm:$0xff] }
 0x125   :  { %4731 = vmatprep.subr.bf16.mxu1 %v7903_v33  ;;  %4763 = vmatprep.subr.bf16.mxu0 %v7503_v22  ;;  %v7923_v51 = vpack.c.bf16 %v1033_v21, %v1025_v54  ;;  %v9631_v21 = vld [vmem:[#allocation67_spill] sm:$0xff]  ;;  %v9637_v54 = vld [vmem:[#allocation74_spill] sm:$0xff] }
 0x127   :  { %9629 = vst [vmem:[#allocation153_spill] sm:$0xff] %v7923_v51 }
 0x128   :  { %4733 = vmatpush1.bf16.msra.mxu1 %v7907_v61  ;;  %4765 = vmatpush1.bf16.msra.mxu0 %v7513_v28 }
 0x129   :  { %4735 = vmatprep.subr.bf16.mxu1 %v7911_v46  ;;  %4767 = vmatprep.subr.bf16.mxu0 %v7516_v29 }
 0x12c   :  { %4737 = vmatpush1.bf16.msra.mxu1 %v7915_v12  ;;  %4769 = vmatpush1.bf16.msra.mxu0 %v7525_v36 }
 0x12d   :  { %4739 = vmatprep.subr.bf16.mxu1 %v7919_v60  ;;  %4771 = vmatprep.subr.bf16.mxu0 %v7528_v37 }
 0x130   :  { %4741 = vmatpush1.bf16.msra.mxu1 %v7923_v51  ;;  %4773 = vmatpush1.bf16.msra.mxu0 %v7537_v44 }
 0x131   :  { %4807 = vmatprep.subr.bf16.mxu1 %v7491_v20  ;;  %4775 = vmatprep.subr.bf16.mxu0 %v7540_v50 }
 0x133   :  { %1325 = vmatmul.mubr.f32.vlgmr.msra.gmra.mrb[24].mxu1 %v7670_v26  ;;  %v9632_v26 = vld [vmem:[#allocation68_spill] sm:$0xff] }
 0x134   :  { %4809 = vmatpush1.bf16.msra.mxu1 %v7551_v59  ;;  %4777 = vmatpush1.bf16.msra.mxu0 %v7553_v62 }
 0x135   :  { %4811 = vmatprep.subr.bf16.mxu1 %v7556_v2  ;;  %4779 = vmatprep.subr.bf16.mxu0 %v7558_v3  ;;  %v198_v3 = vlaneseq }
 0x138   :  { %4813 = vmatpush1.bf16.msra.mxu1 %v7565_v14  ;;  %4781 = vmatpush1.bf16.msra.mxu0 %v7567_v15 }
 0x139   :  { %4815 = vmatprep.subr.bf16.mxu1 %v7571_v23  ;;  %4783 = vmatprep.subr.bf16.mxu0 %v7573_v24  ;;  %v9649_v24 = vld [vmem:[#allocation87_spill] sm:$0xff] }
 0x13c   :  { %4817 = vmatpush1.bf16.msra.mxu1 %v7580_v35  ;;  %4785 = vmatpush1.bf16.msra.mxu0 %v7582_v38 }
 0x13d   :  { %4819 = vmatprep.subr.bf16.mxu1 %v7586_v43  ;;  %4787 = vmatprep.subr.bf16.mxu0 %v7588_v45  ;;  %v9645_v45 = vld [vmem:[#allocation83_spill] sm:$0xff] }
 0x140   :  { %4821 = vmatpush1.bf16.msra.mxu1 %v7595_v56  ;;  %4789 = vmatpush1.bf16.msra.mxu0 %v7597_v57 }
 0x141   :  { %4823 = vmatprep.subr.bf16.mxu1 %v7601_v6  ;;  %4791 = vmatprep.subr.bf16.mxu0 %v7603_v7  ;;  %v9641_v7 = vld [vmem:[#allocation79_spill] sm:$0xff] }
 0x144   :  { %4825 = vmatpush1.bf16.msra.mxu1 %v7610_v17  ;;  %4793 = vmatpush1.bf16.msra.mxu0 %v7612_v25  ;;  %v9639_v25 = vld [vmem:[#allocation76_spill] sm:$0xff] }
 0x145   :  { %4827 = vmatprep.subr.bf16.mxu1 %v7616_v30  ;;  %4795 = vmatprep.subr.bf16.mxu0 %v7618_v31  ;;  %v9638_v31 = vld [vmem:[#allocation75_spill] sm:$0xff] }
 0x148   :  { %4829 = vmatpush1.bf16.msra.mxu1 %v7625_v49  ;;  %4797 = vmatpush1.bf16.msra.mxu0 %v9630_v11  ;;  %v9640_v11 = vld [vmem:[#allocation77_spill] sm:$0xff] }
 0x149   :  { %4831 = vmatprep.subr.bf16.mxu1 %v9631_v21  ;;  %4799 = vmatprep.subr.bf16.mxu0 %v9632_v26 }
 0x14c   :  { %4833 = vmatpush1.bf16.msra.mxu1 %v9633_v8  ;;  %4801 = vmatpush1.bf16.msra.mxu0 %v9634_v32  ;;  %v9644_v32 = vld [vmem:[#allocation81_spill] sm:$0xff] }
 0x14d   :  { %4835 = vmatprep.subr.bf16.mxu1 %v7646_v19  ;;  %4803 = vmatprep.subr.bf16.mxu0 %v9635_v27 }
 0x150   :  { %4837 = vmatpush1.bf16.msra.mxu1 %v9636_v63  ;;  %4805 = vmatpush1.bf16.msra.mxu0 %v9637_v54  ;;  %v9648_v54 = vld [vmem:[#allocation85_spill] sm:$0xff] }
 0x151   :  { %4839 = vmatprep.subr.bf16.mxu1 %v9638_v31  ;;  %4871 = vmatprep.subr.bf16.mxu0 %v9639_v25 }
 0x154   :  { %4841 = vmatpush1.bf16.msra.mxu1 %v9640_v11 }
 0x155   :  { %4843 = vmatprep.subr.bf16.mxu1 %v9641_v7  ;;  %v9652_v7 = vld [vmem:[#allocation89_spill] sm:$0xff] }
 0x156   :  { %v7967_v26 = vpop.f32.mrb[0].mxu1 }
 0x157   :  { %9642 = vst [vmem:[#allocation154_spill] sm:$0xff] %v7967_v26  ;;  %v7969_v57 = vpop.f32.mrb[1].mxu1  ;;  %v9653_v26 = vld [vmem:[#allocation91_spill] sm:$0xff] }
 0x158   :  { %9643 = vst [vmem:[#allocation155_spill] sm:$0xff] %v7969_v57  ;;  %4845 = vmatpush1.bf16.msra.mxu1 %v9644_v32 }
 0x159   :  { %4847 = vmatprep.subr.bf16.mxu1 %v9645_v45  ;;  %v9656_v45 = vld [vmem:[#allocation93_spill] sm:$0xff] }
 0x15a   :  { %v7973_v27 = vpop.f32.mrb[2].mxu1 }
 0x15b   :  { %9646 = vst [vmem:[#allocation156_spill] sm:$0xff] %v7973_v27  ;;  %v7975_v38 = vpop.f32.mrb[3].mxu1  ;;  %v9657_v27 = vld [vmem:[#allocation95_spill] sm:$0xff] }
 0x15c   :  { %9647 = vst [vmem:[#allocation157_spill] sm:$0xff] %v7975_v38  ;;  %4849 = vmatpush1.bf16.msra.mxu1 %v9648_v54  ;;  %v9658_v38 = vld [vmem:[#allocation97_spill] sm:$0xff]  ;;  %v9659_v54 = vld [vmem:[#allocation99_spill] sm:$0xff] }
 0x15d   :  { %4851 = vmatprep.subr.bf16.mxu1 %v9649_v24  ;;  %v9660_v24 = vld [vmem:[#allocation101_spill] sm:$0xff] }
 0x15e   :  { %v7979_v25 = vpop.f32.mrb[4].mxu1 }
 0x15f   :  { %9650 = vst [vmem:[#allocation158_spill] sm:$0xff] %v7979_v25  ;;  %v7981_v15 = vpop.f32.mrb[5].mxu1  ;;  %v9661_v25 = vld [vmem:[#allocation103_spill] sm:$0xff] }
 0x160   :  { %9651 = vst [vmem:[#allocation159_spill] sm:$0xff] %v7981_v15  ;;  %4853 = vmatpush1.bf16.msra.mxu1 %v9652_v7  ;;  %v9662_v15 = vld [vmem:[#allocation105_spill] sm:$0xff]  ;;  %v9663_v7 = vld [vmem:[#allocation107_spill] sm:$0xff] }
 0x161   :  { %4855 = vmatprep.subr.bf16.mxu1 %v9653_v26 }
 0x162   :  { %v7985_v57 = vpop.f32.mrb[6].mxu1 }
 0x163   :  { %9654 = vst [vmem:[#allocation160_spill] sm:$0xff] %v7985_v57  ;;  %v7987_v32 = vpop.f32.mrb[7].mxu1 }
 0x164   :  { %9655 = vst [vmem:[#allocation161_spill] sm:$0xff] %v7987_v32  ;;  %4857 = vmatpush1.bf16.msra.mxu1 %v9656_v45  ;;  %v7997_v32 = vshrl.u32 %v198_v3, 7 }
 0x165   :  { %4859 = vmatprep.subr.bf16.mxu1 %v9657_v27 }
 0x166   :  { %9664 = vst [vmem:[#allocation162_spill] sm:$0xff] %v7997_v32  ;;  %v9361_v45 = vsub.s32 0, %v7997_v32  ;;  %v9367_v27 = vsub.s32 2, %v7997_v32 }
 0x168   :  { %4861 = vmatpush1.bf16.msra.mxu1 %v9658_v38 }
 0x169   :  { %4863 = vmatprep.subr.bf16.mxu1 %v9659_v54 }
 0x16c   :  { %4865 = vmatpush1.bf16.msra.mxu1 %v9660_v24  ;;  %v196_v24 = vld [vmem:[%s9184_s4] sm:$0xff] }
 0x16d   :  { %4867 = vmatprep.subr.bf16.mxu1 %v9661_v25  ;;  %v9366_v25 = vsub.s32 1, %v7997_v32  ;;  %v8012_v3 = vrot.slane %v196_v24, %v9367_v27 }
 0x16f   :  { %9666 = vst [vmem:[#allocation164_spill] sm:$0xff] %v8012_v3  ;;  %v8016_v11 = vrot.slane %v196_v24, %v9366_v25 }
 0x170   :  { %4869 = vmatpush1.bf16.msra.mxu1 %v9662_v15  ;;  %v212_v15 = vsub.s32 3, %v7997_v32 }
 0x171   :  { %4935 = vmatprep.subr.bf16.mxu1 %v9663_v7  ;;  %v8008_v7 = vrot.slane %v196_v24, %v9361_v45  ;;  %9667 = vst [vmem:[#allocation165_spill] sm:$0xff] %v8016_v11 }
 0x172   :  { %v8018_v62 = vrot.slane %v196_v24, %v212_v15  ;;  %v216_v15 = vsub.s32 4, %v7997_v32 }
 0x173   :  { %9665 = vst [vmem:[#allocation163_spill] sm:$0xff] %v8008_v7 }
 0x174   :  { %9668 = vst [vmem:[#allocation166_spill] sm:$0xff] %v8018_v62 }
 0x1a6   :  { %v1113_v26 = vpop.f32.mrb[0].mxu0 }
 0x1a7   :  { %v1115_v57 = vpop.f32.mrb[1].mxu0  ;;  %v6638_v31 = vadd.f32 %v1113_v26, %v8008_v7  ;;  %v220_v26 = vsub.s32 5, %v7997_v32 }
 0x1a8   :  { %v6639_v50 = vadd.f32 %v1115_v57, %v8016_v11 }
 0x1a9   :  { %v4318_v45 = vmul.f32 -1.442695, %v6638_v31  ;;  %v8028_v31 = vrot.slane %v196_v24, %v220_v26 }
 0x1aa   :  { %v4319_v19 = vmul.f32 -1.442695, %v6639_v50 }
 0x1ab   :  { %6782 = vpow2.f32 %v4318_v45  ;;  %9670 = vst [vmem:[#allocation168_spill] sm:$0xff] %v8028_v31 }
 0x1ac   :  { %6784 = vpow2.f32 %v4319_v19 }
 0x1b5   :  { %v6783_v25 = vpop.eup %6782 }
 0x1b6   :  { %v6785_v27 = vpop.eup %6784  ;;  %v1345_v11 = vadd.f32 1.0, %v6783_v25 }
 0x1c6   :  { %v1184_v38 = vpop.f32.mrb[8].mxu1 }
 0x1c7   :  { %v1186_v54 = vpop.f32.mrb[9].mxu1  ;;  %v6662_v63 = vadd.f32 %v1184_v38, %v8012_v3  ;;  %v1346_v38 = vadd.f32 1.0, %v6785_v27  ;;  %v120_v27 = vld [vmem:[#allocation11] sm:$0xff] }
 0x1c8   :  { %v6663_v44 = vadd.f32 %v1186_v54, %v8018_v62  ;;  %v8026_v54 = vrot.slane %v196_v24, %v216_v15  ;;  %v121_v15 = vld [vmem:[#allocation11 + $0x8] sm:$0xff] }
 0x1c9   :  { %v4320_v37 = vmul.f32 -1.442695, %v6662_v63 }
 0x1ca   :  { %v4321_v8 = vmul.f32 -1.442695, %v6663_v44  ;;  %9669 = vst [vmem:[#allocation167_spill] sm:$0xff] %v8026_v54 }
 0x1cb   :  { %6786 = vpow2.f32 %v4320_v37 }
 0x1cc   :  { %6788 = vpow2.f32 %v4321_v8 }
 0x1cd   :  { %6790 = vrcp.f32 %v1345_v11 }
 0x1ce   :  { %6792 = vrcp.f32 %v1346_v38 }
 0x1d5   :  { %v6787_v36 = vpop.eup %6786 }
 0x1d6   :  { %v6789_v57 = vpop.eup %6788  ;;  %v1357_v3 = vadd.f32 1.0, %v6787_v36 }
 0x1d7   :  { %v1358_v50 = vadd.f32 1.0, %v6789_v57  ;;  %v6791_v25 = vpop.eup %6790 }
 0x1d8   :  { %6794 = vrcp.f32 %v1357_v3  ;;  %v6793_v8 = vpop.eup %6792 }
 0x1d9   :  { %6796 = vrcp.f32 %v1358_v50  ;;  %v224_v50 = vsub.s32 6, %v7997_v32 }
 0x1e2   :  { %v6795_v36 = vpop.eup %6794 }
 0x1e3   :  { %v6797_v63 = vpop.eup %6796  ;;  %v1377_v11 = vmul.f32 %v6795_v36, %v120_v27 }
 0x1e4   :  { %v1378_v62 = vmul.f32 %v6797_v63, %v121_v15 }
 0x1e6   :  { %v1255_v37 = vpop.f32.mrb[8].mxu0 }
 0x1e7   :  { %v6678_v44 = vadd.f32 %v1255_v37, %v8026_v54  ;;  %v1257_v45 = vpop.f32.mrb[9].mxu0 }
 0x1e8   :  { %v6679_v19 = vadd.f32 %v1257_v45, %v8028_v31  ;;  %v8038_v45 = vrot.slane %v196_v24, %v224_v50  ;;  %v9677_v50 = vld [vmem:[#allocation82_spill] sm:$0xff] }
 0x1e9   :  { %6798 = vtanh.f32 %v6678_v44  ;;  %v228_v44 = vsub.s32 7, %v7997_v32  ;;  %v9690_v32 = vld [vmem:[#allocation124_spill] sm:$0xff] }
 0x1ea   :  { %6800 = vtanh.f32 %v6679_v19  ;;  %9671 = vst [vmem:[#allocation169_spill] sm:$0xff] %v8038_v45 }
 0x1eb   :  { %v8040_v19 = vrot.slane %v196_v24, %v228_v44  ;;  %v9678_v44 = vld [vmem:[#allocation112_spill] sm:$0xff] }
 0x1f3   :  { %v6799_v26 = vpop.eup %6798 }
 0x1f4   :  { %v6801_v57 = vpop.eup %6800  ;;  %v1379_v38 = vmul.f32 %v6799_v26, %v6791_v25 }
 0x1f5   :  { %v1380_v3 = vmul.f32 %v6801_v57, %v6793_v8 }
 0x1f6   :  { %v8032_v7 = vadd.f32 %v1379_v38, %v1377_v11  ;;  %v9675_v38 = vld [vmem:[#allocation109_spill] sm:$0xff] }
 0x1f7   :  { %v8034_v37 = vadd.f32 %v1380_v3, %v1378_v62  ;;  %v9676_v3 = vld [vmem:[#allocation80_spill] sm:$0xff] }
 0x206   :  { %v1326_v31 = vpop.f32.mrb[24].mxu1 }
 0x207   :  { %v6694_v54 = vadd.f32 %v1326_v31, %v8038_v45  ;;  %v1328_v21 = vpop.f32.mrb[25].mxu1 }
 0x208   :  { %v6695_v25 = vadd.f32 %v1328_v21, %v8040_v19 }
 0x209   :  { %v4322_v36 = vmul.f32 -1.442695, %v6694_v54  ;;  %v9674_v54 = vld [vmem:[#allocation78_spill] sm:$0xff] }
 0x20a   :  { %v4323_v8 = vmul.f32 -1.442695, %v6695_v25  ;;  %v9679_v25 = vld [vmem:[#allocation84_spill] sm:$0xff] }
 0x20b   :  { %6802 = vpow2.f32 %v4322_v36  ;;  %v9680_v36 = vld [vmem:[#allocation114_spill] sm:$0xff] }
 0x20c   :  { %6804 = vpow2.f32 %v4323_v8  ;;  %v9681_v8 = vld [vmem:[#allocation86_spill] sm:$0xff] }
 0x20d   :  { %6806 = vtanh.f32 %v8034_v37 }
 0x215   :  { %v6803_v62 = vpop.eup %6802 }
 0x216   :  { %v6805_v27 = vpop.eup %6804  ;;  %v1371_v63 = vadd.f32 1.0, %v6803_v62  ;;  %v9682_v62 = vld [vmem:[#allocation116_spill] sm:$0xff] }
 0x217   :  { %v1372_v15 = vadd.f32 1.0, %v6805_v27  ;;  %v6807_v24 = vpop.eup %6806  ;;  %v9683_v27 = vld [vmem:[#allocation88_spill] sm:$0xff] }
 0x218   :  { %6808 = vrcp.f32 %v1371_v63  ;;  %v9684_v63 = vld [vmem:[#allocation118_spill] sm:$0xff] }
 0x219   :  { %6810 = vrcp.f32 %v1372_v15  ;;  %v9685_v15 = vld [vmem:[#allocation90_spill] sm:$0xff] }
 0x21a   :  { %6812 = vtanh.f32 %v8032_v7 }
 0x222   :  { %v6809_v26 = vpop.eup %6808 }
 0x223   :  { %v6811_v31 = vpop.eup %6810 }
 0x224   :  { %v6813_v57 = vpop.eup %6812  ;;  %v8046_v11 = vmul.f32 %v6811_v31, %v6807_v24  ;;  %v9686_v24 = vld [vmem:[#allocation120_spill] sm:$0xff]  ;;  %v9688_v31 = vld [vmem:[#allocation122_spill] sm:$0xff] }
 0x225   :  { %v8048_v21 = vmul.f32 %v6813_v57, %v6809_v26  ;;  %v9687_v26 = vld [vmem:[#allocation92_spill] sm:$0xff]  ;;  %v9689_v57 = vld [vmem:[#allocation94_spill] sm:$0xff] }
 0x226   :  { %9672 = vst [vmem:[#allocation170_spill] sm:$0xff] %v8046_v11  ;;  %1462 = vmatprep.mubr.f32.mxu0 %v8046_v11  ;;  %1533 = vmatprep.mubr.f32.mxu1 %v8046_v11 }
 0x227   :  { %9673 = vst [vmem:[#allocation171_spill] sm:$0xff] %v8048_v21  ;;  %1463 = vmatmul.mubr.f32.vlgmr.msra.gmra.mrb[2].mxu0 %v8048_v21  ;;  %1534 = vmatmul.mubr.f32.vlgmr.msra.gmra.mrb[10].mxu1 %v8048_v21 }
 0x228   :  { %4873 = vmatpush1.bf16.msra.mxu0 %v9674_v54  ;;  %4937 = vmatpush1.bf16.msra.mxu1 %v9675_v38 }
 0x229   :  { %1604 = vmatprep.mubr.f32.mxu0 %v8046_v11  ;;  %1675 = vmatprep.mubr.f32.mxu1 %v8046_v11  ;;  %v9691_v11 = vld [vmem:[#allocation96_spill] sm:$0xff] }
 0x22a   :  { %4875 = vmatprep.subr.bf16.mxu0 %v9676_v3  ;;  %4939 = vmatprep.subr.bf16.mxu1 %v7777_v53 }
 0x22c   :  { %4877 = vmatpush1.bf16.msra.mxu0 %v9677_v50  ;;  %4941 = vmatpush1.bf16.msra.mxu1 %v9678_v44 }
 0x22d   :  { %4879 = vmatprep.subr.bf16.mxu0 %v9679_v25  ;;  %4943 = vmatprep.subr.bf16.mxu1 %v9680_v36 }
 0x230   :  { %4881 = vmatpush1.bf16.msra.mxu0 %v9681_v8  ;;  %4945 = vmatpush1.bf16.msra.mxu1 %v9682_v62  ;;  %v9692_v62 = vld [vmem:[#allocation98_spill] sm:$0xff] }
 0x231   :  { %4883 = vmatprep.subr.bf16.mxu0 %v9683_v27  ;;  %4947 = vmatprep.subr.bf16.mxu1 %v9684_v63  ;;  %v9693_v27 = vld [vmem:[#allocation128_spill] sm:$0xff] }
 0x232   :  { %v9694_v63 = vld [vmem:[#allocation100_spill] sm:$0xff] }
 0x234   :  { %4885 = vmatpush1.bf16.msra.mxu0 %v9685_v15  ;;  %4949 = vmatpush1.bf16.msra.mxu1 %v9686_v24  ;;  %v9695_v24 = vld [vmem:[#allocation102_spill] sm:$0xff] }
 0x235   :  { %4887 = vmatprep.subr.bf16.mxu0 %v9687_v26  ;;  %4951 = vmatprep.subr.bf16.mxu1 %v9688_v31  ;;  %v9696_v31 = vld [vmem:[#allocation104_spill] sm:$0xff] }
 0x238   :  { %4889 = vmatpush1.bf16.msra.mxu0 %v9689_v57  ;;  %4953 = vmatpush1.bf16.msra.mxu1 %v9690_v32  ;;  %v9697_v32 = vld [vmem:[#allocation106_spill] sm:$0xff] }
 0x239   :  { %4891 = vmatprep.subr.bf16.mxu0 %v9691_v11  ;;  %4955 = vmatprep.subr.bf16.mxu1 %v7827_v48  ;;  %v9698_v48 = vld [vmem:[#allocation108_spill] sm:$0xff] }
 0x23c   :  { %4893 = vmatpush1.bf16.msra.mxu0 %v9692_v62  ;;  %4957 = vmatpush1.bf16.msra.mxu1 %v9693_v27  ;;  %v9699_v27 = vld [vmem:[#allocation110_spill] sm:$0xff] }
 0x23d   :  { %4895 = vmatprep.subr.bf16.mxu0 %v9694_v63  ;;  %4959 = vmatprep.subr.bf16.mxu1 %v7839_v40  ;;  %v9700_v40 = vld [vmem:[#allocation111_spill] sm:$0xff] }
 0x240   :  { %4897 = vmatpush1.bf16.msra.mxu0 %v9695_v24  ;;  %4961 = vmatpush1.bf16.msra.mxu1 %v7845_v13  ;;  %v9701_v13 = vld [vmem:[#allocation113_spill] sm:$0xff] }
 0x241   :  { %4899 = vmatprep.subr.bf16.mxu0 %v9696_v31  ;;  %4963 = vmatprep.subr.bf16.mxu1 %v7851_v41  ;;  %v9702_v41 = vld [vmem:[#allocation115_spill] sm:$0xff] }
 0x244   :  { %4901 = vmatpush1.bf16.msra.mxu0 %v9697_v32  ;;  %4965 = vmatpush1.bf16.msra.mxu1 %v7857_v39  ;;  %v9703_v39 = vld [vmem:[#allocation117_spill] sm:$0xff] }
 0x245   :  { %4903 = vmatprep.subr.bf16.mxu0 %v9698_v48  ;;  %4967 = vmatprep.subr.bf16.mxu1 %v7863_v10  ;;  %v9704_v10 = vld [vmem:[#allocation119_spill] sm:$0xff] }
 0x248   :  { %4905 = vmatpush1.bf16.msra.mxu0 %v9699_v27  ;;  %4969 = vmatpush1.bf16.msra.mxu1 %v7867_v16  ;;  %v9705_v16 = vld [vmem:[#allocation121_spill] sm:$0xff] }
 0x249   :  { %4907 = vmatprep.subr.bf16.mxu0 %v9700_v40  ;;  %4971 = vmatprep.subr.bf16.mxu1 %v7870_v42  ;;  %v9706_v42 = vld [vmem:[#allocation123_spill] sm:$0xff] }
 0x24c   :  { %4909 = vmatpush1.bf16.msra.mxu0 %v9701_v13  ;;  %4973 = vmatpush1.bf16.msra.mxu1 %v7875_v4  ;;  %v9707_v4 = vld [vmem:[#allocation125_spill] sm:$0xff] }
 0x24d   :  { %4911 = vmatprep.subr.bf16.mxu0 %v9702_v41  ;;  %4975 = vmatprep.subr.bf16.mxu1 %v7879_v9  ;;  %v9708_v9 = vld [vmem:[#allocation127_spill] sm:$0xff] }
 0x250   :  { %4913 = vmatpush1.bf16.msra.mxu0 %v9703_v39  ;;  %4977 = vmatpush1.bf16.msra.mxu1 %v7883_v1 }
 0x251   :  { %4915 = vmatprep.subr.bf16.mxu0 %v9704_v10  ;;  %4979 = vmatprep.subr.bf16.mxu1 %v7887_v5 }
 0x254   :  { %4917 = vmatpush1.bf16.msra.mxu0 %v9705_v16  ;;  %4981 = vmatpush1.bf16.msra.mxu1 %v7891_v34 }
 0x255   :  { %4919 = vmatprep.subr.bf16.mxu0 %v9706_v42  ;;  %4983 = vmatprep.subr.bf16.mxu1 %v7895_v55 }
 0x258   :  { %4921 = vmatpush1.bf16.msra.mxu0 %v9707_v4  ;;  %4985 = vmatpush1.bf16.msra.mxu1 %v7899_v47  ;;  %v9709_v47 = vld [vmem:[#allocation137_spill] sm:$0xff] }
 0x259   :  { %4923 = vmatprep.subr.bf16.mxu0 %v9708_v9  ;;  %4987 = vmatprep.subr.bf16.mxu1 %v7903_v33  ;;  %v9710_v33 = vld [vmem:[#allocation27_spill] sm:$0xff] }
 0x25c   :  { %4925 = vmatpush1.bf16.msra.mxu0 %v7835_v18  ;;  %4989 = vmatpush1.bf16.msra.mxu1 %v7907_v61 }
 0x25d   :  { %4927 = vmatprep.subr.bf16.mxu0 %v7841_v52  ;;  %4991 = vmatprep.subr.bf16.mxu1 %v7911_v46  ;;  %v9711_v46 = vld [vmem:[#allocation28_spill] sm:$0xff] }
 0x260   :  { %4929 = vmatpush1.bf16.msra.mxu0 %v7847_v58  ;;  %4993 = vmatpush1.bf16.msra.mxu1 %v7915_v12  ;;  %v9712_v12 = vld [vmem:[#allocation29_spill] sm:$0xff] }
 0x261   :  { %4931 = vmatprep.subr.bf16.mxu0 %v7853_v0  ;;  %4995 = vmatprep.subr.bf16.mxu1 %v7919_v60  ;;  %v9713_v60 = vld [vmem:[#allocation30_spill] sm:$0xff] }
 0x264   :  { %4933 = vmatpush1.bf16.msra.mxu0 %v9709_v47  ;;  %4997 = vmatpush1.bf16.msra.mxu1 %v7923_v51  ;;  %v9714_v51 = vld [vmem:[#allocation31_spill] sm:$0xff] }
 0x265   :  { %4999 = vmatprep.subr.bf16.mxu0 %v9710_v33  ;;  %5063 = vmatprep.subr.bf16.mxu1 %v7491_v20  ;;  %v9715_v20 = vld [vmem:[#allocation32_spill] sm:$0xff] }
 0x267   :  { %1605 = vmatmul.mubr.f32.vlgmr.msra.gmra.mrb[10].mxu0 %v8048_v21  ;;  %1676 = vmatmul.mubr.f32.vlgmr.msra.gmra.mrb[26].mxu1 %v8048_v21  ;;  %v9716_v21 = vld [vmem:[#allocation33_spill] sm:$0xff] }
 0x268   :  { %5001 = vmatpush1.bf16.msra.mxu0 %v9711_v46  ;;  %5065 = vmatpush1.bf16.msra.mxu1 %v7551_v59  ;;  %v9717_v59 = vld [vmem:[#allocation34_spill] sm:$0xff] }
 0x269   :  { %5003 = vmatprep.subr.bf16.mxu0 %v9712_v12  ;;  %5067 = vmatprep.subr.bf16.mxu1 %v7556_v2  ;;  %v9718_v2 = vld [vmem:[#allocation35_spill] sm:$0xff] }
 0x26c   :  { %5005 = vmatpush1.bf16.msra.mxu0 %v9713_v60  ;;  %5069 = vmatpush1.bf16.msra.mxu1 %v7565_v14  ;;  %v9719_v14 = vld [vmem:[#allocation37_spill] sm:$0xff] }
 0x26d   :  { %5007 = vmatprep.subr.bf16.mxu0 %v9714_v51  ;;  %5071 = vmatprep.subr.bf16.mxu1 %v7571_v23  ;;  %v9764_v23 = vld [vmem:[#allocation166_spill] sm:$0xff] }
 0x270   :  { %5009 = vmatpush1.bf16.msra.mxu0 %v9715_v20  ;;  %5073 = vmatpush1.bf16.msra.mxu1 %v7580_v35  ;;  %v9762_v35 = vld [vmem:[#allocation164_spill] sm:$0xff]  ;;  %v9763_v20 = vld [vmem:[#allocation165_spill] sm:$0xff] }
 0x271   :  { %5011 = vmatprep.subr.bf16.mxu0 %v9716_v21  ;;  %5075 = vmatprep.subr.bf16.mxu1 %v7586_v43  ;;  %v9761_v21 = vld [vmem:[#allocation163_spill] sm:$0xff] }
 0x274   :  { %5013 = vmatpush1.bf16.msra.mxu0 %v9717_v59  ;;  %5077 = vmatpush1.bf16.msra.mxu1 %v7595_v56  ;;  %v9720_v59 = vld [vmem:[#allocation67_spill] sm:$0xff]  ;;  %v9721_v56 = vld [vmem:[#allocation41_spill] sm:$0xff] }
 0x275   :  { %5015 = vmatprep.subr.bf16.mxu0 %v9718_v2  ;;  %5079 = vmatprep.subr.bf16.mxu1 %v7601_v6  ;;  %v9722_v2 = vld [vmem:[#allocation69_spill] sm:$0xff]  ;;  %v9723_v6 = vld [vmem:[#allocation42_spill] sm:$0xff] }
 0x278   :  { %5017 = vmatpush1.bf16.msra.mxu0 %v9719_v14  ;;  %5081 = vmatpush1.bf16.msra.mxu1 %v7610_v17  ;;  %v9724_v14 = vld [vmem:[#allocation71_spill] sm:$0xff] }
 0x279   :  { %5019 = vmatprep.subr.bf16.mxu0 %v7503_v22  ;;  %5083 = vmatprep.subr.bf16.mxu1 %v7616_v30  ;;  %v9725_v17 = vld [vmem:[#allocation43_spill] sm:$0xff]  ;;  %v9726_v22 = vld [vmem:[#allocation73_spill] sm:$0xff]  ;;  %v9727_v30 = vld [vmem:[#allocation44_spill] sm:$0xff] }
 0x27c   :  { %5021 = vmatpush1.bf16.msra.mxu0 %v7513_v28  ;;  %5085 = vmatpush1.bf16.msra.mxu1 %v7625_v49  ;;  %v9728_v28 = vld [vmem:[#allocation75_spill] sm:$0xff]  ;;  %v9729_v49 = vld [vmem:[#allocation46_spill] sm:$0xff] }
 0x27d   :  { %5023 = vmatprep.subr.bf16.mxu0 %v7516_v29  ;;  %5087 = vmatprep.subr.bf16.mxu1 %v9720_v59  ;;  %v9730_v29 = vld [vmem:[#allocation77_spill] sm:$0xff]  ;;  %v9731_v59 = vld [vmem:[#allocation48_spill] sm:$0xff] }
 0x280   :  { %5025 = vmatpush1.bf16.msra.mxu0 %v9721_v56  ;;  %5089 = vmatpush1.bf16.msra.mxu1 %v9722_v2  ;;  %v9732_v56 = vld [vmem:[#allocation79_spill] sm:$0xff]  ;;  %v9733_v2 = vld [vmem:[#allocation50_spill] sm:$0xff] }
 0x281   :  { %5027 = vmatprep.subr.bf16.mxu0 %v9723_v6  ;;  %5091 = vmatprep.subr.bf16.mxu1 %v9724_v14  ;;  %v9734_v6 = vld [vmem:[#allocation81_spill] sm:$0xff]  ;;  %v9735_v14 = vld [vmem:[#allocation52_spill] sm:$0xff] }
 0x284   :  { %5029 = vmatpush1.bf16.msra.mxu0 %v9725_v17  ;;  %5093 = vmatpush1.bf16.msra.mxu1 %v9726_v22  ;;  %v9736_v17 = vld [vmem:[#allocation83_spill] sm:$0xff]  ;;  %v9737_v22 = vld [vmem:[#allocation54_spill] sm:$0xff] }
 0x285   :  { %5031 = vmatprep.subr.bf16.mxu0 %v9727_v30  ;;  %5095 = vmatprep.subr.bf16.mxu1 %v9728_v28  ;;  %v9738_v30 = vld [vmem:[#allocation85_spill] sm:$0xff]  ;;  %v9739_v28 = vld [vmem:[#allocation56_spill] sm:$0xff] }
 0x288   :  { %5033 = vmatpush1.bf16.msra.mxu0 %v9729_v49  ;;  %5097 = vmatpush1.bf16.msra.mxu1 %v9730_v29  ;;  %v9740_v49 = vld [vmem:[#allocation87_spill] sm:$0xff]  ;;  %v9741_v29 = vld [vmem:[#allocation58_spill] sm:$0xff] }
 0x289   :  { %5035 = vmatprep.subr.bf16.mxu0 %v9731_v59  ;;  %5099 = vmatprep.subr.bf16.mxu1 %v9732_v56  ;;  %v9742_v59 = vld [vmem:[#allocation89_spill] sm:$0xff]  ;;  %v9743_v56 = vld [vmem:[#allocation60_spill] sm:$0xff] }
 0x28c   :  { %5037 = vmatpush1.bf16.msra.mxu0 %v9733_v2  ;;  %5101 = vmatpush1.bf16.msra.mxu1 %v9734_v6  ;;  %v9744_v2 = vld [vmem:[#allocation91_spill] sm:$0xff]  ;;  %v9745_v6 = vld [vmem:[#allocation62_spill] sm:$0xff] }
 0x28d   :  { %5039 = vmatprep.subr.bf16.mxu0 %v9735_v14  ;;  %5103 = vmatprep.subr.bf16.mxu1 %v9736_v17  ;;  %v9746_v14 = vld [vmem:[#allocation93_spill] sm:$0xff]  ;;  %v9747_v17 = vld [vmem:[#allocation64_spill] sm:$0xff] }
 0x290   :  { %5041 = vmatpush1.bf16.msra.mxu0 %v9737_v22  ;;  %5105 = vmatpush1.bf16.msra.mxu1 %v9738_v30  ;;  %v9748_v22 = vld [vmem:[#allocation95_spill] sm:$0xff]  ;;  %v9749_v30 = vld [vmem:[#allocation66_spill] sm:$0xff] }
 0x291   :  { %5043 = vmatprep.subr.bf16.mxu0 %v9739_v28  ;;  %5107 = vmatprep.subr.bf16.mxu1 %v9740_v49  ;;  %v9750_v28 = vld [vmem:[#allocation97_spill] sm:$0xff]  ;;  %v9751_v49 = vld [vmem:[#allocation68_spill] sm:$0xff] }
 0x294   :  { %5045 = vmatpush1.bf16.msra.mxu0 %v9741_v29  ;;  %5109 = vmatpush1.bf16.msra.mxu1 %v9742_v59  ;;  %v9752_v29 = vld [vmem:[#allocation99_spill] sm:$0xff]  ;;  %v9753_v59 = vld [vmem:[#allocation70_spill] sm:$0xff] }
 0x295   :  { %5047 = vmatprep.subr.bf16.mxu0 %v9743_v56  ;;  %5111 = vmatprep.subr.bf16.mxu1 %v9744_v2  ;;  %v9754_v56 = vld [vmem:[#allocation101_spill] sm:$0xff]  ;;  %v9755_v2 = vld [vmem:[#allocation72_spill] sm:$0xff] }
 0x298   :  { %5049 = vmatpush1.bf16.msra.mxu0 %v9745_v6  ;;  %5113 = vmatpush1.bf16.msra.mxu1 %v9746_v14  ;;  %v9756_v6 = vld [vmem:[#allocation103_spill] sm:$0xff]  ;;  %v9757_v14 = vld [vmem:[#allocation74_spill] sm:$0xff] }
 0x299   :  { %5051 = vmatprep.subr.bf16.mxu0 %v9747_v17  ;;  %5115 = vmatprep.subr.bf16.mxu1 %v9748_v22  ;;  %v9758_v17 = vld [vmem:[#allocation105_spill] sm:$0xff]  ;;  %v9759_v22 = vld [vmem:[#allocation76_spill] sm:$0xff] }
 0x29c   :  { %5053 = vmatpush1.bf16.msra.mxu0 %v9749_v30  ;;  %5117 = vmatpush1.bf16.msra.mxu1 %v9750_v28  ;;  %v9760_v30 = vld [vmem:[#allocation107_spill] sm:$0xff] }
 0x29d   :  { %5055 = vmatprep.subr.bf16.mxu0 %v9751_v49  ;;  %5119 = vmatprep.subr.bf16.mxu1 %v9752_v29 }
 0x2a0   :  { %5057 = vmatpush1.bf16.msra.mxu0 %v9753_v59  ;;  %5121 = vmatpush1.bf16.msra.mxu1 %v9754_v56 }
 0x2a1   :  { %5059 = vmatprep.subr.bf16.mxu0 %v9755_v2  ;;  %5123 = vmatprep.subr.bf16.mxu1 %v9756_v6 }
 0x2a4   :  { %5061 = vmatpush1.bf16.msra.mxu0 %v9757_v14  ;;  %5125 = vmatpush1.bf16.msra.mxu1 %v9758_v17 }
 0x2a5   :  { %5127 = vmatprep.subr.bf16.mxu0 %v9759_v22  ;;  %5191 = vmatprep.subr.bf16.mxu1 %v9760_v30 }
 0x2fa   :  { %v1464_v28 = vpop.f32.mrb[2].mxu0  ;;  %v1535_v49 = vpop.f32.mrb[10].mxu1 }
 0x2fb   :  { %v1466_v43 = vpop.f32.mrb[3].mxu0  ;;  %v1537_v29 = vpop.f32.mrb[11].mxu1  ;;  %v6640_v59 = vadd.f32 %v1464_v28, %v9761_v21  ;;  %v6664_v56 = vadd.f32 %v1535_v49, %v9762_v35 }
 0x2fc   :  { %v6641_v2 = vadd.f32 %v1466_v43, %v9763_v20  ;;  %v6665_v6 = vadd.f32 %v1537_v29, %v9764_v23 }
 0x2fd   :  { %v4324_v51 = vmul.f32 -1.442695, %v6640_v59  ;;  %v4326_v14 = vmul.f32 -1.442695, %v6664_v56  ;;  %v9765_v59 = vld [vmem:[#allocation167_spill] sm:$0xff] }
 0x2fe   :  { %v4325_v60 = vmul.f32 -1.442695, %v6641_v2  ;;  %v4327_v17 = vmul.f32 -1.442695, %v6665_v6 }
 0x2ff   :  { %6814 = vpow2.f32 %v4324_v51 }
 0x300   :  { %6816 = vpow2.f32 %v4326_v14 }
 0x301   :  { %6818 = vpow2.f32 %v4325_v60 }
 0x302   :  { %6820 = vpow2.f32 %v4327_v17  ;;  %v9766_v17 = vld [vmem:[#allocation168_spill] sm:$0xff] }
 0x309   :  { %v6815_v30 = vpop.eup %6814 }
 0x30a   :  { %v6817_v22 = vpop.eup %6816  ;;  %v1696_v33 = vadd.f32 1.0, %v6815_v30 }
 0x30b   :  { %v6819_v12 = vpop.eup %6818  ;;  %v1708_v28 = vadd.f32 1.0, %v6817_v22 }
 0x30c   :  { %v6821_v46 = vpop.eup %6820  ;;  %v1697_v21 = vadd.f32 1.0, %v6819_v12  ;;  %6822 = vrcp.f32 %v1696_v33 }
 0x30d   :  { %v1709_v49 = vadd.f32 1.0, %v6821_v46  ;;  %6824 = vrcp.f32 %v1708_v28 }
 0x30e   :  { %6826 = vrcp.f32 %v1697_v21 }
 0x30f   :  { %6828 = vrcp.f32 %v1709_v49 }
 0x316   :  { %v6823_v30 = vpop.eup %6822 }
 0x317   :  { %v6825_v33 = vpop.eup %6824 }
 0x318   :  { %v6827_v46 = vpop.eup %6826 }
 0x319   :  { %v6829_v21 = vpop.eup %6828 }
 0x33a   :  { %v1606_v43 = vpop.f32.mrb[10].mxu0  ;;  %v1677_v29 = vpop.f32.mrb[26].mxu1 }
 0x33b   :  { %v6680_v2 = vadd.f32 %v1606_v43, %v9765_v59  ;;  %v6696_v56 = vadd.f32 %v1677_v29, %v8038_v45  ;;  %v1608_v14 = vpop.f32.mrb[11].mxu0  ;;  %v1679_v6 = vpop.f32.mrb[27].mxu1  ;;  %v1728_v29 = vmul.f32 %v6825_v33, %v8032_v7 }
 0x33c   :  { %v6681_v60 = vadd.f32 %v1608_v14, %v9766_v17  ;;  %v6697_v51 = vadd.f32 %v1679_v6, %v8040_v19  ;;  %v1729_v14 = vmul.f32 %v6829_v21, %v8034_v37  ;;  %v9772_v21 = vld [vmem:[#allocation120_spill] sm:$0xff] }
 0x33d   :  { %6830 = vtanh.f32 %v6680_v2  ;;  %v4328_v22 = vmul.f32 -1.442695, %v6696_v56 }
 0x33e   :  { %6832 = vtanh.f32 %v6681_v60  ;;  %v4329_v12 = vmul.f32 -1.442695, %v6697_v51 }
 0x33f   :  { %6834 = vpow2.f32 %v4328_v22 }
 0x340   :  { %6836 = vpow2.f32 %v4329_v12 }
 0x347   :  { %v6831_v28 = vpop.eup %6830 }
 0x348   :  { %v6833_v43 = vpop.eup %6832  ;;  %v1730_v45 = vmul.f32 %v6831_v28, %v6823_v30  ;;  %v9773_v28 = vld [vmem:[#allocation122_spill] sm:$0xff] }
 0x349   :  { %v6835_v49 = vpop.eup %6834  ;;  %v1731_v17 = vmul.f32 %v6833_v43, %v6827_v46  ;;  %v9771_v46 = vld [vmem:[#allocation118_spill] sm:$0xff]  ;;  %v9774_v43 = vld [vmem:[#allocation124_spill] sm:$0xff] }
 0x34a   :  { %v6837_v6 = vpop.eup %6836  ;;  %v8196_v2 = vadd.f32 %v1730_v45, %v1728_v29  ;;  %v1722_v56 = vadd.f32 1.0, %v6835_v49  ;;  %v9769_v45 = vld [vmem:[#allocation116_spill] sm:$0xff]  ;;  %v9775_v29 = vld [vmem:[#allocation126_spill] sm:$0xff] }
 0x34b   :  { %v8198_v60 = vadd.f32 %v1731_v17, %v1729_v14  ;;  %v1723_v51 = vadd.f32 1.0, %v6837_v6  ;;  %v9770_v17 = vld [vmem:[#allocation88_spill] sm:$0xff]  ;;  %v9777_v14 = vld [vmem:[#allocation130_spill] sm:$0xff] }
 0x34c   :  { %6838 = vtanh.f32 %v8196_v2  ;;  %v9776_v49 = vld [vmem:[#allocation128_spill] sm:$0xff] }
 0x34d   :  { %6840 = vrcp.f32 %v1722_v56  ;;  %v9778_v6 = vld [vmem:[#allocation132_spill] sm:$0xff]  ;;  %v9779_v56 = vld [vmem:[#allocation134_spill] sm:$0xff] }
 0x34e   :  { %6842 = vtanh.f32 %v8198_v60 }
 0x34f   :  { %6844 = vrcp.f32 %v1723_v51  ;;  %v9780_v51 = vld [vmem:[#allocation136_spill] sm:$0xff] }
 0x356   :  { %v6839_v22 = vpop.eup %6838 }
 0x357   :  { %v6841_v7 = vpop.eup %6840 }
 0x358   :  { %v6843_v12 = vpop.eup %6842  ;;  %v8204_v37 = vmul.f32 %v6841_v7, %v6839_v22  ;;  %v9781_v22 = vld [vmem:[#allocation138_spill] sm:$0xff]  ;;  %v9782_v7 = vld [vmem:[#allocation139_spill] sm:$0xff] }
 0x359   :  { %v6845_v30 = vpop.eup %6844 }
 0x35a   :  { %v8202_v33 = vmul.f32 %v6845_v30, %v6843_v12  ;;  %9768 = vst [vmem:[#allocation109_spill] sm:$0xff] %v8204_v37  ;;  %v9783_v12 = vld [vmem:[#allocation140_spill] sm:$0xff]  ;;  %v9784_v30 = vld [vmem:[#allocation141_spill] sm:$0xff] }
 0x35c   :  { %9767 = vst [vmem:[#allocation78_spill] sm:$0xff] %v8202_v33  ;;  %1814 = vmatprep.mubr.f32.mxu0 %v8202_v33  ;;  %1885 = vmatprep.mubr.f32.mxu1 %v8202_v33 }
 0x35d   :  { %1815 = vmatmul.mubr.f32.vlgmr.msra.gmra.mrb[4].mxu0 %v8204_v37  ;;  %1886 = vmatmul.mubr.f32.vlgmr.msra.gmra.mrb[12].mxu1 %v8204_v37 }
 0x35e   :  { %5129 = vmatpush1.bf16.msra.mxu0 %v9674_v54  ;;  %5193 = vmatpush1.bf16.msra.mxu1 %v9675_v38 }
 0x35f   :  { %1956 = vmatprep.mubr.f32.mxu0 %v8202_v33  ;;  %2027 = vmatprep.mubr.f32.mxu1 %v8202_v33  ;;  %v9785_v33 = vld [vmem:[#allocation142_spill] sm:$0xff] }
 0x360   :  { %5131 = vmatprep.subr.bf16.mxu0 %v9676_v3  ;;  %5195 = vmatprep.subr.bf16.mxu1 %v7777_v53 }
 0x362   :  { %5133 = vmatpush1.bf16.msra.mxu0 %v9677_v50  ;;  %5197 = vmatpush1.bf16.msra.mxu1 %v9678_v44 }
 0x363   :  { %5135 = vmatprep.subr.bf16.mxu0 %v9679_v25  ;;  %5199 = vmatprep.subr.bf16.mxu1 %v9680_v36 }
 0x366   :  { %5137 = vmatpush1.bf16.msra.mxu0 %v9681_v8  ;;  %5201 = vmatpush1.bf16.msra.mxu1 %v9769_v45 }
 0x367   :  { %5139 = vmatprep.subr.bf16.mxu0 %v9770_v17  ;;  %5203 = vmatprep.subr.bf16.mxu1 %v9771_v46 }
 0x36a   :  { %5141 = vmatpush1.bf16.msra.mxu0 %v9685_v15  ;;  %5205 = vmatpush1.bf16.msra.mxu1 %v9772_v21 }
 0x36b   :  { %5143 = vmatprep.subr.bf16.mxu0 %v9687_v26  ;;  %5207 = vmatprep.subr.bf16.mxu1 %v9773_v28 }
 0x36e   :  { %5145 = vmatpush1.bf16.msra.mxu0 %v9689_v57  ;;  %5209 = vmatpush1.bf16.msra.mxu1 %v9774_v43 }
 0x36f   :  { %5147 = vmatprep.subr.bf16.mxu0 %v9691_v11  ;;  %5211 = vmatprep.subr.bf16.mxu1 %v9775_v29 }
 0x372   :  { %5149 = vmatpush1.bf16.msra.mxu0 %v9692_v62  ;;  %5213 = vmatpush1.bf16.msra.mxu1 %v9776_v49 }
 0x373   :  { %5151 = vmatprep.subr.bf16.mxu0 %v9694_v63  ;;  %5215 = vmatprep.subr.bf16.mxu1 %v9777_v14 }
 0x376   :  { %5153 = vmatpush1.bf16.msra.mxu0 %v9695_v24  ;;  %5217 = vmatpush1.bf16.msra.mxu1 %v9778_v6 }
 0x377   :  { %5155 = vmatprep.subr.bf16.mxu0 %v9696_v31  ;;  %5219 = vmatprep.subr.bf16.mxu1 %v9779_v56 }
 0x37a   :  { %5157 = vmatpush1.bf16.msra.mxu0 %v9697_v32  ;;  %5221 = vmatpush1.bf16.msra.mxu1 %v9780_v51 }
 0x37b   :  { %5159 = vmatprep.subr.bf16.mxu0 %v9698_v48  ;;  %5223 = vmatprep.subr.bf16.mxu1 %v9781_v22 }
 0x37e   :  { %5161 = vmatpush1.bf16.msra.mxu0 %v9699_v27  ;;  %5225 = vmatpush1.bf16.msra.mxu1 %v9782_v7 }
 0x37f   :  { %5163 = vmatprep.subr.bf16.mxu0 %v9700_v40  ;;  %5227 = vmatprep.subr.bf16.mxu1 %v9783_v12 }
 0x382   :  { %5165 = vmatpush1.bf16.msra.mxu0 %v9701_v13  ;;  %5229 = vmatpush1.bf16.msra.mxu1 %v9784_v30 }
 0x383   :  { %5167 = vmatprep.subr.bf16.mxu0 %v9702_v41  ;;  %5231 = vmatprep.subr.bf16.mxu1 %v9785_v33  ;;  %v9786_v41 = vld [vmem:[#allocation147_spill] sm:$0xff] }
 0x386   :  { %5169 = vmatpush1.bf16.msra.mxu0 %v9703_v39  ;;  %5233 = vmatpush1.bf16.msra.mxu1 %v7883_v1  ;;  %v9787_v39 = vld [vmem:[#allocation148_spill] sm:$0xff] }
 0x387   :  { %5171 = vmatprep.subr.bf16.mxu0 %v9704_v10  ;;  %5235 = vmatprep.subr.bf16.mxu1 %v7887_v5 }
 0x38a   :  { %5173 = vmatpush1.bf16.msra.mxu0 %v9705_v16  ;;  %5237 = vmatpush1.bf16.msra.mxu1 %v7891_v34  ;;  %v9788_v16 = vld [vmem:[#allocation150_spill] sm:$0xff] }
 0x38b   :  { %5175 = vmatprep.subr.bf16.mxu0 %v9706_v42  ;;  %5239 = vmatprep.subr.bf16.mxu1 %v7895_v55  ;;  %v9789_v42 = vld [vmem:[#allocation151_spill] sm:$0xff] }
 0x38e   :  { %5177 = vmatpush1.bf16.msra.mxu0 %v9707_v4  ;;  %5241 = vmatpush1.bf16.msra.mxu1 %v9786_v41  ;;  %v9790_v4 = vld [vmem:[#allocation152_spill] sm:$0xff]  ;;  %v9858_v41 = vld [vmem:[#allocation163_spill] sm:$0xff] }
 0x38f   :  { %5179 = vmatprep.subr.bf16.mxu0 %v9708_v9  ;;  %5243 = vmatprep.subr.bf16.mxu1 %v9787_v39  ;;  %v9791_v9 = vld [vmem:[#allocation153_spill] sm:$0xff]  ;;  %v9792_v39 = vld [vmem:[#allocation27_spill] sm:$0xff] }
 0x392   :  { %5181 = vmatpush1.bf16.msra.mxu0 %v7835_v18  ;;  %5245 = vmatpush1.bf16.msra.mxu1 %v7907_v61  ;;  %v9793_v18 = vld [vmem:[#allocation36_spill] sm:$0xff] }
 0x393   :  { %5183 = vmatprep.subr.bf16.mxu0 %v7841_v52  ;;  %5247 = vmatprep.subr.bf16.mxu1 %v9788_v16  ;;  %v9794_v16 = vld [vmem:[#allocation28_spill] sm:$0xff]  ;;  %v9803_v52 = vld [vmem:[#allocation53_spill] sm:$0xff] }
 0x396   :  { %5185 = vmatpush1.bf16.msra.mxu0 %v7847_v58  ;;  %5249 = vmatpush1.bf16.msra.mxu1 %v9789_v42  ;;  %v9795_v58 = vld [vmem:[#allocation45_spill] sm:$0xff] }
 0x397   :  { %5187 = vmatprep.subr.bf16.mxu0 %v7853_v0  ;;  %5251 = vmatprep.subr.bf16.mxu1 %v9790_v4  ;;  %v9796_v42 = vld [vmem:[#allocation29_spill] sm:$0xff]  ;;  %v9797_v0 = vld [vmem:[#allocation47_spill] sm:$0xff]  ;;  %v9798_v4 = vld [vmem:[#allocation30_spill] sm:$0xff] }
 0x39a   :  { %5189 = vmatpush1.bf16.msra.mxu0 %v9709_v47  ;;  %5253 = vmatpush1.bf16.msra.mxu1 %v9791_v9  ;;  %v9799_v47 = vld [vmem:[#allocation49_spill] sm:$0xff]  ;;  %v9800_v9 = vld [vmem:[#allocation31_spill] sm:$0xff] }
 0x39b   :  { %5255 = vmatprep.subr.bf16.mxu0 %v9792_v39  ;;  %5319 = vmatprep.subr.bf16.mxu1 %v9793_v18  ;;  %v9801_v39 = vld [vmem:[#allocation51_spill] sm:$0xff]  ;;  %v9802_v18 = vld [vmem:[#allocation32_spill] sm:$0xff] }
 0x39d   :  { %1957 = vmatmul.mubr.f32.vlgmr.msra.gmra.mrb[12].mxu0 %v8204_v37  ;;  %2028 = vmatmul.mubr.f32.vlgmr.msra.gmra.mrb[28].mxu1 %v8204_v37  ;;  %v9804_v37 = vld [vmem:[#allocation33_spill] sm:$0xff] }
 0x39e   :  { %5257 = vmatpush1.bf16.msra.mxu0 %v9794_v16  ;;  %5321 = vmatpush1.bf16.msra.mxu1 %v9795_v58  ;;  %v9805_v16 = vld [vmem:[#allocation55_spill] sm:$0xff]  ;;  %v9806_v58 = vld [vmem:[#allocation34_spill] sm:$0xff] }
 0x39f   :  { %5259 = vmatprep.subr.bf16.mxu0 %v9796_v42  ;;  %5323 = vmatprep.subr.bf16.mxu1 %v9797_v0  ;;  %v9807_v42 = vld [vmem:[#allocation57_spill] sm:$0xff]  ;;  %v9808_v0 = vld [vmem:[#allocation35_spill] sm:$0xff] }
 0x3a2   :  { %5261 = vmatpush1.bf16.msra.mxu0 %v9798_v4  ;;  %5325 = vmatpush1.bf16.msra.mxu1 %v9799_v47  ;;  %v9809_v4 = vld [vmem:[#allocation59_spill] sm:$0xff]  ;;  %v9810_v47 = vld [vmem:[#allocation37_spill] sm:$0xff] }
 0x3a3   :  { %5263 = vmatprep.subr.bf16.mxu0 %v9800_v9  ;;  %5327 = vmatprep.subr.bf16.mxu1 %v9801_v39  ;;  %v9811_v9 = vld [vmem:[#allocation61_spill] sm:$0xff]  ;;  %v9812_v39 = vld [vmem:[#allocation38_spill] sm:$0xff] }
 0x3a6   :  { %5265 = vmatpush1.bf16.msra.mxu0 %v9802_v18  ;;  %5329 = vmatpush1.bf16.msra.mxu1 %v9803_v52  ;;  %v9813_v18 = vld [vmem:[#allocation63_spill] sm:$0xff] }
 0x3a7   :  { %5267 = vmatprep.subr.bf16.mxu0 %v9804_v37  ;;  %5331 = vmatprep.subr.bf16.mxu1 %v9805_v16  ;;  %v9814_v52 = vld [vmem:[#allocation39_spill] sm:$0xff]  ;;  %v9815_v37 = vld [vmem:[#allocation65_spill] sm:$0xff]  ;;  %v9816_v16 = vld [vmem:[#allocation40_spill] sm:$0xff] }
 0x3aa   :  { %5269 = vmatpush1.bf16.msra.mxu0 %v9806_v58  ;;  %5333 = vmatpush1.bf16.msra.mxu1 %v9807_v42  ;;  %v9817_v58 = vld [vmem:[#allocation67_spill] sm:$0xff]  ;;  %v9818_v42 = vld [vmem:[#allocation41_spill] sm:$0xff] }
 0x3ab   :  { %5271 = vmatprep.subr.bf16.mxu0 %v9808_v0  ;;  %5335 = vmatprep.subr.bf16.mxu1 %v9809_v4  ;;  %v9819_v0 = vld [vmem:[#allocation69_spill] sm:$0xff]  ;;  %v9820_v4 = vld [vmem:[#allocation42_spill] sm:$0xff] }
 0x3ae   :  { %5273 = vmatpush1.bf16.msra.mxu0 %v9810_v47  ;;  %5337 = vmatpush1.bf16.msra.mxu1 %v9811_v9  ;;  %v9821_v47 = vld [vmem:[#allocation71_spill] sm:$0xff] }
 0x3af   :  { %5275 = vmatprep.subr.bf16.mxu0 %v9812_v39  ;;  %5339 = vmatprep.subr.bf16.mxu1 %v9813_v18  ;;  %v9822_v9 = vld [vmem:[#allocation43_spill] sm:$0xff]  ;;  %v9823_v39 = vld [vmem:[#allocation73_spill] sm:$0xff]  ;;  %v9824_v18 = vld [vmem:[#allocation44_spill] sm:$0xff] }
 0x3b2   :  { %5277 = vmatpush1.bf16.msra.mxu0 %v9814_v52  ;;  %5341 = vmatpush1.bf16.msra.mxu1 %v9815_v37  ;;  %v9825_v52 = vld [vmem:[#allocation75_spill] sm:$0xff]  ;;  %v9826_v37 = vld [vmem:[#allocation46_spill] sm:$0xff] }
 0x3b3   :  { %5279 = vmatprep.subr.bf16.mxu0 %v9816_v16  ;;  %5343 = vmatprep.subr.bf16.mxu1 %v9817_v58  ;;  %v9827_v16 = vld [vmem:[#allocation77_spill] sm:$0xff]  ;;  %v9828_v58 = vld [vmem:[#allocation48_spill] sm:$0xff] }
 0x3b6   :  { %5281 = vmatpush1.bf16.msra.mxu0 %v9818_v42  ;;  %5345 = vmatpush1.bf16.msra.mxu1 %v9819_v0  ;;  %v9829_v42 = vld [vmem:[#allocation79_spill] sm:$0xff]  ;;  %v9830_v0 = vld [vmem:[#allocation50_spill] sm:$0xff] }
 0x3b7   :  { %5283 = vmatprep.subr.bf16.mxu0 %v9820_v4  ;;  %5347 = vmatprep.subr.bf16.mxu1 %v9821_v47  ;;  %v9831_v4 = vld [vmem:[#allocation81_spill] sm:$0xff]  ;;  %v9832_v47 = vld [vmem:[#allocation52_spill] sm:$0xff] }
 0x3ba   :  { %5285 = vmatpush1.bf16.msra.mxu0 %v9822_v9  ;;  %5349 = vmatpush1.bf16.msra.mxu1 %v9823_v39  ;;  %v9833_v9 = vld [vmem:[#allocation83_spill] sm:$0xff]  ;;  %v9834_v39 = vld [vmem:[#allocation54_spill] sm:$0xff] }
 0x3bb   :  { %5287 = vmatprep.subr.bf16.mxu0 %v9824_v18  ;;  %5351 = vmatprep.subr.bf16.mxu1 %v9825_v52  ;;  %v9835_v18 = vld [vmem:[#allocation85_spill] sm:$0xff]  ;;  %v9836_v52 = vld [vmem:[#allocation56_spill] sm:$0xff] }
 0x3be   :  { %5289 = vmatpush1.bf16.msra.mxu0 %v9826_v37  ;;  %5353 = vmatpush1.bf16.msra.mxu1 %v9827_v16  ;;  %v9837_v37 = vld [vmem:[#allocation87_spill] sm:$0xff]  ;;  %v9838_v16 = vld [vmem:[#allocation58_spill] sm:$0xff] }
 0x3bf   :  { %5291 = vmatprep.subr.bf16.mxu0 %v9828_v58  ;;  %5355 = vmatprep.subr.bf16.mxu1 %v9829_v42  ;;  %v9839_v58 = vld [vmem:[#allocation89_spill] sm:$0xff]  ;;  %v9840_v42 = vld [vmem:[#allocation60_spill] sm:$0xff] }
 0x3c2   :  { %5293 = vmatpush1.bf16.msra.mxu0 %v9830_v0  ;;  %5357 = vmatpush1.bf16.msra.mxu1 %v9831_v4  ;;  %v9841_v0 = vld [vmem:[#allocation91_spill] sm:$0xff]  ;;  %v9842_v4 = vld [vmem:[#allocation62_spill] sm:$0xff] }
 0x3c3   :  { %5295 = vmatprep.subr.bf16.mxu0 %v9832_v47  ;;  %5359 = vmatprep.subr.bf16.mxu1 %v9833_v9  ;;  %v9843_v47 = vld [vmem:[#allocation93_spill] sm:$0xff]  ;;  %v9844_v9 = vld [vmem:[#allocation64_spill] sm:$0xff] }
 0x3c6   :  { %5297 = vmatpush1.bf16.msra.mxu0 %v9834_v39  ;;  %5361 = vmatpush1.bf16.msra.mxu1 %v9835_v18  ;;  %v9845_v39 = vld [vmem:[#allocation95_spill] sm:$0xff]  ;;  %v9846_v18 = vld [vmem:[#allocation66_spill] sm:$0xff] }
 0x3c7   :  { %5299 = vmatprep.subr.bf16.mxu0 %v9836_v52  ;;  %5363 = vmatprep.subr.bf16.mxu1 %v9837_v37  ;;  %v9847_v52 = vld [vmem:[#allocation97_spill] sm:$0xff]  ;;  %v9848_v37 = vld [vmem:[#allocation68_spill] sm:$0xff] }
 0x3ca   :  { %5301 = vmatpush1.bf16.msra.mxu0 %v9838_v16  ;;  %5365 = vmatpush1.bf16.msra.mxu1 %v9839_v58  ;;  %v9849_v16 = vld [vmem:[#allocation99_spill] sm:$0xff]  ;;  %v9850_v58 = vld [vmem:[#allocation70_spill] sm:$0xff] }
 0x3cb   :  { %5303 = vmatprep.subr.bf16.mxu0 %v9840_v42  ;;  %5367 = vmatprep.subr.bf16.mxu1 %v9841_v0  ;;  %v9851_v42 = vld [vmem:[#allocation101_spill] sm:$0xff]  ;;  %v9852_v0 = vld [vmem:[#allocation72_spill] sm:$0xff] }
 0x3ce   :  { %5305 = vmatpush1.bf16.msra.mxu0 %v9842_v4  ;;  %5369 = vmatpush1.bf16.msra.mxu1 %v9843_v47  ;;  %v9853_v4 = vld [vmem:[#allocation103_spill] sm:$0xff]  ;;  %v9854_v47 = vld [vmem:[#allocation74_spill] sm:$0xff] }
 0x3cf   :  { %5307 = vmatprep.subr.bf16.mxu0 %v9844_v9  ;;  %5371 = vmatprep.subr.bf16.mxu1 %v9845_v39  ;;  %v9855_v9 = vld [vmem:[#allocation105_spill] sm:$0xff]  ;;  %v9856_v39 = vld [vmem:[#allocation76_spill] sm:$0xff] }
 0x3d2   :  { %5309 = vmatpush1.bf16.msra.mxu0 %v9846_v18  ;;  %5373 = vmatpush1.bf16.msra.mxu1 %v9847_v52  ;;  %v9857_v18 = vld [vmem:[#allocation107_spill] sm:$0xff] }
 0x3d3   :  { %5311 = vmatprep.subr.bf16.mxu0 %v9848_v37  ;;  %5375 = vmatprep.subr.bf16.mxu1 %v9849_v16 }
 0x3d6   :  { %5313 = vmatpush1.bf16.msra.mxu0 %v9850_v58  ;;  %5377 = vmatpush1.bf16.msra.mxu1 %v9851_v42 }
 0x3d7   :  { %5315 = vmatprep.subr.bf16.mxu0 %v9852_v0  ;;  %5379 = vmatprep.subr.bf16.mxu1 %v9853_v4 }
 0x3da   :  { %5317 = vmatpush1.bf16.msra.mxu0 %v9854_v47  ;;  %5381 = vmatpush1.bf16.msra.mxu1 %v9855_v9 }
 0x3db   :  { %5383 = vmatprep.subr.bf16.mxu0 %v9856_v39  ;;  %5447 = vmatprep.subr.bf16.mxu1 %v9857_v18 }
 0x430   :  { %v1816_v52 = vpop.f32.mrb[4].mxu0  ;;  %v1887_v37 = vpop.f32.mrb[12].mxu1 }
 0x431   :  { %v1818_v61 = vpop.f32.mrb[5].mxu0  ;;  %v1889_v16 = vpop.f32.mrb[13].mxu1  ;;  %v6642_v58 = vadd.f32 %v1816_v52, %v9858_v41  ;;  %v6666_v42 = vadd.f32 %v1887_v37, %v9762_v35 }
 0x432   :  { %v6643_v0 = vadd.f32 %v1818_v61, %v9763_v20  ;;  %v6667_v4 = vadd.f32 %v1889_v16, %v9764_v23 }
 0x433   :  { %v4330_v55 = vmul.f32 -1.442695, %v6642_v58  ;;  %v4332_v47 = vmul.f32 -1.442695, %v6666_v42 }
 0x434   :  { %v4331_v34 = vmul.f32 -1.442695, %v6643_v0  ;;  %v4333_v9 = vmul.f32 -1.442695, %v6667_v4  ;;  %v9859_v0 = vld [vmem:[#allocation169_spill] sm:$0xff]  ;;  %v9860_v4 = vld [vmem:[#allocation168_spill] sm:$0xff] }
 0x435   :  { %6846 = vpow2.f32 %v4330_v55 }
 0x436   :  { %6848 = vpow2.f32 %v4332_v47 }
 0x437   :  { %6850 = vpow2.f32 %v4331_v34 }
 0x438   :  { %6852 = vpow2.f32 %v4333_v9 }
 0x43f   :  { %v6847_v18 = vpop.eup %6846 }
 0x440   :  { %v6849_v39 = vpop.eup %6848  ;;  %v2048_v1 = vadd.f32 1.0, %v6847_v18 }
 0x441   :  { %v6851_v5 = vpop.eup %6850  ;;  %v2060_v52 = vadd.f32 1.0, %v6849_v39 }
 0x442   :  { %v6853_v10 = vpop.eup %6852  ;;  %v2049_v41 = vadd.f32 1.0, %v6851_v5  ;;  %6854 = vrcp.f32 %v2048_v1 }
 0x443   :  { %v2061_v37 = vadd.f32 1.0, %v6853_v10  ;;  %6856 = vrcp.f32 %v2060_v52 }
 0x444   :  { %6858 = vrcp.f32 %v2049_v41 }
 0x445   :  { %6860 = vrcp.f32 %v2061_v37 }
 0x44c   :  { %v6855_v1 = vpop.eup %6854 }
 0x44d   :  { %v6857_v10 = vpop.eup %6856 }
 0x44e   :  { %v6859_v41 = vpop.eup %6858 }
 0x44f   :  { %v6861_v5 = vpop.eup %6860 }
 0x470   :  { %v1958_v61 = vpop.f32.mrb[12].mxu0  ;;  %v2029_v16 = vpop.f32.mrb[28].mxu1 }
 0x471   :  { %v6682_v58 = vadd.f32 %v1958_v61, %v9765_v59  ;;  %v6698_v42 = vadd.f32 %v2029_v16, %v9859_v0  ;;  %v1960_v47 = vpop.f32.mrb[13].mxu0  ;;  %v2031_v34 = vpop.f32.mrb[29].mxu1  ;;  %v2080_v16 = vmul.f32 %v6857_v10, %v8196_v2 }
 0x472   :  { %v6683_v9 = vadd.f32 %v1960_v47, %v9860_v4  ;;  %v6699_v55 = vadd.f32 %v2031_v34, %v8040_v19  ;;  %v2081_v47 = vmul.f32 %v6861_v5, %v8198_v60  ;;  %v9866_v5 = vld [vmem:[#allocation119_spill] sm:$0xff] }
 0x473   :  { %6862 = vtanh.f32 %v6682_v58  ;;  %v4334_v18 = vmul.f32 -1.442695, %v6698_v42 }
 0x474   :  { %6864 = vtanh.f32 %v6683_v9  ;;  %v4335_v39 = vmul.f32 -1.442695, %v6699_v55 }
 0x475   :  { %6866 = vpow2.f32 %v4334_v18 }
 0x476   :  { %6868 = vpow2.f32 %v4335_v39 }
 0x47d   :  { %v6863_v52 = vpop.eup %6862 }
 0x47e   :  { %v6865_v61 = vpop.eup %6864  ;;  %v2082_v0 = vmul.f32 %v6863_v52, %v6855_v1  ;;  %v9867_v52 = vld [vmem:[#allocation144_spill] sm:$0xff] }
 0x47f   :  { %v6867_v37 = vpop.eup %6866  ;;  %v2083_v4 = vmul.f32 %v6865_v61, %v6859_v41  ;;  %v9865_v41 = vld [vmem:[#allocation143_spill] sm:$0xff]  ;;  %v9868_v61 = vld [vmem:[#allocation121_spill] sm:$0xff] }
 0x480   :  { %v6869_v34 = vpop.eup %6868  ;;  %v8352_v58 = vadd.f32 %v2082_v0, %v2080_v16  ;;  %v2074_v42 = vadd.f32 1.0, %v6867_v37  ;;  %v9863_v0 = vld [vmem:[#allocation115_spill] sm:$0xff]  ;;  %v9869_v16 = vld [vmem:[#allocation145_spill] sm:$0xff] }
 0x481   :  { %v8354_v9 = vadd.f32 %v2083_v4, %v2081_v47  ;;  %v2075_v55 = vadd.f32 1.0, %v6869_v34  ;;  %v9864_v4 = vld [vmem:[#allocation117_spill] sm:$0xff]  ;;  %v9870_v37 = vld [vmem:[#allocation123_spill] sm:$0xff]  ;;  %v9871_v47 = vld [vmem:[#allocation146_spill] sm:$0xff] }
 0x482   :  { %6870 = vtanh.f32 %v8352_v58  ;;  %v9872_v34 = vld [vmem:[#allocation125_spill] sm:$0xff] }
 0x483   :  { %6872 = vrcp.f32 %v2074_v42  ;;  %v9873_v42 = vld [vmem:[#allocation147_spill] sm:$0xff] }
 0x484   :  { %6874 = vtanh.f32 %v8354_v9 }
 0x485   :  { %6876 = vrcp.f32 %v2075_v55  ;;  %v9874_v55 = vld [vmem:[#allocation127_spill] sm:$0xff] }
 0x48c   :  { %v6871_v18 = vpop.eup %6870 }
 0x48d   :  { %v6873_v2 = vpop.eup %6872 }
 0x48e   :  { %v6875_v39 = vpop.eup %6874  ;;  %v8360_v60 = vmul.f32 %v6873_v2, %v6871_v18  ;;  %v9875_v18 = vld [vmem:[#allocation148_spill] sm:$0xff]  ;;  %v9876_v2 = vld [vmem:[#allocation129_spill] sm:$0xff] }
 0x48f   :  { %v6877_v1 = vpop.eup %6876 }
 0x490   :  { %v8358_v10 = vmul.f32 %v6877_v1, %v6875_v39  ;;  %9862 = vst [vmem:[#allocation82_spill] sm:$0xff] %v8360_v60  ;;  %v9877_v39 = vld [vmem:[#allocation149_spill] sm:$0xff]  ;;  %v9878_v1 = vld [vmem:[#allocation131_spill] sm:$0xff] }
 0x492   :  { %9861 = vst [vmem:[#allocation80_spill] sm:$0xff] %v8358_v10  ;;  %2166 = vmatprep.mubr.f32.mxu0 %v8358_v10  ;;  %2237 = vmatprep.mubr.f32.mxu1 %v8358_v10 }
 0x493   :  { %2167 = vmatmul.mubr.f32.vlgmr.msra.gmra.mrb[6].mxu0 %v8360_v60  ;;  %2238 = vmatmul.mubr.f32.vlgmr.msra.gmra.mrb[14].mxu1 %v8360_v60 }
 0x494   :  { %5385 = vmatpush1.bf16.msra.mxu0 %v9674_v54  ;;  %5449 = vmatpush1.bf16.msra.mxu1 %v9675_v38 }
 0x495   :  { %2308 = vmatprep.mubr.f32.mxu0 %v8358_v10  ;;  %2379 = vmatprep.mubr.f32.mxu1 %v8358_v10  ;;  %v9879_v10 = vld [vmem:[#allocation150_spill] sm:$0xff] }
 0x496   :  { %5387 = vmatprep.subr.bf16.mxu0 %v9676_v3  ;;  %5451 = vmatprep.subr.bf16.mxu1 %v7777_v53 }
 0x498   :  { %5389 = vmatpush1.bf16.msra.mxu0 %v9677_v50  ;;  %5453 = vmatpush1.bf16.msra.mxu1 %v9678_v44 }
 0x499   :  { %5391 = vmatprep.subr.bf16.mxu0 %v9679_v25  ;;  %5455 = vmatprep.subr.bf16.mxu1 %v9680_v36 }
 0x49c   :  { %5393 = vmatpush1.bf16.msra.mxu0 %v9681_v8  ;;  %5457 = vmatpush1.bf16.msra.mxu1 %v9769_v45 }
 0x49d   :  { %5395 = vmatprep.subr.bf16.mxu0 %v9770_v17  ;;  %5459 = vmatprep.subr.bf16.mxu1 %v9771_v46 }
 0x4a0   :  { %5397 = vmatpush1.bf16.msra.mxu0 %v9685_v15  ;;  %5461 = vmatpush1.bf16.msra.mxu1 %v9772_v21 }
 0x4a1   :  { %5399 = vmatprep.subr.bf16.mxu0 %v9687_v26  ;;  %5463 = vmatprep.subr.bf16.mxu1 %v9773_v28 }
 0x4a4   :  { %5401 = vmatpush1.bf16.msra.mxu0 %v9689_v57  ;;  %5465 = vmatpush1.bf16.msra.mxu1 %v9774_v43 }
 0x4a5   :  { %5403 = vmatprep.subr.bf16.mxu0 %v9691_v11  ;;  %5467 = vmatprep.subr.bf16.mxu1 %v9775_v29 }
 0x4a8   :  { %5405 = vmatpush1.bf16.msra.mxu0 %v9692_v62  ;;  %5469 = vmatpush1.bf16.msra.mxu1 %v9776_v49 }
 0x4a9   :  { %5407 = vmatprep.subr.bf16.mxu0 %v9694_v63  ;;  %5471 = vmatprep.subr.bf16.mxu1 %v9777_v14 }
 0x4ac   :  { %5409 = vmatpush1.bf16.msra.mxu0 %v9695_v24  ;;  %5473 = vmatpush1.bf16.msra.mxu1 %v9778_v6 }
 0x4ad   :  { %5411 = vmatprep.subr.bf16.mxu0 %v9696_v31  ;;  %5475 = vmatprep.subr.bf16.mxu1 %v9779_v56 }
 0x4b0   :  { %5413 = vmatpush1.bf16.msra.mxu0 %v9697_v32  ;;  %5477 = vmatpush1.bf16.msra.mxu1 %v9780_v51 }
 0x4b1   :  { %5415 = vmatprep.subr.bf16.mxu0 %v9698_v48  ;;  %5479 = vmatprep.subr.bf16.mxu1 %v9781_v22 }
 0x4b4   :  { %5417 = vmatpush1.bf16.msra.mxu0 %v9699_v27  ;;  %5481 = vmatpush1.bf16.msra.mxu1 %v9782_v7 }
 0x4b5   :  { %5419 = vmatprep.subr.bf16.mxu0 %v9700_v40  ;;  %5483 = vmatprep.subr.bf16.mxu1 %v9783_v12 }
 0x4b8   :  { %5421 = vmatpush1.bf16.msra.mxu0 %v9701_v13  ;;  %5485 = vmatpush1.bf16.msra.mxu1 %v9784_v30 }
 0x4b9   :  { %5423 = vmatprep.subr.bf16.mxu0 %v9863_v0  ;;  %5487 = vmatprep.subr.bf16.mxu1 %v9785_v33 }
 0x4bc   :  { %5425 = vmatpush1.bf16.msra.mxu0 %v9864_v4  ;;  %5489 = vmatpush1.bf16.msra.mxu1 %v9865_v41 }
 0x4bd   :  { %5427 = vmatprep.subr.bf16.mxu0 %v9866_v5  ;;  %5491 = vmatprep.subr.bf16.mxu1 %v9867_v52 }
 0x4c0   :  { %5429 = vmatpush1.bf16.msra.mxu0 %v9868_v61  ;;  %5493 = vmatpush1.bf16.msra.mxu1 %v9869_v16  ;;  %v9880_v16 = vld [vmem:[#allocation133_spill] sm:$0xff]  ;;  %v9952_v61 = vld [vmem:[#allocation163_spill] sm:$0xff] }
 0x4c1   :  { %5431 = vmatprep.subr.bf16.mxu0 %v9870_v37  ;;  %5495 = vmatprep.subr.bf16.mxu1 %v9871_v47  ;;  %v9881_v37 = vld [vmem:[#allocation151_spill] sm:$0xff] }
 0x4c2   :  { %v9882_v47 = vld [vmem:[#allocation135_spill] sm:$0xff] }
 0x4c4   :  { %5433 = vmatpush1.bf16.msra.mxu0 %v9872_v34  ;;  %5497 = vmatpush1.bf16.msra.mxu1 %v9873_v42  ;;  %v9883_v34 = vld [vmem:[#allocation152_spill] sm:$0xff]  ;;  %v9884_v42 = vld [vmem:[#allocation137_spill] sm:$0xff] }
 0x4c5   :  { %5435 = vmatprep.subr.bf16.mxu0 %v9874_v55  ;;  %5499 = vmatprep.subr.bf16.mxu1 %v9875_v18  ;;  %v9885_v55 = vld [vmem:[#allocation153_spill] sm:$0xff]  ;;  %v9886_v18 = vld [vmem:[#allocation27_spill] sm:$0xff] }
 0x4c8   :  { %5437 = vmatpush1.bf16.msra.mxu0 %v9876_v2  ;;  %5501 = vmatpush1.bf16.msra.mxu1 %v9877_v39  ;;  %v9887_v2 = vld [vmem:[#allocation36_spill] sm:$0xff] }
 0x4c9   :  { %5439 = vmatprep.subr.bf16.mxu0 %v9878_v1  ;;  %5503 = vmatprep.subr.bf16.mxu1 %v9879_v10  ;;  %v9888_v10 = vld [vmem:[#allocation28_spill] sm:$0xff]  ;;  %v9897_v1 = vld [vmem:[#allocation53_spill] sm:$0xff] }
 0x4cc   :  { %5441 = vmatpush1.bf16.msra.mxu0 %v9880_v16  ;;  %5505 = vmatpush1.bf16.msra.mxu1 %v9881_v37  ;;  %v9889_v16 = vld [vmem:[#allocation45_spill] sm:$0xff] }
 0x4cd   :  { %5443 = vmatprep.subr.bf16.mxu0 %v9882_v47  ;;  %5507 = vmatprep.subr.bf16.mxu1 %v9883_v34  ;;  %v9890_v37 = vld [vmem:[#allocation29_spill] sm:$0xff]  ;;  %v9891_v47 = vld [vmem:[#allocation47_spill] sm:$0xff]  ;;  %v9892_v34 = vld [vmem:[#allocation30_spill] sm:$0xff] }
 0x4d0   :  { %5445 = vmatpush1.bf16.msra.mxu0 %v9884_v42  ;;  %5509 = vmatpush1.bf16.msra.mxu1 %v9885_v55  ;;  %v9893_v42 = vld [vmem:[#allocation49_spill] sm:$0xff]  ;;  %v9894_v55 = vld [vmem:[#allocation31_spill] sm:$0xff] }
 0x4d1   :  { %5511 = vmatprep.subr.bf16.mxu0 %v9886_v18  ;;  %5575 = vmatprep.subr.bf16.mxu1 %v9887_v2  ;;  %v9895_v18 = vld [vmem:[#allocation51_spill] sm:$0xff]  ;;  %v9896_v2 = vld [vmem:[#allocation32_spill] sm:$0xff] }
 0x4d3   :  { %2309 = vmatmul.mubr.f32.vlgmr.msra.gmra.mrb[14].mxu0 %v8360_v60  ;;  %2380 = vmatmul.mubr.f32.vlgmr.msra.gmra.mrb[30].mxu1 %v8360_v60  ;;  %v9898_v60 = vld [vmem:[#allocation33_spill] sm:$0xff] }
 0x4d4   :  { %5513 = vmatpush1.bf16.msra.mxu0 %v9888_v10  ;;  %5577 = vmatpush1.bf16.msra.mxu1 %v9889_v16  ;;  %v9899_v10 = vld [vmem:[#allocation55_spill] sm:$0xff]  ;;  %v9900_v16 = vld [vmem:[#allocation34_spill] sm:$0xff] }
 0x4d5   :  { %5515 = vmatprep.subr.bf16.mxu0 %v9890_v37  ;;  %5579 = vmatprep.subr.bf16.mxu1 %v9891_v47  ;;  %v9901_v37 = vld [vmem:[#allocation57_spill] sm:$0xff]  ;;  %v9902_v47 = vld [vmem:[#allocation35_spill] sm:$0xff] }
 0x4d8   :  { %5517 = vmatpush1.bf16.msra.mxu0 %v9892_v34  ;;  %5581 = vmatpush1.bf16.msra.mxu1 %v9893_v42  ;;  %v9903_v34 = vld [vmem:[#allocation59_spill] sm:$0xff]  ;;  %v9904_v42 = vld [vmem:[#allocation37_spill] sm:$0xff] }
 0x4d9   :  { %5519 = vmatprep.subr.bf16.mxu0 %v9894_v55  ;;  %5583 = vmatprep.subr.bf16.mxu1 %v9895_v18  ;;  %v9905_v55 = vld [vmem:[#allocation61_spill] sm:$0xff]  ;;  %v9906_v18 = vld [vmem:[#allocation38_spill] sm:$0xff] }
 0x4dc   :  { %5521 = vmatpush1.bf16.msra.mxu0 %v9896_v2  ;;  %5585 = vmatpush1.bf16.msra.mxu1 %v9897_v1  ;;  %v9907_v2 = vld [vmem:[#allocation63_spill] sm:$0xff] }
 0x4dd   :  { %5523 = vmatprep.subr.bf16.mxu0 %v9898_v60  ;;  %5587 = vmatprep.subr.bf16.mxu1 %v9899_v10  ;;  %v9908_v1 = vld [vmem:[#allocation39_spill] sm:$0xff]  ;;  %v9909_v60 = vld [vmem:[#allocation65_spill] sm:$0xff]  ;;  %v9910_v10 = vld [vmem:[#allocation40_spill] sm:$0xff] }
 0x4e0   :  { %5525 = vmatpush1.bf16.msra.mxu0 %v9900_v16  ;;  %5589 = vmatpush1.bf16.msra.mxu1 %v9901_v37  ;;  %v9911_v16 = vld [vmem:[#allocation67_spill] sm:$0xff]  ;;  %v9912_v37 = vld [vmem:[#allocation41_spill] sm:$0xff] }
 0x4e1   :  { %5527 = vmatprep.subr.bf16.mxu0 %v9902_v47  ;;  %5591 = vmatprep.subr.bf16.mxu1 %v9903_v34  ;;  %v9913_v47 = vld [vmem:[#allocation69_spill] sm:$0xff]  ;;  %v9914_v34 = vld [vmem:[#allocation42_spill] sm:$0xff] }
 0x4e4   :  { %5529 = vmatpush1.bf16.msra.mxu0 %v9904_v42  ;;  %5593 = vmatpush1.bf16.msra.mxu1 %v9905_v55  ;;  %v9915_v42 = vld [vmem:[#allocation71_spill] sm:$0xff] }
 0x4e5   :  { %5531 = vmatprep.subr.bf16.mxu0 %v9906_v18  ;;  %5595 = vmatprep.subr.bf16.mxu1 %v9907_v2  ;;  %v9916_v55 = vld [vmem:[#allocation43_spill] sm:$0xff]  ;;  %v9917_v18 = vld [vmem:[#allocation73_spill] sm:$0xff]  ;;  %v9918_v2 = vld [vmem:[#allocation44_spill] sm:$0xff] }
 0x4e8   :  { %5533 = vmatpush1.bf16.msra.mxu0 %v9908_v1  ;;  %5597 = vmatpush1.bf16.msra.mxu1 %v9909_v60  ;;  %v9919_v1 = vld [vmem:[#allocation75_spill] sm:$0xff]  ;;  %v9920_v60 = vld [vmem:[#allocation46_spill] sm:$0xff] }
 0x4e9   :  { %5535 = vmatprep.subr.bf16.mxu0 %v9910_v10  ;;  %5599 = vmatprep.subr.bf16.mxu1 %v9911_v16  ;;  %v9921_v10 = vld [vmem:[#allocation77_spill] sm:$0xff]  ;;  %v9922_v16 = vld [vmem:[#allocation48_spill] sm:$0xff] }
 0x4ec   :  { %5537 = vmatpush1.bf16.msra.mxu0 %v9912_v37  ;;  %5601 = vmatpush1.bf16.msra.mxu1 %v9913_v47  ;;  %v9923_v37 = vld [vmem:[#allocation79_spill] sm:$0xff]  ;;  %v9924_v47 = vld [vmem:[#allocation50_spill] sm:$0xff] }
 0x4ed   :  { %5539 = vmatprep.subr.bf16.mxu0 %v9914_v34  ;;  %5603 = vmatprep.subr.bf16.mxu1 %v9915_v42  ;;  %v9925_v34 = vld [vmem:[#allocation81_spill] sm:$0xff]  ;;  %v9926_v42 = vld [vmem:[#allocation52_spill] sm:$0xff] }
 0x4f0   :  { %5541 = vmatpush1.bf16.msra.mxu0 %v9916_v55  ;;  %5605 = vmatpush1.bf16.msra.mxu1 %v9917_v18  ;;  %v9927_v55 = vld [vmem:[#allocation83_spill] sm:$0xff]  ;;  %v9928_v18 = vld [vmem:[#allocation54_spill] sm:$0xff] }
 0x4f1   :  { %5543 = vmatprep.subr.bf16.mxu0 %v9918_v2  ;;  %5607 = vmatprep.subr.bf16.mxu1 %v9919_v1  ;;  %v9929_v2 = vld [vmem:[#allocation85_spill] sm:$0xff]  ;;  %v9930_v1 = vld [vmem:[#allocation56_spill] sm:$0xff] }
 0x4f4   :  { %5545 = vmatpush1.bf16.msra.mxu0 %v9920_v60  ;;  %5609 = vmatpush1.bf16.msra.mxu1 %v9921_v10  ;;  %v9931_v60 = vld [vmem:[#allocation87_spill] sm:$0xff]  ;;  %v9932_v10 = vld [vmem:[#allocation58_spill] sm:$0xff] }
 0x4f5   :  { %5547 = vmatprep.subr.bf16.mxu0 %v9922_v16  ;;  %5611 = vmatprep.subr.bf16.mxu1 %v9923_v37  ;;  %v9933_v16 = vld [vmem:[#allocation89_spill] sm:$0xff]  ;;  %v9934_v37 = vld [vmem:[#allocation60_spill] sm:$0xff] }
 0x4f8   :  { %5549 = vmatpush1.bf16.msra.mxu0 %v9924_v47  ;;  %5613 = vmatpush1.bf16.msra.mxu1 %v9925_v34  ;;  %v9935_v47 = vld [vmem:[#allocation91_spill] sm:$0xff]  ;;  %v9936_v34 = vld [vmem:[#allocation62_spill] sm:$0xff] }
 0x4f9   :  { %5551 = vmatprep.subr.bf16.mxu0 %v9926_v42  ;;  %5615 = vmatprep.subr.bf16.mxu1 %v9927_v55  ;;  %v9937_v42 = vld [vmem:[#allocation93_spill] sm:$0xff]  ;;  %v9938_v55 = vld [vmem:[#allocation64_spill] sm:$0xff] }
 0x4fc   :  { %5553 = vmatpush1.bf16.msra.mxu0 %v9928_v18  ;;  %5617 = vmatpush1.bf16.msra.mxu1 %v9929_v2  ;;  %v9939_v18 = vld [vmem:[#allocation95_spill] sm:$0xff]  ;;  %v9940_v2 = vld [vmem:[#allocation66_spill] sm:$0xff] }
 0x4fd   :  { %5555 = vmatprep.subr.bf16.mxu0 %v9930_v1  ;;  %5619 = vmatprep.subr.bf16.mxu1 %v9931_v60  ;;  %v9941_v1 = vld [vmem:[#allocation97_spill] sm:$0xff]  ;;  %v9942_v60 = vld [vmem:[#allocation68_spill] sm:$0xff] }
 0x500   :  { %5557 = vmatpush1.bf16.msra.mxu0 %v9932_v10  ;;  %5621 = vmatpush1.bf16.msra.mxu1 %v9933_v16  ;;  %v9943_v10 = vld [vmem:[#allocation99_spill] sm:$0xff]  ;;  %v9944_v16 = vld [vmem:[#allocation70_spill] sm:$0xff] }
 0x501   :  { %5559 = vmatprep.subr.bf16.mxu0 %v9934_v37  ;;  %5623 = vmatprep.subr.bf16.mxu1 %v9935_v47  ;;  %v9945_v37 = vld [vmem:[#allocation101_spill] sm:$0xff]  ;;  %v9946_v47 = vld [vmem:[#allocation72_spill] sm:$0xff] }
 0x504   :  { %5561 = vmatpush1.bf16.msra.mxu0 %v9936_v34  ;;  %5625 = vmatpush1.bf16.msra.mxu1 %v9937_v42  ;;  %v9947_v34 = vld [vmem:[#allocation103_spill] sm:$0xff]  ;;  %v9948_v42 = vld [vmem:[#allocation74_spill] sm:$0xff] }
 0x505   :  { %5563 = vmatprep.subr.bf16.mxu0 %v9938_v55  ;;  %5627 = vmatprep.subr.bf16.mxu1 %v9939_v18  ;;  %v9949_v55 = vld [vmem:[#allocation105_spill] sm:$0xff]  ;;  %v9950_v18 = vld [vmem:[#allocation76_spill] sm:$0xff] }
 0x508   :  { %5565 = vmatpush1.bf16.msra.mxu0 %v9940_v2  ;;  %5629 = vmatpush1.bf16.msra.mxu1 %v9941_v1  ;;  %v9951_v2 = vld [vmem:[#allocation107_spill] sm:$0xff] }
 0x509   :  { %5567 = vmatprep.subr.bf16.mxu0 %v9942_v60  ;;  %5631 = vmatprep.subr.bf16.mxu1 %v9943_v10 }
 0x50c   :  { %5569 = vmatpush1.bf16.msra.mxu0 %v9944_v16  ;;  %5633 = vmatpush1.bf16.msra.mxu1 %v9945_v37 }
 0x50d   :  { %5571 = vmatprep.subr.bf16.mxu0 %v9946_v47  ;;  %5635 = vmatprep.subr.bf16.mxu1 %v9947_v34 }
 0x510   :  { %5573 = vmatpush1.bf16.msra.mxu0 %v9948_v42  ;;  %5637 = vmatpush1.bf16.msra.mxu1 %v9949_v55 }
 0x511   :  { %5639 = vmatprep.subr.bf16.mxu0 %v9950_v18  ;;  %5703 = vmatprep.subr.bf16.mxu1 %v9951_v2 }
 0x566   :  { %v2168_v1 = vpop.f32.mrb[6].mxu0  ;;  %v2239_v60 = vpop.f32.mrb[14].mxu1 }
 0x567   :  { %v2170_v39 = vpop.f32.mrb[7].mxu0  ;;  %v2241_v10 = vpop.f32.mrb[15].mxu1  ;;  %v6644_v16 = vadd.f32 %v2168_v1, %v9952_v61  ;;  %v6668_v37 = vadd.f32 %v2239_v60, %v9762_v35 }
 0x568   :  { %v6645_v47 = vadd.f32 %v2170_v39, %v9763_v20  ;;  %v6669_v34 = vadd.f32 %v2241_v10, %v9764_v23 }
 0x569   :  { %v4336_v52 = vmul.f32 -1.442695, %v6644_v16  ;;  %v4338_v42 = vmul.f32 -1.442695, %v6668_v37  ;;  %v9953_v37 = vld [vmem:[#allocation169_spill] sm:$0xff] }
 0x56a   :  { %v4337_v5 = vmul.f32 -1.442695, %v6645_v47  ;;  %v4339_v55 = vmul.f32 -1.442695, %v6669_v34  ;;  %v9954_v34 = vld [vmem:[#allocation168_spill] sm:$0xff] }
 0x56b   :  { %6878 = vpow2.f32 %v4336_v52 }
 0x56c   :  { %6880 = vpow2.f32 %v4338_v42 }
 0x56d   :  { %6882 = vpow2.f32 %v4337_v5 }
 0x56e   :  { %6884 = vpow2.f32 %v4339_v55 }
 0x575   :  { %v6879_v2 = vpop.eup %6878 }
 0x576   :  { %v6881_v18 = vpop.eup %6880  ;;  %v2400_v33 = vadd.f32 1.0, %v6879_v2 }
 0x577   :  { %v6883_v41 = vpop.eup %6882  ;;  %v2412_v1 = vadd.f32 1.0, %v6881_v18 }
 0x578   :  { %v6885_v4 = vpop.eup %6884  ;;  %v2401_v61 = vadd.f32 1.0, %v6883_v41  ;;  %6886 = vrcp.f32 %v2400_v33 }
 0x579   :  { %v2413_v60 = vadd.f32 1.0, %v6885_v4  ;;  %6888 = vrcp.f32 %v2412_v1 }
 0x57a   :  { %6890 = vrcp.f32 %v2401_v61 }
 0x57b   :  { %6892 = vrcp.f32 %v2413_v60 }
 0x582   :  { %v6887_v33 = vpop.eup %6886 }
 0x583   :  { %v6889_v41 = vpop.eup %6888 }
 0x584   :  { %v6891_v61 = vpop.eup %6890 }
 0x585   :  { %v6893_v2 = vpop.eup %6892 }
 0x5a6   :  { %v2310_v39 = vpop.f32.mrb[14].mxu0  ;;  %v2381_v10 = vpop.f32.mrb[30].mxu1 }
 0x5a7   :  { %v6684_v16 = vadd.f32 %v2310_v39, %v9765_v59  ;;  %v6700_v52 = vadd.f32 %v2381_v10, %v9953_v37  ;;  %v2312_v47 = vpop.f32.mrb[15].mxu0  ;;  %v2383_v5 = vpop.f32.mrb[31].mxu1  ;;  %v2432_v10 = vmul.f32 %v6889_v41, %v8352_v58 }
 0x5a8   :  { %v6685_v42 = vadd.f32 %v2312_v47, %v9954_v34  ;;  %v6701_v55 = vadd.f32 %v2383_v5, %v8040_v19  ;;  %v2433_v47 = vmul.f32 %v6893_v2, %v8354_v9  ;;  %v9960_v2 = vld [vmem:[#allocation119_spill] sm:$0xff] }
 0x5a9   :  { %6894 = vtanh.f32 %v6684_v16  ;;  %v4340_v18 = vmul.f32 -1.442695, %v6700_v52 }
 0x5aa   :  { %6896 = vtanh.f32 %v6685_v42  ;;  %v4341_v4 = vmul.f32 -1.442695, %v6701_v55 }
 0x5ab   :  { %6898 = vpow2.f32 %v4340_v18 }
 0x5ac   :  { %6900 = vpow2.f32 %v4341_v4 }
 0x5b3   :  { %v6895_v1 = vpop.eup %6894 }
 0x5b4   :  { %v6897_v39 = vpop.eup %6896  ;;  %v2434_v37 = vmul.f32 %v6895_v1, %v6887_v33  ;;  %v9961_v1 = vld [vmem:[#allocation144_spill] sm:$0xff] }
 0x5b5   :  { %v6899_v60 = vpop.eup %6898  ;;  %v2435_v34 = vmul.f32 %v6897_v39, %v6891_v61  ;;  %v9959_v61 = vld [vmem:[#allocation143_spill] sm:$0xff]  ;;  %v9962_v39 = vld [vmem:[#allocation121_spill] sm:$0xff] }
 0x5b6   :  { %v6901_v5 = vpop.eup %6900  ;;  %v8508_v16 = vadd.f32 %v2434_v37, %v2432_v10  ;;  %v2426_v52 = vadd.f32 1.0, %v6899_v60  ;;  %v9957_v37 = vld [vmem:[#allocation142_spill] sm:$0xff]  ;;  %v9963_v10 = vld [vmem:[#allocation145_spill] sm:$0xff]  ;;  %v9964_v60 = vld [vmem:[#allocation123_spill] sm:$0xff] }
 0x5b7   :  { %v8510_v42 = vadd.f32 %v2435_v34, %v2433_v47  ;;  %v2427_v55 = vadd.f32 1.0, %v6901_v5  ;;  %v9958_v34 = vld [vmem:[#allocation117_spill] sm:$0xff]  ;;  %v9965_v47 = vld [vmem:[#allocation146_spill] sm:$0xff] }
 0x5b8   :  { %6902 = vtanh.f32 %v8508_v16  ;;  %v9966_v5 = vld [vmem:[#allocation125_spill] sm:$0xff] }
 0x5b9   :  { %6904 = vrcp.f32 %v2426_v52  ;;  %v9967_v52 = vld [vmem:[#allocation147_spill] sm:$0xff] }
 0x5ba   :  { %6906 = vtanh.f32 %v8510_v42 }
 0x5bb   :  { %6908 = vrcp.f32 %v2427_v55  ;;  %v9968_v55 = vld [vmem:[#allocation127_spill] sm:$0xff] }
 0x5c2   :  { %v6903_v18 = vpop.eup %6902 }
 0x5c3   :  { %v6905_v58 = vpop.eup %6904 }
 0x5c4   :  { %v6907_v4 = vpop.eup %6906  ;;  %v8516_v9 = vmul.f32 %v6905_v58, %v6903_v18  ;;  %v9969_v18 = vld [vmem:[#allocation148_spill] sm:$0xff]  ;;  %v9970_v58 = vld [vmem:[#allocation129_spill] sm:$0xff] }
 0x5c5   :  { %v6909_v33 = vpop.eup %6908 }
 0x5c6   :  { %v8514_v41 = vmul.f32 %v6909_v33, %v6907_v4  ;;  %9956 = vst [vmem:[#allocation84_spill] sm:$0xff] %v8516_v9  ;;  %v9971_v4 = vld [vmem:[#allocation149_spill] sm:$0xff]  ;;  %v9972_v33 = vld [vmem:[#allocation131_spill] sm:$0xff] }
 0x5c8   :  { %9955 = vst [vmem:[#allocation112_spill] sm:$0xff] %v8514_v41  ;;  %2518 = vmatprep.mubr.f32.mxu0 %v8514_v41  ;;  %2589 = vmatprep.mubr.f32.mxu1 %v8514_v41 }
 0x5c9   :  { %2519 = vmatmul.mubr.f32.vlgmr.msra.gmra.mrb[24].mxu0 %v8516_v9  ;;  %2590 = vmatmul.mubr.f32.vlgmr.msra.gmra.mrb[16].mxu1 %v8516_v9 }
 0x5ca   :  { %5641 = vmatpush1.bf16.msra.mxu0 %v9674_v54  ;;  %5705 = vmatpush1.bf16.msra.mxu1 %v9675_v38 }
 0x5cb   :  { %2660 = vmatprep.mubr.f32.mxu0 %v8514_v41  ;;  %2731 = vmatprep.mubr.f32.mxu1 %v8514_v41  ;;  %v9973_v41 = vld [vmem:[#allocation150_spill] sm:$0xff] }
 0x5cc   :  { %5643 = vmatprep.subr.bf16.mxu0 %v9676_v3  ;;  %5707 = vmatprep.subr.bf16.mxu1 %v7777_v53 }
 0x5ce   :  { %5645 = vmatpush1.bf16.msra.mxu0 %v9677_v50  ;;  %5709 = vmatpush1.bf16.msra.mxu1 %v9678_v44 }
 0x5cf   :  { %5647 = vmatprep.subr.bf16.mxu0 %v9679_v25  ;;  %5711 = vmatprep.subr.bf16.mxu1 %v9680_v36 }
 0x5d2   :  { %5649 = vmatpush1.bf16.msra.mxu0 %v9681_v8  ;;  %5713 = vmatpush1.bf16.msra.mxu1 %v9769_v45 }
 0x5d3   :  { %5651 = vmatprep.subr.bf16.mxu0 %v9770_v17  ;;  %5715 = vmatprep.subr.bf16.mxu1 %v9771_v46 }
 0x5d6   :  { %5653 = vmatpush1.bf16.msra.mxu0 %v9685_v15  ;;  %5717 = vmatpush1.bf16.msra.mxu1 %v9772_v21 }
 0x5d7   :  { %5655 = vmatprep.subr.bf16.mxu0 %v9687_v26  ;;  %5719 = vmatprep.subr.bf16.mxu1 %v9773_v28 }
 0x5da   :  { %5657 = vmatpush1.bf16.msra.mxu0 %v9689_v57  ;;  %5721 = vmatpush1.bf16.msra.mxu1 %v9774_v43 }
 0x5db   :  { %5659 = vmatprep.subr.bf16.mxu0 %v9691_v11  ;;  %5723 = vmatprep.subr.bf16.mxu1 %v9775_v29 }
 0x5de   :  { %5661 = vmatpush1.bf16.msra.mxu0 %v9692_v62  ;;  %5725 = vmatpush1.bf16.msra.mxu1 %v9776_v49 }
 0x5df   :  { %5663 = vmatprep.subr.bf16.mxu0 %v9694_v63  ;;  %5727 = vmatprep.subr.bf16.mxu1 %v9777_v14 }
 0x5e2   :  { %5665 = vmatpush1.bf16.msra.mxu0 %v9695_v24  ;;  %5729 = vmatpush1.bf16.msra.mxu1 %v9778_v6 }
 0x5e3   :  { %5667 = vmatprep.subr.bf16.mxu0 %v9696_v31  ;;  %5731 = vmatprep.subr.bf16.mxu1 %v9779_v56 }
 0x5e6   :  { %5669 = vmatpush1.bf16.msra.mxu0 %v9697_v32  ;;  %5733 = vmatpush1.bf16.msra.mxu1 %v9780_v51 }
 0x5e7   :  { %5671 = vmatprep.subr.bf16.mxu0 %v9698_v48  ;;  %5735 = vmatprep.subr.bf16.mxu1 %v9781_v22 }
 0x5ea   :  { %5673 = vmatpush1.bf16.msra.mxu0 %v9699_v27  ;;  %5737 = vmatpush1.bf16.msra.mxu1 %v9782_v7 }
 0x5eb   :  { %5675 = vmatprep.subr.bf16.mxu0 %v9700_v40  ;;  %5739 = vmatprep.subr.bf16.mxu1 %v9783_v12 }
 0x5ee   :  { %5677 = vmatpush1.bf16.msra.mxu0 %v9701_v13  ;;  %5741 = vmatpush1.bf16.msra.mxu1 %v9784_v30 }
 0x5ef   :  { %5679 = vmatprep.subr.bf16.mxu0 %v9863_v0  ;;  %5743 = vmatprep.subr.bf16.mxu1 %v9957_v37 }
 0x5f2   :  { %5681 = vmatpush1.bf16.msra.mxu0 %v9958_v34  ;;  %5745 = vmatpush1.bf16.msra.mxu1 %v9959_v61 }
 0x5f3   :  { %5683 = vmatprep.subr.bf16.mxu0 %v9960_v2  ;;  %5747 = vmatprep.subr.bf16.mxu1 %v9961_v1 }
 0x5f6   :  { %5685 = vmatpush1.bf16.msra.mxu0 %v9962_v39  ;;  %5749 = vmatpush1.bf16.msra.mxu1 %v9963_v10  ;;  %v9974_v10 = vld [vmem:[#allocation133_spill] sm:$0xff] }
 0x5f7   :  { %5687 = vmatprep.subr.bf16.mxu0 %v9964_v60  ;;  %5751 = vmatprep.subr.bf16.mxu1 %v9965_v47  ;;  %v9975_v60 = vld [vmem:[#allocation151_spill] sm:$0xff] }
 0x5f8   :  { %v9976_v47 = vld [vmem:[#allocation135_spill] sm:$0xff] }
 0x5fa   :  { %5689 = vmatpush1.bf16.msra.mxu0 %v9966_v5  ;;  %5753 = vmatpush1.bf16.msra.mxu1 %v9967_v52  ;;  %v9977_v5 = vld [vmem:[#allocation152_spill] sm:$0xff]  ;;  %v9978_v52 = vld [vmem:[#allocation137_spill] sm:$0xff] }
 0x5fb   :  { %5691 = vmatprep.subr.bf16.mxu0 %v9968_v55  ;;  %5755 = vmatprep.subr.bf16.mxu1 %v9969_v18  ;;  %v9979_v55 = vld [vmem:[#allocation153_spill] sm:$0xff]  ;;  %v9980_v18 = vld [vmem:[#allocation27_spill] sm:$0xff] }
 0x5fe   :  { %5693 = vmatpush1.bf16.msra.mxu0 %v9970_v58  ;;  %5757 = vmatpush1.bf16.msra.mxu1 %v9971_v4  ;;  %v9981_v58 = vld [vmem:[#allocation36_spill] sm:$0xff] }
 0x5ff   :  { %5695 = vmatprep.subr.bf16.mxu0 %v9972_v33  ;;  %5759 = vmatprep.subr.bf16.mxu1 %v9973_v41  ;;  %v9982_v41 = vld [vmem:[#allocation28_spill] sm:$0xff]  ;;  %v9991_v33 = vld [vmem:[#allocation53_spill] sm:$0xff] }
 0x602   :  { %5697 = vmatpush1.bf16.msra.mxu0 %v9974_v10  ;;  %5761 = vmatpush1.bf16.msra.mxu1 %v9975_v60  ;;  %v9983_v10 = vld [vmem:[#allocation45_spill] sm:$0xff] }
 0x603   :  { %5699 = vmatprep.subr.bf16.mxu0 %v9976_v47  ;;  %5763 = vmatprep.subr.bf16.mxu1 %v9977_v5  ;;  %v9984_v60 = vld [vmem:[#allocation29_spill] sm:$0xff]  ;;  %v9985_v47 = vld [vmem:[#allocation47_spill] sm:$0xff]  ;;  %v9986_v5 = vld [vmem:[#allocation30_spill] sm:$0xff] }
 0x606   :  { %5701 = vmatpush1.bf16.msra.mxu0 %v9978_v52  ;;  %5765 = vmatpush1.bf16.msra.mxu1 %v9979_v55  ;;  %v9987_v52 = vld [vmem:[#allocation49_spill] sm:$0xff]  ;;  %v9988_v55 = vld [vmem:[#allocation31_spill] sm:$0xff] }
 0x607   :  { %5767 = vmatprep.subr.bf16.mxu0 %v9980_v18  ;;  %5831 = vmatprep.subr.bf16.mxu1 %v9981_v58  ;;  %v9989_v18 = vld [vmem:[#allocation51_spill] sm:$0xff]  ;;  %v9990_v58 = vld [vmem:[#allocation32_spill] sm:$0xff] }
 0x609   :  { %2661 = vmatmul.mubr.f32.vlgmr.msra.gmra.mrb[16].mxu0 %v8516_v9  ;;  %2732 = vmatmul.mubr.f32.vlgmr.msra.gmra.mrb[32].mxu1 %v8516_v9  ;;  %v9992_v9 = vld [vmem:[#allocation33_spill] sm:$0xff] }
 0x60a   :  { %5769 = vmatpush1.bf16.msra.mxu0 %v9982_v41  ;;  %5833 = vmatpush1.bf16.msra.mxu1 %v9983_v10  ;;  %v9993_v41 = vld [vmem:[#allocation55_spill] sm:$0xff]  ;;  %v9994_v10 = vld [vmem:[#allocation34_spill] sm:$0xff] }
 0x60b   :  { %5771 = vmatprep.subr.bf16.mxu0 %v9984_v60  ;;  %5835 = vmatprep.subr.bf16.mxu1 %v9985_v47  ;;  %v9995_v60 = vld [vmem:[#allocation57_spill] sm:$0xff]  ;;  %v9996_v47 = vld [vmem:[#allocation35_spill] sm:$0xff] }
 0x60e   :  { %5773 = vmatpush1.bf16.msra.mxu0 %v9986_v5  ;;  %5837 = vmatpush1.bf16.msra.mxu1 %v9987_v52  ;;  %v9997_v5 = vld [vmem:[#allocation59_spill] sm:$0xff]  ;;  %v9998_v52 = vld [vmem:[#allocation37_spill] sm:$0xff] }
 0x60f   :  { %5775 = vmatprep.subr.bf16.mxu0 %v9988_v55  ;;  %5839 = vmatprep.subr.bf16.mxu1 %v9989_v18  ;;  %v9999_v55 = vld [vmem:[#allocation61_spill] sm:$0xff]  ;;  %v10000_v18 = vld [vmem:[#allocation38_spill] sm:$0xff] }
 0x612   :  { %5777 = vmatpush1.bf16.msra.mxu0 %v9990_v58  ;;  %5841 = vmatpush1.bf16.msra.mxu1 %v9991_v33  ;;  %v10001_v58 = vld [vmem:[#allocation63_spill] sm:$0xff] }
 0x613   :  { %5779 = vmatprep.subr.bf16.mxu0 %v9992_v9  ;;  %5843 = vmatprep.subr.bf16.mxu1 %v9993_v41  ;;  %v10002_v33 = vld [vmem:[#allocation39_spill] sm:$0xff]  ;;  %v10003_v9 = vld [vmem:[#allocation65_spill] sm:$0xff]  ;;  %v10004_v41 = vld [vmem:[#allocation40_spill] sm:$0xff] }
 0x616   :  { %5781 = vmatpush1.bf16.msra.mxu0 %v9994_v10  ;;  %5845 = vmatpush1.bf16.msra.mxu1 %v9995_v60  ;;  %v10005_v10 = vld [vmem:[#allocation67_spill] sm:$0xff]  ;;  %v10006_v60 = vld [vmem:[#allocation41_spill] sm:$0xff] }
 0x617   :  { %5783 = vmatprep.subr.bf16.mxu0 %v9996_v47  ;;  %5847 = vmatprep.subr.bf16.mxu1 %v9997_v5  ;;  %v10007_v47 = vld [vmem:[#allocation69_spill] sm:$0xff]  ;;  %v10008_v5 = vld [vmem:[#allocation42_spill] sm:$0xff] }
 0x61a   :  { %5785 = vmatpush1.bf16.msra.mxu0 %v9998_v52  ;;  %5849 = vmatpush1.bf16.msra.mxu1 %v9999_v55  ;;  %v10009_v52 = vld [vmem:[#allocation71_spill] sm:$0xff] }
 0x61b   :  { %5787 = vmatprep.subr.bf16.mxu0 %v10000_v18  ;;  %5851 = vmatprep.subr.bf16.mxu1 %v10001_v58  ;;  %v10010_v55 = vld [vmem:[#allocation43_spill] sm:$0xff]  ;;  %v10011_v18 = vld [vmem:[#allocation73_spill] sm:$0xff]  ;;  %v10012_v58 = vld [vmem:[#allocation44_spill] sm:$0xff] }
 0x61e   :  { %5789 = vmatpush1.bf16.msra.mxu0 %v10002_v33  ;;  %5853 = vmatpush1.bf16.msra.mxu1 %v10003_v9  ;;  %v10013_v33 = vld [vmem:[#allocation75_spill] sm:$0xff]  ;;  %v10014_v9 = vld [vmem:[#allocation46_spill] sm:$0xff] }
 0x61f   :  { %5791 = vmatprep.subr.bf16.mxu0 %v10004_v41  ;;  %5855 = vmatprep.subr.bf16.mxu1 %v10005_v10  ;;  %v10015_v41 = vld [vmem:[#allocation77_spill] sm:$0xff]  ;;  %v10016_v10 = vld [vmem:[#allocation48_spill] sm:$0xff] }
 0x622   :  { %5793 = vmatpush1.bf16.msra.mxu0 %v10006_v60  ;;  %5857 = vmatpush1.bf16.msra.mxu1 %v10007_v47  ;;  %v10017_v60 = vld [vmem:[#allocation79_spill] sm:$0xff]  ;;  %v10018_v47 = vld [vmem:[#allocation50_spill] sm:$0xff] }
 0x623   :  { %5795 = vmatprep.subr.bf16.mxu0 %v10008_v5  ;;  %5859 = vmatprep.subr.bf16.mxu1 %v10009_v52  ;;  %v10019_v5 = vld [vmem:[#allocation81_spill] sm:$0xff]  ;;  %v10020_v52 = vld [vmem:[#allocation52_spill] sm:$0xff] }
 0x626   :  { %5797 = vmatpush1.bf16.msra.mxu0 %v10010_v55  ;;  %5861 = vmatpush1.bf16.msra.mxu1 %v10011_v18  ;;  %v10021_v55 = vld [vmem:[#allocation83_spill] sm:$0xff]  ;;  %v10022_v18 = vld [vmem:[#allocation54_spill] sm:$0xff] }
 0x627   :  { %5799 = vmatprep.subr.bf16.mxu0 %v10012_v58  ;;  %5863 = vmatprep.subr.bf16.mxu1 %v10013_v33  ;;  %v10023_v58 = vld [vmem:[#allocation85_spill] sm:$0xff]  ;;  %v10024_v33 = vld [vmem:[#allocation56_spill] sm:$0xff] }
 0x62a   :  { %5801 = vmatpush1.bf16.msra.mxu0 %v10014_v9  ;;  %5865 = vmatpush1.bf16.msra.mxu1 %v10015_v41  ;;  %v10025_v9 = vld [vmem:[#allocation87_spill] sm:$0xff]  ;;  %v10026_v41 = vld [vmem:[#allocation58_spill] sm:$0xff] }
 0x62b   :  { %5803 = vmatprep.subr.bf16.mxu0 %v10016_v10  ;;  %5867 = vmatprep.subr.bf16.mxu1 %v10017_v60  ;;  %v10027_v10 = vld [vmem:[#allocation89_spill] sm:$0xff]  ;;  %v10028_v60 = vld [vmem:[#allocation60_spill] sm:$0xff] }
 0x62e   :  { %5805 = vmatpush1.bf16.msra.mxu0 %v10018_v47  ;;  %5869 = vmatpush1.bf16.msra.mxu1 %v10019_v5  ;;  %v10029_v47 = vld [vmem:[#allocation91_spill] sm:$0xff]  ;;  %v10030_v5 = vld [vmem:[#allocation62_spill] sm:$0xff] }
 0x62f   :  { %5807 = vmatprep.subr.bf16.mxu0 %v10020_v52  ;;  %5871 = vmatprep.subr.bf16.mxu1 %v10021_v55  ;;  %v10031_v52 = vld [vmem:[#allocation93_spill] sm:$0xff]  ;;  %v10032_v55 = vld [vmem:[#allocation64_spill] sm:$0xff] }
 0x632   :  { %5809 = vmatpush1.bf16.msra.mxu0 %v10022_v18  ;;  %5873 = vmatpush1.bf16.msra.mxu1 %v10023_v58  ;;  %v10033_v18 = vld [vmem:[#allocation95_spill] sm:$0xff]  ;;  %v10034_v58 = vld [vmem:[#allocation66_spill] sm:$0xff] }
 0x633   :  { %5811 = vmatprep.subr.bf16.mxu0 %v10024_v33  ;;  %5875 = vmatprep.subr.bf16.mxu1 %v10025_v9  ;;  %v10035_v33 = vld [vmem:[#allocation97_spill] sm:$0xff]  ;;  %v10036_v9 = vld [vmem:[#allocation68_spill] sm:$0xff] }
 0x636   :  { %5813 = vmatpush1.bf16.msra.mxu0 %v10026_v41  ;;  %5877 = vmatpush1.bf16.msra.mxu1 %v10027_v10  ;;  %v10037_v41 = vld [vmem:[#allocation99_spill] sm:$0xff]  ;;  %v10038_v10 = vld [vmem:[#allocation70_spill] sm:$0xff] }
 0x637   :  { %5815 = vmatprep.subr.bf16.mxu0 %v10028_v60  ;;  %5879 = vmatprep.subr.bf16.mxu1 %v10029_v47  ;;  %v10039_v60 = vld [vmem:[#allocation101_spill] sm:$0xff]  ;;  %v10040_v47 = vld [vmem:[#allocation72_spill] sm:$0xff] }
 0x63a   :  { %5817 = vmatpush1.bf16.msra.mxu0 %v10030_v5  ;;  %5881 = vmatpush1.bf16.msra.mxu1 %v10031_v52  ;;  %v10041_v5 = vld [vmem:[#allocation103_spill] sm:$0xff]  ;;  %v10042_v52 = vld [vmem:[#allocation74_spill] sm:$0xff] }
 0x63b   :  { %5819 = vmatprep.subr.bf16.mxu0 %v10032_v55  ;;  %5883 = vmatprep.subr.bf16.mxu1 %v10033_v18  ;;  %v10043_v55 = vld [vmem:[#allocation105_spill] sm:$0xff]  ;;  %v10044_v18 = vld [vmem:[#allocation76_spill] sm:$0xff] }
 0x63e   :  { %5821 = vmatpush1.bf16.msra.mxu0 %v10034_v58  ;;  %5885 = vmatpush1.bf16.msra.mxu1 %v10035_v33  ;;  %v10045_v58 = vld [vmem:[#allocation107_spill] sm:$0xff] }
 0x63f   :  { %5823 = vmatprep.subr.bf16.mxu0 %v10036_v9  ;;  %5887 = vmatprep.subr.bf16.mxu1 %v10037_v41  ;;  %v10046_v33 = vld [vmem:[#allocation163_spill] sm:$0xff]  ;;  %v10047_v9 = vld [vmem:[#allocation154_spill] sm:$0xff] }
 0x640   :  { %v354_v4 = vadd.f32 %v10047_v9, %v10046_v33  ;;  %v10048_v41 = vld [vmem:[#allocation155_spill] sm:$0xff] }
 0x642   :  { %5825 = vmatpush1.bf16.msra.mxu0 %v10038_v10  ;;  %5889 = vmatpush1.bf16.msra.mxu1 %v10039_v60  ;;  %v356_v10 = vadd.f32 %v10048_v41, %v9763_v20 }
 0x643   :  { %5827 = vmatprep.subr.bf16.mxu0 %v10040_v47  ;;  %5891 = vmatprep.subr.bf16.mxu1 %v10041_v5 }
 0x646   :  { %5829 = vmatpush1.bf16.msra.mxu0 %v10042_v52  ;;  %5893 = vmatpush1.bf16.msra.mxu1 %v10043_v55 }
 0x647   :  { %5895 = vmatprep.subr.bf16.mxu0 %v10044_v18  ;;  %5959 = vmatprep.subr.bf16.mxu1 %v10045_v58 }
 0x69c   :  { %v2520_v39 = vpop.f32.mrb[24].mxu0  ;;  %v2591_v60 = vpop.f32.mrb[16].mxu1 }
 0x69d   :  { %v2738_v1 = vadd.f32 %v2520_v39, %v354_v4  ;;  %v2522_v47 = vpop.f32.mrb[25].mxu0  ;;  %v2593_v2 = vpop.f32.mrb[17].mxu1  ;;  %v6670_v52 = vadd.f32 %v2591_v60, %v9762_v35 }
 0x69e   :  { %v2739_v5 = vadd.f32 %v2522_v47, %v356_v10  ;;  %v6671_v55 = vadd.f32 %v2593_v2, %v9764_v23  ;;  %v10049_v47 = vld [vmem:[#allocation169_spill] sm:$0xff] }
 0x69f   :  { %v4342_v61 = vmul.f32 -1.442695, %v2738_v1  ;;  %v4344_v18 = vmul.f32 -1.442695, %v6670_v52  ;;  %v10050_v52 = vld [vmem:[#allocation168_spill] sm:$0xff] }
 0x6a0   :  { %v4343_v34 = vmul.f32 -1.442695, %v2739_v5  ;;  %v4345_v58 = vmul.f32 -1.442695, %v6671_v55 }
 0x6a1   :  { %6910 = vpow2.f32 %v4342_v61 }
 0x6a2   :  { %6912 = vpow2.f32 %v4344_v18 }
 0x6a3   :  { %6914 = vpow2.f32 %v4343_v34 }
 0x6a4   :  { %6916 = vpow2.f32 %v4345_v58 }
 0x6ab   :  { %v6911_v9 = vpop.eup %6910 }
 0x6ac   :  { %v6913_v41 = vpop.eup %6912  ;;  %v2752_v39 = vadd.f32 1.0, %v6911_v9 }
 0x6ad   :  { %v6915_v20 = vpop.eup %6914  ;;  %v2764_v4 = vadd.f32 1.0, %v6913_v41 }
 0x6ae   :  { %v6917_v33 = vpop.eup %6916  ;;  %v2753_v37 = vadd.f32 1.0, %v6915_v20  ;;  %6918 = vrcp.f32 %v2752_v39 }
 0x6af   :  { %v2765_v10 = vadd.f32 1.0, %v6917_v33  ;;  %6920 = vrcp.f32 %v2764_v4 }
 0x6b0   :  { %6922 = vrcp.f32 %v2753_v37 }
 0x6b1   :  { %6924 = vrcp.f32 %v2765_v10 }
 0x6b8   :  { %v6919_v33 = vpop.eup %6918 }
 0x6b9   :  { %v6921_v9 = vpop.eup %6920 }
 0x6ba   :  { %v6923_v37 = vpop.eup %6922 }
 0x6bb   :  { %v6925_v41 = vpop.eup %6924 }
 0x6dc   :  { %v2662_v60 = vpop.f32.mrb[16].mxu0  ;;  %v2733_v2 = vpop.f32.mrb[32].mxu1 }
 0x6dd   :  { %v6686_v1 = vadd.f32 %v2662_v60, %v9765_v59  ;;  %v6702_v61 = vadd.f32 %v2733_v2, %v10049_v47  ;;  %v2664_v5 = vpop.f32.mrb[17].mxu0  ;;  %v2735_v34 = vpop.f32.mrb[33].mxu1  ;;  %v2784_v60 = vmul.f32 %v6921_v9, %v8508_v16 }
 0x6de   :  { %v6687_v55 = vadd.f32 %v2664_v5, %v10050_v52  ;;  %v6703_v18 = vadd.f32 %v2735_v34, %v8040_v19  ;;  %v2785_v5 = vmul.f32 %v6925_v41, %v8510_v42  ;;  %v10055_v41 = vld [vmem:[#allocation143_spill] sm:$0xff] }
 0x6df   :  { %6926 = vtanh.f32 %v6686_v1  ;;  %v4346_v58 = vmul.f32 -1.442695, %v6702_v61 }
 0x6e0   :  { %6928 = vtanh.f32 %v6687_v55  ;;  %v4347_v20 = vmul.f32 -1.442695, %v6703_v18 }
 0x6e1   :  { %6930 = vpow2.f32 %v4346_v58 }
 0x6e2   :  { %6932 = vpow2.f32 %v4347_v20 }
 0x6e9   :  { %v6927_v39 = vpop.eup %6926 }
 0x6ea   :  { %v6929_v4 = vpop.eup %6928  ;;  %v2786_v2 = vmul.f32 %v6927_v39, %v6919_v33  ;;  %v10056_v39 = vld [vmem:[#allocation119_spill] sm:$0xff] }
 0x6eb   :  { %v6931_v10 = vpop.eup %6930  ;;  %v2787_v52 = vmul.f32 %v6929_v4, %v6923_v37  ;;  %v10054_v37 = vld [vmem:[#allocation117_spill] sm:$0xff]  ;;  %v10057_v4 = vld [vmem:[#allocation144_spill] sm:$0xff] }
 0x6ec   :  { %v6933_v34 = vpop.eup %6932  ;;  %v8666_v1 = vadd.f32 %v2786_v2, %v2784_v60  ;;  %v2778_v61 = vadd.f32 1.0, %v6931_v10  ;;  %v10058_v60 = vld [vmem:[#allocation121_spill] sm:$0xff]  ;;  %v10060_v10 = vld [vmem:[#allocation123_spill] sm:$0xff] }
 0x6ed   :  { %v8668_v55 = vadd.f32 %v2787_v52, %v2785_v5  ;;  %v2779_v18 = vadd.f32 1.0, %v6933_v34  ;;  %v10053_v52 = vld [vmem:[#allocation142_spill] sm:$0xff]  ;;  %v10059_v2 = vld [vmem:[#allocation145_spill] sm:$0xff] }
 0x6ee   :  { %6934 = vtanh.f32 %v8666_v1  ;;  %v10061_v5 = vld [vmem:[#allocation146_spill] sm:$0xff]  ;;  %v10062_v34 = vld [vmem:[#allocation125_spill] sm:$0xff] }
 0x6ef   :  { %6936 = vrcp.f32 %v2778_v61  ;;  %v10063_v61 = vld [vmem:[#allocation147_spill] sm:$0xff] }
 0x6f0   :  { %6938 = vtanh.f32 %v8668_v55 }
 0x6f1   :  { %6940 = vrcp.f32 %v2779_v18  ;;  %v10064_v18 = vld [vmem:[#allocation127_spill] sm:$0xff] }
 0x6f8   :  { %v6935_v58 = vpop.eup %6934 }
 0x6f9   :  { %v6937_v16 = vpop.eup %6936 }
 0x6fa   :  { %v6939_v20 = vpop.eup %6938  ;;  %v8674_v42 = vmul.f32 %v6937_v16, %v6935_v58  ;;  %v10065_v58 = vld [vmem:[#allocation148_spill] sm:$0xff]  ;;  %v10066_v16 = vld [vmem:[#allocation129_spill] sm:$0xff] }
 0x6fb   :  { %v6941_v33 = vpop.eup %6940 }
 0x6fc   :  { %v8672_v9 = vmul.f32 %v6941_v33, %v6939_v20  ;;  %10052 = vst [vmem:[#allocation86_spill] sm:$0xff] %v8674_v42  ;;  %v10067_v20 = vld [vmem:[#allocation149_spill] sm:$0xff]  ;;  %v10068_v33 = vld [vmem:[#allocation131_spill] sm:$0xff] }
 0x6fe   :  { %10051 = vst [vmem:[#allocation114_spill] sm:$0xff] %v8672_v9  ;;  %2870 = vmatprep.mubr.f32.mxu0 %v8672_v9  ;;  %2941 = vmatprep.mubr.f32.mxu1 %v8672_v9 }
 0x6ff   :  { %2871 = vmatmul.mubr.f32.vlgmr.msra.gmra.mrb[26].mxu0 %v8674_v42  ;;  %2942 = vmatmul.mubr.f32.vlgmr.msra.gmra.mrb[18].mxu1 %v8674_v42 }
 0x700   :  { %5897 = vmatpush1.bf16.msra.mxu0 %v9674_v54  ;;  %5961 = vmatpush1.bf16.msra.mxu1 %v9675_v38 }
 0x701   :  { %3012 = vmatprep.mubr.f32.mxu0 %v8672_v9  ;;  %3083 = vmatprep.mubr.f32.mxu1 %v8672_v9  ;;  %v10069_v9 = vld [vmem:[#allocation150_spill] sm:$0xff] }
 0x702   :  { %5899 = vmatprep.subr.bf16.mxu0 %v9676_v3  ;;  %5963 = vmatprep.subr.bf16.mxu1 %v7777_v53 }
 0x704   :  { %5901 = vmatpush1.bf16.msra.mxu0 %v9677_v50  ;;  %5965 = vmatpush1.bf16.msra.mxu1 %v9678_v44 }
 0x705   :  { %5903 = vmatprep.subr.bf16.mxu0 %v9679_v25  ;;  %5967 = vmatprep.subr.bf16.mxu1 %v9680_v36 }
 0x708   :  { %5905 = vmatpush1.bf16.msra.mxu0 %v9681_v8  ;;  %5969 = vmatpush1.bf16.msra.mxu1 %v9769_v45 }
 0x709   :  { %5907 = vmatprep.subr.bf16.mxu0 %v9770_v17  ;;  %5971 = vmatprep.subr.bf16.mxu1 %v9771_v46 }
 0x70c   :  { %5909 = vmatpush1.bf16.msra.mxu0 %v9685_v15  ;;  %5973 = vmatpush1.bf16.msra.mxu1 %v9772_v21 }
 0x70d   :  { %5911 = vmatprep.subr.bf16.mxu0 %v9687_v26  ;;  %5975 = vmatprep.subr.bf16.mxu1 %v9773_v28 }
 0x710   :  { %5913 = vmatpush1.bf16.msra.mxu0 %v9689_v57  ;;  %5977 = vmatpush1.bf16.msra.mxu1 %v9774_v43 }
 0x711   :  { %5915 = vmatprep.subr.bf16.mxu0 %v9691_v11  ;;  %5979 = vmatprep.subr.bf16.mxu1 %v9775_v29 }
 0x714   :  { %5917 = vmatpush1.bf16.msra.mxu0 %v9692_v62  ;;  %5981 = vmatpush1.bf16.msra.mxu1 %v9776_v49 }
 0x715   :  { %5919 = vmatprep.subr.bf16.mxu0 %v9694_v63  ;;  %5983 = vmatprep.subr.bf16.mxu1 %v9777_v14 }
 0x718   :  { %5921 = vmatpush1.bf16.msra.mxu0 %v9695_v24  ;;  %5985 = vmatpush1.bf16.msra.mxu1 %v9778_v6 }
 0x719   :  { %5923 = vmatprep.subr.bf16.mxu0 %v9696_v31  ;;  %5987 = vmatprep.subr.bf16.mxu1 %v9779_v56 }
 0x71c   :  { %5925 = vmatpush1.bf16.msra.mxu0 %v9697_v32  ;;  %5989 = vmatpush1.bf16.msra.mxu1 %v9780_v51 }
 0x71d   :  { %5927 = vmatprep.subr.bf16.mxu0 %v9698_v48  ;;  %5991 = vmatprep.subr.bf16.mxu1 %v9781_v22 }
 0x720   :  { %5929 = vmatpush1.bf16.msra.mxu0 %v9699_v27  ;;  %5993 = vmatpush1.bf16.msra.mxu1 %v9782_v7 }
 0x721   :  { %5931 = vmatprep.subr.bf16.mxu0 %v9700_v40  ;;  %5995 = vmatprep.subr.bf16.mxu1 %v9783_v12 }
 0x724   :  { %5933 = vmatpush1.bf16.msra.mxu0 %v9701_v13  ;;  %5997 = vmatpush1.bf16.msra.mxu1 %v9784_v30 }
 0x725   :  { %5935 = vmatprep.subr.bf16.mxu0 %v9863_v0  ;;  %5999 = vmatprep.subr.bf16.mxu1 %v10053_v52 }
 0x728   :  { %5937 = vmatpush1.bf16.msra.mxu0 %v10054_v37  ;;  %6001 = vmatpush1.bf16.msra.mxu1 %v10055_v41 }
 0x729   :  { %5939 = vmatprep.subr.bf16.mxu0 %v10056_v39  ;;  %6003 = vmatprep.subr.bf16.mxu1 %v10057_v4 }
 0x72c   :  { %5941 = vmatpush1.bf16.msra.mxu0 %v10058_v60  ;;  %6005 = vmatpush1.bf16.msra.mxu1 %v10059_v2  ;;  %v10070_v2 = vld [vmem:[#allocation133_spill] sm:$0xff] }
 0x72d   :  { %5943 = vmatprep.subr.bf16.mxu0 %v10060_v10  ;;  %6007 = vmatprep.subr.bf16.mxu1 %v10061_v5  ;;  %v10071_v10 = vld [vmem:[#allocation151_spill] sm:$0xff]  ;;  %v10145_v60 = vld [vmem:[#allocation157_spill] sm:$0xff] }
 0x72e   :  { %v10072_v5 = vld [vmem:[#allocation135_spill] sm:$0xff] }
 0x730   :  { %5945 = vmatpush1.bf16.msra.mxu0 %v10062_v34  ;;  %6009 = vmatpush1.bf16.msra.mxu1 %v10063_v61  ;;  %v10073_v34 = vld [vmem:[#allocation152_spill] sm:$0xff]  ;;  %v10074_v61 = vld [vmem:[#allocation137_spill] sm:$0xff] }
 0x731   :  { %5947 = vmatprep.subr.bf16.mxu0 %v10064_v18  ;;  %6011 = vmatprep.subr.bf16.mxu1 %v10065_v58  ;;  %v10075_v18 = vld [vmem:[#allocation153_spill] sm:$0xff]  ;;  %v10076_v58 = vld [vmem:[#allocation27_spill] sm:$0xff] }
 0x734   :  { %5949 = vmatpush1.bf16.msra.mxu0 %v10066_v16  ;;  %6013 = vmatpush1.bf16.msra.mxu1 %v10067_v20  ;;  %v10077_v16 = vld [vmem:[#allocation36_spill] sm:$0xff] }
 0x735   :  { %5951 = vmatprep.subr.bf16.mxu0 %v10068_v33  ;;  %6015 = vmatprep.subr.bf16.mxu1 %v10069_v9  ;;  %v10078_v9 = vld [vmem:[#allocation28_spill] sm:$0xff]  ;;  %v10087_v33 = vld [vmem:[#allocation53_spill] sm:$0xff] }
 0x738   :  { %5953 = vmatpush1.bf16.msra.mxu0 %v10070_v2  ;;  %6017 = vmatpush1.bf16.msra.mxu1 %v10071_v10  ;;  %v10079_v2 = vld [vmem:[#allocation45_spill] sm:$0xff] }
 0x739   :  { %5955 = vmatprep.subr.bf16.mxu0 %v10072_v5  ;;  %6019 = vmatprep.subr.bf16.mxu1 %v10073_v34  ;;  %v10080_v10 = vld [vmem:[#allocation29_spill] sm:$0xff]  ;;  %v10081_v5 = vld [vmem:[#allocation47_spill] sm:$0xff]  ;;  %v10082_v34 = vld [vmem:[#allocation30_spill] sm:$0xff] }
 0x73c   :  { %5957 = vmatpush1.bf16.msra.mxu0 %v10074_v61  ;;  %6021 = vmatpush1.bf16.msra.mxu1 %v10075_v18  ;;  %v10083_v61 = vld [vmem:[#allocation49_spill] sm:$0xff]  ;;  %v10084_v18 = vld [vmem:[#allocation31_spill] sm:$0xff] }
 0x73d   :  { %6023 = vmatprep.subr.bf16.mxu0 %v10076_v58  ;;  %6087 = vmatprep.subr.bf16.mxu1 %v10077_v16  ;;  %v10085_v58 = vld [vmem:[#allocation51_spill] sm:$0xff]  ;;  %v10086_v16 = vld [vmem:[#allocation32_spill] sm:$0xff] }
 0x73f   :  { %3013 = vmatmul.mubr.f32.vlgmr.msra.gmra.mrb[18].mxu0 %v8674_v42  ;;  %3084 = vmatmul.mubr.f32.vlgmr.msra.gmra.mrb[34].mxu1 %v8674_v42  ;;  %v10088_v42 = vld [vmem:[#allocation33_spill] sm:$0xff] }
 0x740   :  { %6025 = vmatpush1.bf16.msra.mxu0 %v10078_v9  ;;  %6089 = vmatpush1.bf16.msra.mxu1 %v10079_v2  ;;  %v10089_v9 = vld [vmem:[#allocation55_spill] sm:$0xff]  ;;  %v10090_v2 = vld [vmem:[#allocation34_spill] sm:$0xff] }
 0x741   :  { %6027 = vmatprep.subr.bf16.mxu0 %v10080_v10  ;;  %6091 = vmatprep.subr.bf16.mxu1 %v10081_v5  ;;  %v10091_v10 = vld [vmem:[#allocation57_spill] sm:$0xff]  ;;  %v10092_v5 = vld [vmem:[#allocation35_spill] sm:$0xff] }
 0x744   :  { %6029 = vmatpush1.bf16.msra.mxu0 %v10082_v34  ;;  %6093 = vmatpush1.bf16.msra.mxu1 %v10083_v61  ;;  %v10093_v34 = vld [vmem:[#allocation59_spill] sm:$0xff]  ;;  %v10094_v61 = vld [vmem:[#allocation37_spill] sm:$0xff] }
 0x745   :  { %6031 = vmatprep.subr.bf16.mxu0 %v10084_v18  ;;  %6095 = vmatprep.subr.bf16.mxu1 %v10085_v58  ;;  %v10095_v18 = vld [vmem:[#allocation61_spill] sm:$0xff]  ;;  %v10096_v58 = vld [vmem:[#allocation38_spill] sm:$0xff] }
 0x748   :  { %6033 = vmatpush1.bf16.msra.mxu0 %v10086_v16  ;;  %6097 = vmatpush1.bf16.msra.mxu1 %v10087_v33  ;;  %v10097_v16 = vld [vmem:[#allocation63_spill] sm:$0xff] }
 0x749   :  { %6035 = vmatprep.subr.bf16.mxu0 %v10088_v42  ;;  %6099 = vmatprep.subr.bf16.mxu1 %v10089_v9  ;;  %v10098_v33 = vld [vmem:[#allocation39_spill] sm:$0xff]  ;;  %v10099_v42 = vld [vmem:[#allocation65_spill] sm:$0xff]  ;;  %v10100_v9 = vld [vmem:[#allocation40_spill] sm:$0xff] }
 0x74c   :  { %6037 = vmatpush1.bf16.msra.mxu0 %v10090_v2  ;;  %6101 = vmatpush1.bf16.msra.mxu1 %v10091_v10  ;;  %v10101_v2 = vld [vmem:[#allocation67_spill] sm:$0xff]  ;;  %v10102_v10 = vld [vmem:[#allocation41_spill] sm:$0xff] }
 0x74d   :  { %6039 = vmatprep.subr.bf16.mxu0 %v10092_v5  ;;  %6103 = vmatprep.subr.bf16.mxu1 %v10093_v34  ;;  %v10103_v5 = vld [vmem:[#allocation69_spill] sm:$0xff]  ;;  %v10104_v34 = vld [vmem:[#allocation42_spill] sm:$0xff] }
 0x750   :  { %6041 = vmatpush1.bf16.msra.mxu0 %v10094_v61  ;;  %6105 = vmatpush1.bf16.msra.mxu1 %v10095_v18  ;;  %v10105_v61 = vld [vmem:[#allocation71_spill] sm:$0xff] }
 0x751   :  { %6043 = vmatprep.subr.bf16.mxu0 %v10096_v58  ;;  %6107 = vmatprep.subr.bf16.mxu1 %v10097_v16  ;;  %v10106_v18 = vld [vmem:[#allocation43_spill] sm:$0xff]  ;;  %v10107_v58 = vld [vmem:[#allocation73_spill] sm:$0xff]  ;;  %v10108_v16 = vld [vmem:[#allocation44_spill] sm:$0xff] }
 0x754   :  { %6045 = vmatpush1.bf16.msra.mxu0 %v10098_v33  ;;  %6109 = vmatpush1.bf16.msra.mxu1 %v10099_v42  ;;  %v10109_v33 = vld [vmem:[#allocation75_spill] sm:$0xff]  ;;  %v10110_v42 = vld [vmem:[#allocation46_spill] sm:$0xff] }
 0x755   :  { %6047 = vmatprep.subr.bf16.mxu0 %v10100_v9  ;;  %6111 = vmatprep.subr.bf16.mxu1 %v10101_v2  ;;  %v10111_v9 = vld [vmem:[#allocation77_spill] sm:$0xff]  ;;  %v10112_v2 = vld [vmem:[#allocation48_spill] sm:$0xff] }
 0x758   :  { %6049 = vmatpush1.bf16.msra.mxu0 %v10102_v10  ;;  %6113 = vmatpush1.bf16.msra.mxu1 %v10103_v5  ;;  %v10113_v10 = vld [vmem:[#allocation79_spill] sm:$0xff]  ;;  %v10114_v5 = vld [vmem:[#allocation50_spill] sm:$0xff] }
 0x759   :  { %6051 = vmatprep.subr.bf16.mxu0 %v10104_v34  ;;  %6115 = vmatprep.subr.bf16.mxu1 %v10105_v61  ;;  %v10115_v34 = vld [vmem:[#allocation81_spill] sm:$0xff]  ;;  %v10116_v61 = vld [vmem:[#allocation52_spill] sm:$0xff] }
 0x75c   :  { %6053 = vmatpush1.bf16.msra.mxu0 %v10106_v18  ;;  %6117 = vmatpush1.bf16.msra.mxu1 %v10107_v58  ;;  %v10117_v18 = vld [vmem:[#allocation83_spill] sm:$0xff]  ;;  %v10118_v58 = vld [vmem:[#allocation54_spill] sm:$0xff] }
 0x75d   :  { %6055 = vmatprep.subr.bf16.mxu0 %v10108_v16  ;;  %6119 = vmatprep.subr.bf16.mxu1 %v10109_v33  ;;  %v10119_v16 = vld [vmem:[#allocation85_spill] sm:$0xff]  ;;  %v10120_v33 = vld [vmem:[#allocation56_spill] sm:$0xff] }
 0x760   :  { %6057 = vmatpush1.bf16.msra.mxu0 %v10110_v42  ;;  %6121 = vmatpush1.bf16.msra.mxu1 %v10111_v9  ;;  %v10121_v42 = vld [vmem:[#allocation87_spill] sm:$0xff]  ;;  %v10122_v9 = vld [vmem:[#allocation58_spill] sm:$0xff] }
 0x761   :  { %6059 = vmatprep.subr.bf16.mxu0 %v10112_v2  ;;  %6123 = vmatprep.subr.bf16.mxu1 %v10113_v10  ;;  %v10123_v2 = vld [vmem:[#allocation89_spill] sm:$0xff]  ;;  %v10124_v10 = vld [vmem:[#allocation60_spill] sm:$0xff] }
 0x764   :  { %6061 = vmatpush1.bf16.msra.mxu0 %v10114_v5  ;;  %6125 = vmatpush1.bf16.msra.mxu1 %v10115_v34  ;;  %v10125_v5 = vld [vmem:[#allocation91_spill] sm:$0xff]  ;;  %v10126_v34 = vld [vmem:[#allocation62_spill] sm:$0xff] }
 0x765   :  { %6063 = vmatprep.subr.bf16.mxu0 %v10116_v61  ;;  %6127 = vmatprep.subr.bf16.mxu1 %v10117_v18  ;;  %v10127_v61 = vld [vmem:[#allocation93_spill] sm:$0xff]  ;;  %v10128_v18 = vld [vmem:[#allocation64_spill] sm:$0xff] }
 0x768   :  { %6065 = vmatpush1.bf16.msra.mxu0 %v10118_v58  ;;  %6129 = vmatpush1.bf16.msra.mxu1 %v10119_v16  ;;  %v10129_v58 = vld [vmem:[#allocation95_spill] sm:$0xff]  ;;  %v10130_v16 = vld [vmem:[#allocation66_spill] sm:$0xff] }
 0x769   :  { %6067 = vmatprep.subr.bf16.mxu0 %v10120_v33  ;;  %6131 = vmatprep.subr.bf16.mxu1 %v10121_v42  ;;  %v10131_v33 = vld [vmem:[#allocation97_spill] sm:$0xff]  ;;  %v10132_v42 = vld [vmem:[#allocation68_spill] sm:$0xff] }
 0x76c   :  { %6069 = vmatpush1.bf16.msra.mxu0 %v10122_v9  ;;  %6133 = vmatpush1.bf16.msra.mxu1 %v10123_v2  ;;  %v10133_v9 = vld [vmem:[#allocation99_spill] sm:$0xff]  ;;  %v10134_v2 = vld [vmem:[#allocation70_spill] sm:$0xff] }
 0x76d   :  { %6071 = vmatprep.subr.bf16.mxu0 %v10124_v10  ;;  %6135 = vmatprep.subr.bf16.mxu1 %v10125_v5  ;;  %v10135_v10 = vld [vmem:[#allocation101_spill] sm:$0xff]  ;;  %v10136_v5 = vld [vmem:[#allocation72_spill] sm:$0xff] }
 0x770   :  { %6073 = vmatpush1.bf16.msra.mxu0 %v10126_v34  ;;  %6137 = vmatpush1.bf16.msra.mxu1 %v10127_v61  ;;  %v10137_v34 = vld [vmem:[#allocation103_spill] sm:$0xff]  ;;  %v10138_v61 = vld [vmem:[#allocation74_spill] sm:$0xff] }
 0x771   :  { %6075 = vmatprep.subr.bf16.mxu0 %v10128_v18  ;;  %6139 = vmatprep.subr.bf16.mxu1 %v10129_v58  ;;  %v10139_v18 = vld [vmem:[#allocation105_spill] sm:$0xff]  ;;  %v10140_v58 = vld [vmem:[#allocation76_spill] sm:$0xff] }
 0x774   :  { %6077 = vmatpush1.bf16.msra.mxu0 %v10130_v16  ;;  %6141 = vmatpush1.bf16.msra.mxu1 %v10131_v33  ;;  %v10141_v16 = vld [vmem:[#allocation107_spill] sm:$0xff] }
 0x775   :  { %6079 = vmatprep.subr.bf16.mxu0 %v10132_v42  ;;  %6143 = vmatprep.subr.bf16.mxu1 %v10133_v9  ;;  %v10142_v33 = vld [vmem:[#allocation163_spill] sm:$0xff]  ;;  %v10143_v42 = vld [vmem:[#allocation156_spill] sm:$0xff]  ;;  %v10144_v9 = vld [vmem:[#allocation165_spill] sm:$0xff] }
 0x776   :  { %v360_v20 = vadd.f32 %v10143_v42, %v10142_v33 }
 0x778   :  { %6081 = vmatpush1.bf16.msra.mxu0 %v10134_v2  ;;  %6145 = vmatpush1.bf16.msra.mxu1 %v10135_v10  ;;  %v362_v2 = vadd.f32 %v10145_v60, %v10144_v9 }
 0x779   :  { %6083 = vmatprep.subr.bf16.mxu0 %v10136_v5  ;;  %6147 = vmatprep.subr.bf16.mxu1 %v10137_v34 }
 0x77c   :  { %6085 = vmatpush1.bf16.msra.mxu0 %v10138_v61  ;;  %6149 = vmatpush1.bf16.msra.mxu1 %v10139_v18 }
 0x77d   :  { %6151 = vmatprep.subr.bf16.mxu0 %v10140_v58  ;;  %6215 = vmatprep.subr.bf16.mxu1 %v10141_v16 }
 0x7d2   :  { %v2872_v4 = vpop.f32.mrb[26].mxu0  ;;  %v2943_v10 = vpop.f32.mrb[18].mxu1 }
 0x7d3   :  { %v3090_v39 = vadd.f32 %v2872_v4, %v360_v20  ;;  %v2874_v5 = vpop.f32.mrb[27].mxu0  ;;  %v2945_v41 = vpop.f32.mrb[19].mxu1  ;;  %v6672_v61 = vadd.f32 %v2943_v10, %v9762_v35 }
 0x7d4   :  { %v3091_v34 = vadd.f32 %v2874_v5, %v362_v2  ;;  %v6673_v18 = vadd.f32 %v2945_v41, %v9764_v23 }
 0x7d5   :  { %v4348_v37 = vmul.f32 -1.442695, %v3090_v39  ;;  %v4350_v58 = vmul.f32 -1.442695, %v6672_v61 }
 0x7d6   :  { %v4349_v52 = vmul.f32 -1.442695, %v3091_v34  ;;  %v4351_v16 = vmul.f32 -1.442695, %v6673_v18  ;;  %v10146_v34 = vld [vmem:[#allocation168_spill] sm:$0xff] }
 0x7d7   :  { %6942 = vpow2.f32 %v4348_v37 }
 0x7d8   :  { %6944 = vpow2.f32 %v4350_v58 }
 0x7d9   :  { %6946 = vpow2.f32 %v4349_v52 }
 0x7da   :  { %6948 = vpow2.f32 %v4351_v16 }
 0x7e1   :  { %v6943_v42 = vpop.eup %6942 }
 0x7e2   :  { %v6945_v60 = vpop.eup %6944  ;;  %v3104_v4 = vadd.f32 1.0, %v6943_v42 }
 0x7e3   :  { %v6947_v9 = vpop.eup %6946  ;;  %v3116_v20 = vadd.f32 1.0, %v6945_v60 }
 0x7e4   :  { %v6949_v33 = vpop.eup %6948  ;;  %v3105_v0 = vadd.f32 1.0, %v6947_v9  ;;  %6950 = vrcp.f32 %v3104_v4 }
 0x7e5   :  { %v3117_v2 = vadd.f32 1.0, %v6949_v33  ;;  %6952 = vrcp.f32 %v3116_v20 }
 0x7e6   :  { %6954 = vrcp.f32 %v3105_v0 }
 0x7e7   :  { %6956 = vrcp.f32 %v3117_v2 }
 0x7ee   :  { %v6951_v16 = vpop.eup %6950 }
 0x7ef   :  { %v6953_v33 = vpop.eup %6952 }
 0x7f0   :  { %v6955_v0 = vpop.eup %6954  ;;  %v3136_v20 = vmul.f32 %v6953_v33, %v8666_v1 }
 0x7f1   :  { %v6957_v42 = vpop.eup %6956 }
 0x812   :  { %v3014_v10 = vpop.f32.mrb[18].mxu0  ;;  %v3085_v41 = vpop.f32.mrb[34].mxu1 }
 0x813   :  { %v6688_v39 = vadd.f32 %v3014_v10, %v9765_v59  ;;  %v6704_v37 = vadd.f32 %v3085_v41, %v10049_v47  ;;  %v3016_v5 = vpop.f32.mrb[19].mxu0  ;;  %v3087_v52 = vpop.f32.mrb[35].mxu1  ;;  %v3137_v41 = vmul.f32 %v6957_v42, %v8668_v55  ;;  %v10150_v42 = vld [vmem:[#allocation142_spill] sm:$0xff] }
 0x814   :  { %v6689_v61 = vadd.f32 %v3016_v5, %v10146_v34  ;;  %v6705_v18 = vadd.f32 %v3087_v52, %v8040_v19 }
 0x815   :  { %6958 = vtanh.f32 %v6688_v39  ;;  %v4352_v58 = vmul.f32 -1.442695, %v6704_v37 }
 0x816   :  { %6960 = vtanh.f32 %v6689_v61  ;;  %v4353_v9 = vmul.f32 -1.442695, %v6705_v18 }
 0x817   :  { %6962 = vpow2.f32 %v4352_v58 }
 0x818   :  { %6964 = vpow2.f32 %v4353_v9 }
 0x81f   :  { %v6959_v60 = vpop.eup %6958 }
 0x820   :  { %v6961_v4 = vpop.eup %6960  ;;  %v3138_v10 = vmul.f32 %v6959_v60, %v6951_v16  ;;  %v10151_v60 = vld [vmem:[#allocation117_spill] sm:$0xff] }
 0x821   :  { %v6963_v2 = vpop.eup %6962  ;;  %v3139_v5 = vmul.f32 %v6961_v4, %v6955_v0  ;;  %v10149_v0 = vld [vmem:[#allocation115_spill] sm:$0xff] }
 0x822   :  { %v6965_v52 = vpop.eup %6964  ;;  %v8824_v39 = vadd.f32 %v3138_v10, %v3136_v20  ;;  %v3130_v37 = vadd.f32 1.0, %v6963_v2  ;;  %v10152_v4 = vld [vmem:[#allocation143_spill] sm:$0xff]  ;;  %v10154_v10 = vld [vmem:[#allocation144_spill] sm:$0xff]  ;;  %v10155_v2 = vld [vmem:[#allocation121_spill] sm:$0xff] }
 0x823   :  { %v8826_v61 = vadd.f32 %v3139_v5, %v3137_v41  ;;  %v3131_v18 = vadd.f32 1.0, %v6965_v52  ;;  %v10153_v20 = vld [vmem:[#allocation119_spill] sm:$0xff]  ;;  %v10156_v41 = vld [vmem:[#allocation145_spill] sm:$0xff]  ;;  %v10158_v52 = vld [vmem:[#allocation146_spill] sm:$0xff] }
 0x824   :  { %6966 = vtanh.f32 %v8824_v39  ;;  %v10157_v5 = vld [vmem:[#allocation123_spill] sm:$0xff] }
 0x825   :  { %6968 = vrcp.f32 %v3130_v37  ;;  %v10159_v37 = vld [vmem:[#allocation125_spill] sm:$0xff] }
 0x826   :  { %6970 = vtanh.f32 %v8826_v61 }
 0x827   :  { %6972 = vrcp.f32 %v3131_v18  ;;  %v10160_v18 = vld [vmem:[#allocation147_spill] sm:$0xff] }
 0x82e   :  { %v6967_v58 = vpop.eup %6966 }
 0x82f   :  { %v6969_v1 = vpop.eup %6968 }
 0x830   :  { %v6971_v9 = vpop.eup %6970  ;;  %v8832_v55 = vmul.f32 %v6969_v1, %v6967_v58  ;;  %v10161_v58 = vld [vmem:[#allocation127_spill] sm:$0xff]  ;;  %v10162_v1 = vld [vmem:[#allocation148_spill] sm:$0xff] }
 0x831   :  { %v6973_v16 = vpop.eup %6972 }
 0x832   :  { %v8830_v33 = vmul.f32 %v6973_v16, %v6971_v9  ;;  %10148 = vst [vmem:[#allocation92_spill] sm:$0xff] %v8832_v55  ;;  %v10163_v9 = vld [vmem:[#allocation129_spill] sm:$0xff] }
 0x833   :  { %v10164_v16 = vld [vmem:[#allocation149_spill] sm:$0xff] }
 0x834   :  { %10147 = vst [vmem:[#allocation90_spill] sm:$0xff] %v8830_v33  ;;  %3222 = vmatprep.mubr.f32.mxu0 %v8830_v33  ;;  %3293 = vmatprep.mubr.f32.mxu1 %v8830_v33 }
 0x835   :  { %3223 = vmatmul.mubr.f32.vlgmr.msra.gmra.mrb[28].mxu0 %v8832_v55  ;;  %3294 = vmatmul.mubr.f32.vlgmr.msra.gmra.mrb[20].mxu1 %v8832_v55 }
 0x836   :  { %6153 = vmatpush1.bf16.msra.mxu0 %v9674_v54  ;;  %6217 = vmatpush1.bf16.msra.mxu1 %v9675_v38 }
 0x837   :  { %3364 = vmatprep.mubr.f32.mxu0 %v8830_v33  ;;  %3435 = vmatprep.mubr.f32.mxu1 %v8830_v33  ;;  %v10165_v33 = vld [vmem:[#allocation131_spill] sm:$0xff] }
 0x838   :  { %6155 = vmatprep.subr.bf16.mxu0 %v9676_v3  ;;  %6219 = vmatprep.subr.bf16.mxu1 %v7777_v53 }
 0x83a   :  { %6157 = vmatpush1.bf16.msra.mxu0 %v9677_v50  ;;  %6221 = vmatpush1.bf16.msra.mxu1 %v9678_v44 }
 0x83b   :  { %6159 = vmatprep.subr.bf16.mxu0 %v9679_v25  ;;  %6223 = vmatprep.subr.bf16.mxu1 %v9680_v36 }
 0x83e   :  { %6161 = vmatpush1.bf16.msra.mxu0 %v9681_v8  ;;  %6225 = vmatpush1.bf16.msra.mxu1 %v9769_v45 }
 0x83f   :  { %6163 = vmatprep.subr.bf16.mxu0 %v9770_v17  ;;  %6227 = vmatprep.subr.bf16.mxu1 %v9771_v46 }
 0x842   :  { %6165 = vmatpush1.bf16.msra.mxu0 %v9685_v15  ;;  %6229 = vmatpush1.bf16.msra.mxu1 %v9772_v21 }
 0x843   :  { %6167 = vmatprep.subr.bf16.mxu0 %v9687_v26  ;;  %6231 = vmatprep.subr.bf16.mxu1 %v9773_v28 }
 0x846   :  { %6169 = vmatpush1.bf16.msra.mxu0 %v9689_v57  ;;  %6233 = vmatpush1.bf16.msra.mxu1 %v9774_v43 }
 0x847   :  { %6171 = vmatprep.subr.bf16.mxu0 %v9691_v11  ;;  %6235 = vmatprep.subr.bf16.mxu1 %v9775_v29 }
 0x84a   :  { %6173 = vmatpush1.bf16.msra.mxu0 %v9692_v62  ;;  %6237 = vmatpush1.bf16.msra.mxu1 %v9776_v49 }
 0x84b   :  { %6175 = vmatprep.subr.bf16.mxu0 %v9694_v63  ;;  %6239 = vmatprep.subr.bf16.mxu1 %v9777_v14 }
 0x84e   :  { %6177 = vmatpush1.bf16.msra.mxu0 %v9695_v24  ;;  %6241 = vmatpush1.bf16.msra.mxu1 %v9778_v6 }
 0x84f   :  { %6179 = vmatprep.subr.bf16.mxu0 %v9696_v31  ;;  %6243 = vmatprep.subr.bf16.mxu1 %v9779_v56 }
 0x852   :  { %6181 = vmatpush1.bf16.msra.mxu0 %v9697_v32  ;;  %6245 = vmatpush1.bf16.msra.mxu1 %v9780_v51 }
 0x853   :  { %6183 = vmatprep.subr.bf16.mxu0 %v9698_v48  ;;  %6247 = vmatprep.subr.bf16.mxu1 %v9781_v22 }
 0x856   :  { %6185 = vmatpush1.bf16.msra.mxu0 %v9699_v27  ;;  %6249 = vmatpush1.bf16.msra.mxu1 %v9782_v7 }
 0x857   :  { %6187 = vmatprep.subr.bf16.mxu0 %v9700_v40  ;;  %6251 = vmatprep.subr.bf16.mxu1 %v9783_v12 }
 0x85a   :  { %6189 = vmatpush1.bf16.msra.mxu0 %v9701_v13  ;;  %6253 = vmatpush1.bf16.msra.mxu1 %v9784_v30 }
 0x85b   :  { %6191 = vmatprep.subr.bf16.mxu0 %v10149_v0  ;;  %6255 = vmatprep.subr.bf16.mxu1 %v10150_v42 }
 0x85e   :  { %6193 = vmatpush1.bf16.msra.mxu0 %v10151_v60  ;;  %6257 = vmatpush1.bf16.msra.mxu1 %v10152_v4 }
 0x85f   :  { %6195 = vmatprep.subr.bf16.mxu0 %v10153_v20  ;;  %6259 = vmatprep.subr.bf16.mxu1 %v10154_v10  ;;  %v10242_v10 = vld [vmem:[#allocation159_spill] sm:$0xff] }
 0x862   :  { %6197 = vmatpush1.bf16.msra.mxu0 %v10155_v2  ;;  %6261 = vmatpush1.bf16.msra.mxu1 %v10156_v41  ;;  %v10166_v2 = vld [vmem:[#allocation150_spill] sm:$0xff]  ;;  %v10167_v41 = vld [vmem:[#allocation133_spill] sm:$0xff] }
 0x863   :  { %6199 = vmatprep.subr.bf16.mxu0 %v10157_v5  ;;  %6263 = vmatprep.subr.bf16.mxu1 %v10158_v52  ;;  %v10168_v5 = vld [vmem:[#allocation151_spill] sm:$0xff] }
 0x864   :  { %v10169_v52 = vld [vmem:[#allocation135_spill] sm:$0xff] }
 0x866   :  { %6201 = vmatpush1.bf16.msra.mxu0 %v10159_v37  ;;  %6265 = vmatpush1.bf16.msra.mxu1 %v10160_v18  ;;  %v10170_v37 = vld [vmem:[#allocation152_spill] sm:$0xff]  ;;  %v10171_v18 = vld [vmem:[#allocation137_spill] sm:$0xff] }
 0x867   :  { %6203 = vmatprep.subr.bf16.mxu0 %v10161_v58  ;;  %6267 = vmatprep.subr.bf16.mxu1 %v10162_v1  ;;  %v10172_v58 = vld [vmem:[#allocation153_spill] sm:$0xff]  ;;  %v10173_v1 = vld [vmem:[#allocation27_spill] sm:$0xff] }
 0x86a   :  { %6205 = vmatpush1.bf16.msra.mxu0 %v10163_v9  ;;  %6269 = vmatpush1.bf16.msra.mxu1 %v10164_v16  ;;  %v10174_v9 = vld [vmem:[#allocation36_spill] sm:$0xff] }
 0x86b   :  { %6207 = vmatprep.subr.bf16.mxu0 %v10165_v33  ;;  %6271 = vmatprep.subr.bf16.mxu1 %v10166_v2  ;;  %v10175_v2 = vld [vmem:[#allocation28_spill] sm:$0xff]  ;;  %v10184_v33 = vld [vmem:[#allocation53_spill] sm:$0xff] }
 0x86e   :  { %6209 = vmatpush1.bf16.msra.mxu0 %v10167_v41  ;;  %6273 = vmatpush1.bf16.msra.mxu1 %v10168_v5  ;;  %v10176_v41 = vld [vmem:[#allocation45_spill] sm:$0xff] }
 0x86f   :  { %6211 = vmatprep.subr.bf16.mxu0 %v10169_v52  ;;  %6275 = vmatprep.subr.bf16.mxu1 %v10170_v37  ;;  %v10177_v5 = vld [vmem:[#allocation29_spill] sm:$0xff]  ;;  %v10178_v52 = vld [vmem:[#allocation47_spill] sm:$0xff]  ;;  %v10179_v37 = vld [vmem:[#allocation30_spill] sm:$0xff] }
 0x872   :  { %6213 = vmatpush1.bf16.msra.mxu0 %v10171_v18  ;;  %6277 = vmatpush1.bf16.msra.mxu1 %v10172_v58  ;;  %v10180_v18 = vld [vmem:[#allocation49_spill] sm:$0xff]  ;;  %v10181_v58 = vld [vmem:[#allocation31_spill] sm:$0xff] }
 0x873   :  { %6279 = vmatprep.subr.bf16.mxu0 %v10173_v1  ;;  %6343 = vmatprep.subr.bf16.mxu1 %v10174_v9  ;;  %v10182_v1 = vld [vmem:[#allocation51_spill] sm:$0xff]  ;;  %v10183_v9 = vld [vmem:[#allocation32_spill] sm:$0xff] }
 0x875   :  { %3365 = vmatmul.mubr.f32.vlgmr.msra.gmra.mrb[20].mxu0 %v8832_v55  ;;  %3436 = vmatmul.mubr.f32.vlgmr.msra.gmra.mrb[36].mxu1 %v8832_v55  ;;  %v10185_v55 = vld [vmem:[#allocation33_spill] sm:$0xff] }
 0x876   :  { %6281 = vmatpush1.bf16.msra.mxu0 %v10175_v2  ;;  %6345 = vmatpush1.bf16.msra.mxu1 %v10176_v41  ;;  %v10186_v2 = vld [vmem:[#allocation55_spill] sm:$0xff]  ;;  %v10187_v41 = vld [vmem:[#allocation34_spill] sm:$0xff] }
 0x877   :  { %6283 = vmatprep.subr.bf16.mxu0 %v10177_v5  ;;  %6347 = vmatprep.subr.bf16.mxu1 %v10178_v52  ;;  %v10188_v5 = vld [vmem:[#allocation57_spill] sm:$0xff]  ;;  %v10189_v52 = vld [vmem:[#allocation35_spill] sm:$0xff] }
 0x87a   :  { %6285 = vmatpush1.bf16.msra.mxu0 %v10179_v37  ;;  %6349 = vmatpush1.bf16.msra.mxu1 %v10180_v18  ;;  %v10190_v37 = vld [vmem:[#allocation59_spill] sm:$0xff]  ;;  %v10191_v18 = vld [vmem:[#allocation37_spill] sm:$0xff] }
 0x87b   :  { %6287 = vmatprep.subr.bf16.mxu0 %v10181_v58  ;;  %6351 = vmatprep.subr.bf16.mxu1 %v10182_v1  ;;  %v10192_v58 = vld [vmem:[#allocation61_spill] sm:$0xff]  ;;  %v10193_v1 = vld [vmem:[#allocation38_spill] sm:$0xff] }
 0x87e   :  { %6289 = vmatpush1.bf16.msra.mxu0 %v10183_v9  ;;  %6353 = vmatpush1.bf16.msra.mxu1 %v10184_v33  ;;  %v10194_v9 = vld [vmem:[#allocation63_spill] sm:$0xff] }
 0x87f   :  { %6291 = vmatprep.subr.bf16.mxu0 %v10185_v55  ;;  %6355 = vmatprep.subr.bf16.mxu1 %v10186_v2  ;;  %v10195_v33 = vld [vmem:[#allocation39_spill] sm:$0xff]  ;;  %v10196_v55 = vld [vmem:[#allocation65_spill] sm:$0xff]  ;;  %v10197_v2 = vld [vmem:[#allocation40_spill] sm:$0xff] }
 0x882   :  { %6293 = vmatpush1.bf16.msra.mxu0 %v10187_v41  ;;  %6357 = vmatpush1.bf16.msra.mxu1 %v10188_v5  ;;  %v10198_v41 = vld [vmem:[#allocation67_spill] sm:$0xff]  ;;  %v10199_v5 = vld [vmem:[#allocation41_spill] sm:$0xff] }
 0x883   :  { %6295 = vmatprep.subr.bf16.mxu0 %v10189_v52  ;;  %6359 = vmatprep.subr.bf16.mxu1 %v10190_v37  ;;  %v10200_v52 = vld [vmem:[#allocation69_spill] sm:$0xff]  ;;  %v10201_v37 = vld [vmem:[#allocation42_spill] sm:$0xff] }
 0x886   :  { %6297 = vmatpush1.bf16.msra.mxu0 %v10191_v18  ;;  %6361 = vmatpush1.bf16.msra.mxu1 %v10192_v58  ;;  %v10202_v18 = vld [vmem:[#allocation71_spill] sm:$0xff] }
 0x887   :  { %6299 = vmatprep.subr.bf16.mxu0 %v10193_v1  ;;  %6363 = vmatprep.subr.bf16.mxu1 %v10194_v9  ;;  %v10203_v58 = vld [vmem:[#allocation43_spill] sm:$0xff]  ;;  %v10204_v1 = vld [vmem:[#allocation73_spill] sm:$0xff]  ;;  %v10205_v9 = vld [vmem:[#allocation44_spill] sm:$0xff] }
 0x88a   :  { %6301 = vmatpush1.bf16.msra.mxu0 %v10195_v33  ;;  %6365 = vmatpush1.bf16.msra.mxu1 %v10196_v55  ;;  %v10206_v33 = vld [vmem:[#allocation75_spill] sm:$0xff]  ;;  %v10207_v55 = vld [vmem:[#allocation46_spill] sm:$0xff] }
 0x88b   :  { %6303 = vmatprep.subr.bf16.mxu0 %v10197_v2  ;;  %6367 = vmatprep.subr.bf16.mxu1 %v10198_v41  ;;  %v10208_v2 = vld [vmem:[#allocation77_spill] sm:$0xff]  ;;  %v10209_v41 = vld [vmem:[#allocation48_spill] sm:$0xff] }
 0x88e   :  { %6305 = vmatpush1.bf16.msra.mxu0 %v10199_v5  ;;  %6369 = vmatpush1.bf16.msra.mxu1 %v10200_v52  ;;  %v10210_v5 = vld [vmem:[#allocation79_spill] sm:$0xff]  ;;  %v10211_v52 = vld [vmem:[#allocation50_spill] sm:$0xff] }
 0x88f   :  { %6307 = vmatprep.subr.bf16.mxu0 %v10201_v37  ;;  %6371 = vmatprep.subr.bf16.mxu1 %v10202_v18  ;;  %v10212_v37 = vld [vmem:[#allocation81_spill] sm:$0xff]  ;;  %v10213_v18 = vld [vmem:[#allocation52_spill] sm:$0xff] }
 0x892   :  { %6309 = vmatpush1.bf16.msra.mxu0 %v10203_v58  ;;  %6373 = vmatpush1.bf16.msra.mxu1 %v10204_v1  ;;  %v10214_v58 = vld [vmem:[#allocation83_spill] sm:$0xff]  ;;  %v10215_v1 = vld [vmem:[#allocation54_spill] sm:$0xff] }
 0x893   :  { %6311 = vmatprep.subr.bf16.mxu0 %v10205_v9  ;;  %6375 = vmatprep.subr.bf16.mxu1 %v10206_v33  ;;  %v10216_v9 = vld [vmem:[#allocation85_spill] sm:$0xff]  ;;  %v10217_v33 = vld [vmem:[#allocation56_spill] sm:$0xff] }
 0x896   :  { %6313 = vmatpush1.bf16.msra.mxu0 %v10207_v55  ;;  %6377 = vmatpush1.bf16.msra.mxu1 %v10208_v2  ;;  %v10218_v55 = vld [vmem:[#allocation87_spill] sm:$0xff]  ;;  %v10219_v2 = vld [vmem:[#allocation58_spill] sm:$0xff] }
 0x897   :  { %6315 = vmatprep.subr.bf16.mxu0 %v10209_v41  ;;  %6379 = vmatprep.subr.bf16.mxu1 %v10210_v5  ;;  %v10220_v41 = vld [vmem:[#allocation89_spill] sm:$0xff]  ;;  %v10221_v5 = vld [vmem:[#allocation60_spill] sm:$0xff] }
 0x89a   :  { %6317 = vmatpush1.bf16.msra.mxu0 %v10211_v52  ;;  %6381 = vmatpush1.bf16.msra.mxu1 %v10212_v37  ;;  %v10222_v52 = vld [vmem:[#allocation91_spill] sm:$0xff]  ;;  %v10223_v37 = vld [vmem:[#allocation62_spill] sm:$0xff] }
 0x89b   :  { %6319 = vmatprep.subr.bf16.mxu0 %v10213_v18  ;;  %6383 = vmatprep.subr.bf16.mxu1 %v10214_v58  ;;  %v10224_v18 = vld [vmem:[#allocation93_spill] sm:$0xff]  ;;  %v10225_v58 = vld [vmem:[#allocation64_spill] sm:$0xff] }
 0x89e   :  { %6321 = vmatpush1.bf16.msra.mxu0 %v10215_v1  ;;  %6385 = vmatpush1.bf16.msra.mxu1 %v10216_v9  ;;  %v10226_v1 = vld [vmem:[#allocation95_spill] sm:$0xff]  ;;  %v10227_v9 = vld [vmem:[#allocation66_spill] sm:$0xff] }
 0x89f   :  { %6323 = vmatprep.subr.bf16.mxu0 %v10217_v33  ;;  %6387 = vmatprep.subr.bf16.mxu1 %v10218_v55  ;;  %v10228_v33 = vld [vmem:[#allocation97_spill] sm:$0xff]  ;;  %v10229_v55 = vld [vmem:[#allocation68_spill] sm:$0xff] }
 0x8a2   :  { %6325 = vmatpush1.bf16.msra.mxu0 %v10219_v2  ;;  %6389 = vmatpush1.bf16.msra.mxu1 %v10220_v41  ;;  %v10230_v2 = vld [vmem:[#allocation99_spill] sm:$0xff]  ;;  %v10231_v41 = vld [vmem:[#allocation70_spill] sm:$0xff] }
 0x8a3   :  { %6327 = vmatprep.subr.bf16.mxu0 %v10221_v5  ;;  %6391 = vmatprep.subr.bf16.mxu1 %v10222_v52  ;;  %v10232_v5 = vld [vmem:[#allocation101_spill] sm:$0xff]  ;;  %v10233_v52 = vld [vmem:[#allocation72_spill] sm:$0xff] }
 0x8a6   :  { %6329 = vmatpush1.bf16.msra.mxu0 %v10223_v37  ;;  %6393 = vmatpush1.bf16.msra.mxu1 %v10224_v18  ;;  %v10234_v37 = vld [vmem:[#allocation103_spill] sm:$0xff]  ;;  %v10235_v18 = vld [vmem:[#allocation74_spill] sm:$0xff] }
 0x8a7   :  { %6331 = vmatprep.subr.bf16.mxu0 %v10225_v58  ;;  %6395 = vmatprep.subr.bf16.mxu1 %v10226_v1  ;;  %v10236_v58 = vld [vmem:[#allocation105_spill] sm:$0xff]  ;;  %v10237_v1 = vld [vmem:[#allocation76_spill] sm:$0xff] }
 0x8aa   :  { %6333 = vmatpush1.bf16.msra.mxu0 %v10227_v9  ;;  %6397 = vmatpush1.bf16.msra.mxu1 %v10228_v33  ;;  %v10238_v9 = vld [vmem:[#allocation107_spill] sm:$0xff] }
 0x8ab   :  { %6335 = vmatprep.subr.bf16.mxu0 %v10229_v55  ;;  %6399 = vmatprep.subr.bf16.mxu1 %v10230_v2  ;;  %v10239_v33 = vld [vmem:[#allocation163_spill] sm:$0xff]  ;;  %v10240_v55 = vld [vmem:[#allocation158_spill] sm:$0xff]  ;;  %v10241_v2 = vld [vmem:[#allocation165_spill] sm:$0xff] }
 0x8ac   :  { %v366_v16 = vadd.f32 %v10240_v55, %v10239_v33 }
 0x8ae   :  { %6337 = vmatpush1.bf16.msra.mxu0 %v10231_v41  ;;  %6401 = vmatpush1.bf16.msra.mxu1 %v10232_v5  ;;  %v368_v41 = vadd.f32 %v10242_v10, %v10241_v2 }
 0x8af   :  { %6339 = vmatprep.subr.bf16.mxu0 %v10233_v52  ;;  %6403 = vmatprep.subr.bf16.mxu1 %v10234_v37 }
 0x8b2   :  { %6341 = vmatpush1.bf16.msra.mxu0 %v10235_v18  ;;  %6405 = vmatpush1.bf16.msra.mxu1 %v10236_v58 }
 0x8b3   :  { %6407 = vmatprep.subr.bf16.mxu0 %v10237_v1  ;;  %6471 = vmatprep.subr.bf16.mxu1 %v10238_v9 }
 0x908   :  { %v3224_v20 = vpop.f32.mrb[28].mxu0  ;;  %v3295_v5 = vpop.f32.mrb[20].mxu1 }
 0x909   :  { %v3442_v4 = vadd.f32 %v3224_v20, %v366_v16  ;;  %v3226_v52 = vpop.f32.mrb[29].mxu0  ;;  %v3297_v60 = vpop.f32.mrb[21].mxu1  ;;  %v6674_v18 = vadd.f32 %v3295_v5, %v9762_v35 }
 0x90a   :  { %v3443_v37 = vadd.f32 %v3226_v52, %v368_v41  ;;  %v6675_v58 = vadd.f32 %v3297_v60, %v9764_v23 }
 0x90b   :  { %v4354_v42 = vmul.f32 -1.442695, %v3442_v4  ;;  %v4356_v1 = vmul.f32 -1.442695, %v6674_v18 }
 0x90c   :  { %v4355_v0 = vmul.f32 -1.442695, %v3443_v37  ;;  %v4357_v9 = vmul.f32 -1.442695, %v6675_v58 }
 0x90d   :  { %6974 = vpow2.f32 %v4354_v42 }
 0x90e   :  { %6976 = vpow2.f32 %v4356_v1 }
 0x90f   :  { %6978 = vpow2.f32 %v4355_v0 }
 0x910   :  { %6980 = vpow2.f32 %v4357_v9 }
 0x917   :  { %v6975_v55 = vpop.eup %6974 }
 0x918   :  { %v6977_v10 = vpop.eup %6976  ;;  %v3456_v20 = vadd.f32 1.0, %v6975_v55 }
 0x919   :  { %v6979_v2 = vpop.eup %6978  ;;  %v3468_v16 = vadd.f32 1.0, %v6977_v10 }
 0x91a   :  { %v6981_v33 = vpop.eup %6980  ;;  %v3457_v30 = vadd.f32 1.0, %v6979_v2  ;;  %6982 = vrcp.f32 %v3456_v20 }
 0x91b   :  { %v3469_v41 = vadd.f32 1.0, %v6981_v33  ;;  %6984 = vrcp.f32 %v3468_v16 }
 0x91c   :  { %6986 = vrcp.f32 %v3457_v30 }
 0x91d   :  { %6988 = vrcp.f32 %v3469_v41 }
 0x924   :  { %v6983_v2 = vpop.eup %6982 }
 0x925   :  { %v6985_v1 = vpop.eup %6984 }
 0x926   :  { %v6987_v30 = vpop.eup %6986  ;;  %v3488_v20 = vmul.f32 %v6985_v1, %v8824_v39  ;;  %v10266_v1 = vld [vmem:[#allocation137_spill] sm:$0xff] }
 0x927   :  { %v6989_v9 = vpop.eup %6988 }
 0x948   :  { %v3366_v5 = vpop.f32.mrb[20].mxu0  ;;  %v3437_v60 = vpop.f32.mrb[36].mxu1 }
 0x949   :  { %v6690_v4 = vadd.f32 %v3366_v5, %v9765_v59  ;;  %v6706_v42 = vadd.f32 %v3437_v60, %v10049_v47  ;;  %v3368_v52 = vpop.f32.mrb[21].mxu0  ;;  %v3439_v0 = vpop.f32.mrb[37].mxu1  ;;  %v3489_v5 = vmul.f32 %v6989_v9, %v8826_v61 }
 0x94a   :  { %v6691_v37 = vadd.f32 %v3368_v52, %v10146_v34  ;;  %v6707_v18 = vadd.f32 %v3439_v0, %v8040_v19 }
 0x94b   :  { %6990 = vtanh.f32 %v6690_v4  ;;  %v4358_v58 = vmul.f32 -1.442695, %v6706_v42 }
 0x94c   :  { %6992 = vtanh.f32 %v6691_v37  ;;  %v4359_v33 = vmul.f32 -1.442695, %v6707_v18 }
 0x94d   :  { %6994 = vpow2.f32 %v4358_v58 }
 0x94e   :  { %6996 = vpow2.f32 %v4359_v33 }
 0x955   :  { %v6991_v55 = vpop.eup %6990 }
 0x956   :  { %v6993_v10 = vpop.eup %6992  ;;  %v3490_v16 = vmul.f32 %v6991_v55, %v6983_v2 }
 0x957   :  { %v6995_v41 = vpop.eup %6994  ;;  %v3491_v60 = vmul.f32 %v6993_v10, %v6987_v30  ;;  %v10267_v30 = vld [vmem:[#allocation153_spill] sm:$0xff] }
 0x958   :  { %v6997_v52 = vpop.eup %6996  ;;  %v8982_v4 = vadd.f32 %v3490_v16, %v3488_v20  ;;  %v3482_v42 = vadd.f32 1.0, %v6995_v41  ;;  %v3879_v10 = vld [vmem:[#allocation15 + $0x30] sm:$0xff]  ;;  %v3882_v20 = vld [vmem:[#allocation15 + $0x48] sm:$0xff]  ;;  %v3881_v16 = vld [vmem:[#allocation15 + $0x40] sm:$0xff] }
 0x959   :  { %v8984_v0 = vadd.f32 %v3491_v60, %v3489_v5  ;;  %v3483_v37 = vadd.f32 1.0, %v6997_v52  ;;  %v3884_v60 = vld [vmem:[#allocation15 + $0x58] sm:$0xff]  ;;  %v3886_v52 = vld [vmem:[#allocation15 + $0x68] sm:$0xff] }
 0x95a   :  { %6998 = vtanh.f32 %v8982_v4 }
 0x95b   :  { %7000 = vrcp.f32 %v3482_v42  ;;  %v3889_v42 = vld [vmem:[#allocation15 + $0x80] sm:$0xff] }
 0x95c   :  { %7002 = vtanh.f32 %v8984_v0 }
 0x95d   :  { %7004 = vrcp.f32 %v3483_v37  ;;  %v3935_v37 = vld [vmem:[#allocation15 + $0x1f0] sm:$0xff] }
 0x964   :  { %v6999_v18 = vpop.eup %6998 }
 0x965   :  { %v7001_v39 = vpop.eup %7000 }
 0x966   :  { %v7003_v58 = vpop.eup %7002  ;;  %v8990_v61 = vmul.f32 %v7001_v39, %v6999_v18  ;;  %v3938_v18 = vld [vmem:[#allocation15 + $0x208] sm:$0xff]  ;;  %v10268_v39 = vld [vmem:[#allocation170_spill] sm:$0xff] }
 0x967   :  { %v7005_v33 = vpop.eup %7004 }
 0x968   :  { %v8988_v2 = vmul.f32 %v7005_v33, %v7003_v58  ;;  %v6540_v58 = vpack.c.bf16 %v3882_v20, %v3879_v10  ;;  %v6604_v33 = vpack.c.bf16 %v3884_v60, %v3881_v16  ;;  %v3908_v10 = vld [vmem:[#allocation15 + $0x118] sm:$0xff]  ;;  %v3910_v20 = vld [vmem:[#allocation15 + $0x128] sm:$0xff]  ;;  %v3913_v16 = vld [vmem:[#allocation15 + $0x140] sm:$0xff] }
 0x96a   :  { %3574 = vmatprep.mubr.f32.mxu0 %v8988_v2  ;;  %3645 = vmatprep.mubr.f32.mxu1 %v8988_v2 }
 0x96b   :  { %3575 = vmatmul.mubr.f32.vlgmr.msra.gmra.mrb[30].mxu0 %v8990_v61  ;;  %3646 = vmatmul.mubr.f32.vlgmr.msra.gmra.mrb[22].mxu1 %v8990_v61 }
 0x96c   :  { %6409 = vmatpush1.bf16.msra.mxu0 %v9674_v54  ;;  %6473 = vmatpush1.bf16.msra.mxu1 %v9675_v38  ;;  %v10246_v54 = vld [vmem:[#allocation117_spill] sm:$0xff]  ;;  %v10248_v38 = vld [vmem:[#allocation119_spill] sm:$0xff] }
 0x96d   :  { %3716 = vmatprep.mubr.f32.mxu0 %v8988_v2  ;;  %3787 = vmatprep.mubr.f32.mxu1 %v8988_v2 }
 0x96e   :  { %6411 = vmatprep.subr.bf16.mxu0 %v9676_v3  ;;  %6475 = vmatprep.subr.bf16.mxu1 %v7777_v53  ;;  %v10243_v53 = vld [vmem:[#allocation141_spill] sm:$0xff]  ;;  %v10249_v3 = vld [vmem:[#allocation144_spill] sm:$0xff] }
 0x970   :  { %6413 = vmatpush1.bf16.msra.mxu0 %v9677_v50  ;;  %6477 = vmatpush1.bf16.msra.mxu1 %v9678_v44  ;;  %v10250_v50 = vld [vmem:[#allocation121_spill] sm:$0xff]  ;;  %v10252_v44 = vld [vmem:[#allocation123_spill] sm:$0xff] }
 0x971   :  { %6415 = vmatprep.subr.bf16.mxu0 %v9679_v25  ;;  %6479 = vmatprep.subr.bf16.mxu1 %v9680_v36  ;;  %v10254_v25 = vld [vmem:[#allocation125_spill] sm:$0xff]  ;;  %v10255_v36 = vld [vmem:[#allocation147_spill] sm:$0xff] }
 0x974   :  { %6417 = vmatpush1.bf16.msra.mxu0 %v9681_v8  ;;  %6481 = vmatpush1.bf16.msra.mxu1 %v9769_v45  ;;  %v10256_v8 = vld [vmem:[#allocation127_spill] sm:$0xff]  ;;  %v3926_v45 = vld [vmem:[#allocation15 + $0x1a8] sm:$0xff] }
 0x975   :  { %6419 = vmatprep.subr.bf16.mxu0 %v9770_v17  ;;  %6483 = vmatprep.subr.bf16.mxu1 %v9771_v46  ;;  %v10262_v17 = vld [vmem:[#allocation133_spill] sm:$0xff]  ;;  %v10263_v46 = vld [vmem:[#allocation151_spill] sm:$0xff] }
 0x978   :  { %6421 = vmatpush1.bf16.msra.mxu0 %v9685_v15  ;;  %6485 = vmatpush1.bf16.msra.mxu1 %v9772_v21  ;;  %v10260_v15 = vld [vmem:[#allocation131_spill] sm:$0xff] }
 0x979   :  { %6423 = vmatprep.subr.bf16.mxu0 %v9687_v26  ;;  %6487 = vmatprep.subr.bf16.mxu1 %v9773_v28  ;;  %v3874_v26 = vld [vmem:[#allocation15 + $0x8] sm:$0xff]  ;;  %v10264_v21 = vld [vmem:[#allocation135_spill] sm:$0xff] }
 0x97a   :  { %v10265_v28 = vld [vmem:[#allocation152_spill] sm:$0xff] }
 0x97c   :  { %6425 = vmatpush1.bf16.msra.mxu0 %v9689_v57  ;;  %6489 = vmatpush1.bf16.msra.mxu1 %v9774_v43  ;;  %v3923_v57 = vld [vmem:[#allocation15 + $0x190] sm:$0xff] }
 0x97d   :  { %6427 = vmatprep.subr.bf16.mxu0 %v9691_v11  ;;  %6491 = vmatprep.subr.bf16.mxu1 %v9775_v29  ;;  %v10244_v11 = vld [vmem:[#allocation115_spill] sm:$0xff]  ;;  %v6598_v29 = vpack.c.bf16 %v3926_v45, %v3923_v57  ;;  %v3950_v57 = vld [vmem:[#allocation15 + $0x268] sm:$0xff] }
 0x980   :  { %6429 = vmatpush1.bf16.msra.mxu0 %v9692_v62  ;;  %6493 = vmatpush1.bf16.msra.mxu1 %v9776_v49  ;;  %v10257_v62 = vld [vmem:[#allocation148_spill] sm:$0xff]  ;;  %v3873_v49 = vld [vmem:[#allocation15] sm:$0xff] }
 0x981   :  { %6431 = vmatprep.subr.bf16.mxu0 %v9694_v63  ;;  %6495 = vmatprep.subr.bf16.mxu1 %v9777_v14  ;;  %v10259_v63 = vld [vmem:[#allocation149_spill] sm:$0xff]  ;;  %v3876_v14 = vld [vmem:[#allocation15 + $0x18] sm:$0xff] }
 0x982   :  { %v6536_v9 = vpack.c.bf16 %v3876_v14, %v3873_v49  ;;  %v3902_v49 = vld [vmem:[#allocation15 + $0xe8] sm:$0xff]  ;;  %v3904_v14 = vld [vmem:[#allocation15 + $0xf8] sm:$0xff] }
 0x984   :  { %6433 = vmatpush1.bf16.msra.mxu0 %v9695_v24  ;;  %6497 = vmatpush1.bf16.msra.mxu1 %v9778_v6  ;;  %v10261_v24 = vld [vmem:[#allocation150_spill] sm:$0xff]  ;;  %v3875_v6 = vld [vmem:[#allocation15 + $0x10] sm:$0xff] }
 0x985   :  { %6435 = vmatprep.subr.bf16.mxu0 %v9696_v31  ;;  %6499 = vmatprep.subr.bf16.mxu1 %v9779_v56  ;;  %v3877_v31 = vld [vmem:[#allocation15 + $0x20] sm:$0xff]  ;;  %v3878_v56 = vld [vmem:[#allocation15 + $0x28] sm:$0xff] }
 0x986   :  { %v6534_v43 = vpack.c.bf16 %v3877_v31, %v3874_v26  ;;  %v6600_v55 = vpack.c.bf16 %v3878_v56, %v3875_v6  ;;  %v3901_v26 = vld [vmem:[#allocation15 + $0xe0] sm:$0xff]  ;;  %v3947_v31 = vld [vmem:[#allocation15 + $0x250] sm:$0xff] }
 0x987   :  { %v3907_v6 = vld [vmem:[#allocation15 + $0x110] sm:$0xff]  ;;  %v3953_v56 = vld [vmem:[#allocation15 + $0x280] sm:$0xff] }
 0x988   :  { %6437 = vmatpush1.bf16.msra.mxu0 %v9697_v32  ;;  %6501 = vmatpush1.bf16.msra.mxu1 %v9780_v51  ;;  %v10245_v32 = vld [vmem:[#allocation142_spill] sm:$0xff] }
 0x989   :  { %6439 = vmatprep.subr.bf16.mxu0 %v9698_v48  ;;  %6503 = vmatprep.subr.bf16.mxu1 %v9781_v22  ;;  %v10247_v48 = vld [vmem:[#allocation143_spill] sm:$0xff]  ;;  %v3880_v51 = vld [vmem:[#allocation15 + $0x38] sm:$0xff]  ;;  %v3883_v22 = vld [vmem:[#allocation15 + $0x50] sm:$0xff] }
 0x98a   :  { %v6538_v41 = vpack.c.bf16 %v3883_v22, %v3880_v51  ;;  %v3956_v51 = vld [vmem:[#allocation15 + $0x298] sm:$0xff] }
 0x98c   :  { %6441 = vmatpush1.bf16.msra.mxu0 %v9699_v27  ;;  %6505 = vmatpush1.bf16.msra.mxu1 %v9782_v7  ;;  %v10258_v27 = vld [vmem:[#allocation129_spill] sm:$0xff]  ;;  %v3929_v7 = vld [vmem:[#allocation15 + $0x1c0] sm:$0xff] }
 0x98d   :  { %6443 = vmatprep.subr.bf16.mxu0 %v9700_v40  ;;  %6507 = vmatprep.subr.bf16.mxu1 %v9783_v12  ;;  %v10251_v40 = vld [vmem:[#allocation145_spill] sm:$0xff]  ;;  %v3932_v12 = vld [vmem:[#allocation15 + $0x1d8] sm:$0xff] }
 0x98e   :  { %v6602_v5 = vpack.c.bf16 %v3932_v12, %v3929_v7  ;;  %v6554_v12 = vpack.c.bf16 %v3907_v6, %v3904_v14  ;;  %v3933_v6 = vld [vmem:[#allocation15 + $0x1e0] sm:$0xff] }
 0x990   :  { %6445 = vmatpush1.bf16.msra.mxu0 %v9701_v13  ;;  %6509 = vmatpush1.bf16.msra.mxu1 %v10243_v53  ;;  %v10253_v13 = vld [vmem:[#allocation146_spill] sm:$0xff]  ;;  %v6542_v53 = vpack.c.bf16 %v3889_v42, %v3886_v52  ;;  %v6558_v42 = vpack.c.bf16 %v3913_v16, %v3910_v20  ;;  %v3949_v20 = vld [vmem:[#allocation15 + $0x260] sm:$0xff] }
 0x991   :  { %6447 = vmatprep.subr.bf16.mxu0 %v10244_v11  ;;  %6511 = vmatprep.subr.bf16.mxu1 %v10245_v32  ;;  %v3885_v11 = vld [vmem:[#allocation15 + $0x60] sm:$0xff]  ;;  %v3888_v32 = vld [vmem:[#allocation15 + $0x78] sm:$0xff] }
 0x992   :  { %v10273_v16 = vld [vmem:[#allocation82_spill] sm:$0xff] }
 0x994   :  { %6449 = vmatpush1.bf16.msra.mxu0 %v10246_v54  ;;  %6513 = vmatpush1.bf16.msra.mxu1 %v10247_v48  ;;  %v3887_v54 = vld [vmem:[#allocation15 + $0x70] sm:$0xff]  ;;  %v6606_v48 = vpack.c.bf16 %v3938_v18, %v3935_v37  ;;  %v3909_v37 = vld [vmem:[#allocation15 + $0x120] sm:$0xff]  ;;  %v3912_v18 = vld [vmem:[#allocation15 + $0x138] sm:$0xff] }
 0x995   :  { %6451 = vmatprep.subr.bf16.mxu0 %v10248_v38  ;;  %6515 = vmatprep.subr.bf16.mxu1 %v10249_v3  ;;  %v3890_v38 = vld [vmem:[#allocation15 + $0x88] sm:$0xff]  ;;  %v3892_v3 = vld [vmem:[#allocation15 + $0x98] sm:$0xff] }
 0x998   :  { %6453 = vmatpush1.bf16.msra.mxu0 %v10250_v50  ;;  %6517 = vmatpush1.bf16.msra.mxu1 %v10251_v40  ;;  %v3895_v50 = vld [vmem:[#allocation15 + $0xb0] sm:$0xff]  ;;  %v3941_v40 = vld [vmem:[#allocation15 + $0x220] sm:$0xff] }
 0x999   :  { %6455 = vmatprep.subr.bf16.mxu0 %v10252_v44  ;;  %6519 = vmatprep.subr.bf16.mxu1 %v10253_v13  ;;  %v3944_v44 = vld [vmem:[#allocation15 + $0x238] sm:$0xff]  ;;  %v6544_v13 = vpack.c.bf16 %v3888_v32, %v3885_v11  ;;  %v3919_v11 = vld [vmem:[#allocation15 + $0x170] sm:$0xff]  ;;  %v3965_v32 = vld [vmem:[#allocation15 + $0x2e0] sm:$0xff] }
 0x99c   :  { %6457 = vmatpush1.bf16.msra.mxu0 %v10254_v25  ;;  %6521 = vmatpush1.bf16.msra.mxu1 %v10255_v36  ;;  %v6608_v25 = vpack.c.bf16 %v3890_v38, %v3887_v54  ;;  %v6546_v36 = vpack.c.bf16 %v3895_v50, %v3892_v3  ;;  %v3968_v54 = vld [vmem:[#allocation15 + $0x2f8] sm:$0xff]  ;;  %v3915_v50 = vld [vmem:[#allocation15 + $0x150] sm:$0xff] }
 0x99d   :  { %6459 = vmatprep.subr.bf16.mxu0 %v10256_v8  ;;  %6523 = vmatprep.subr.bf16.mxu1 %v10257_v62  ;;  %v3891_v8 = vld [vmem:[#allocation15 + $0x90] sm:$0xff]  ;;  %v3894_v62 = vld [vmem:[#allocation15 + $0xa8] sm:$0xff] }
 0x99e   :  { %v6548_v45 = vpack.c.bf16 %v3894_v62, %v3891_v8  ;;  %v3925_v8 = vld [vmem:[#allocation15 + $0x1a0] sm:$0xff] }
 0x9a0   :  { %6461 = vmatpush1.bf16.msra.mxu0 %v10258_v27  ;;  %6525 = vmatpush1.bf16.msra.mxu1 %v10259_v63  ;;  %v3893_v27 = vld [vmem:[#allocation15 + $0xa0] sm:$0xff]  ;;  %v6610_v63 = vpack.c.bf16 %v3944_v44, %v3941_v40  ;;  %v3918_v40 = vld [vmem:[#allocation15 + $0x168] sm:$0xff] }
 0x9a1   :  { %6463 = vmatprep.subr.bf16.mxu0 %v10260_v15  ;;  %6527 = vmatprep.subr.bf16.mxu1 %v10261_v24  ;;  %v3896_v15 = vld [vmem:[#allocation15 + $0xb8] sm:$0xff]  ;;  %v3898_v24 = vld [vmem:[#allocation15 + $0xc8] sm:$0xff]  ;;  %v3917_v44 = vld [vmem:[#allocation15 + $0x160] sm:$0xff]  ;;  %v6564_v62 = vpack.c.bf16 %v3918_v40, %v3915_v50 }
 0x9a2   :  { %v10278_v50 = vld [vmem:[#allocation90_spill] sm:$0xff] }
 0x9a4   :  { %6465 = vmatpush1.bf16.msra.mxu0 %v10262_v17  ;;  %6529 = vmatpush1.bf16.msra.mxu1 %v10263_v46  ;;  %v6612_v17 = vpack.c.bf16 %v3896_v15, %v3893_v27  ;;  %v6550_v46 = vpack.c.bf16 %v3901_v26, %v3898_v24  ;;  %v3921_v15 = vld [vmem:[#allocation15 + $0x180] sm:$0xff]  ;;  %v3924_v24 = vld [vmem:[#allocation15 + $0x198] sm:$0xff] }
 0x9a5   :  { %6467 = vmatprep.subr.bf16.mxu0 %v10264_v21  ;;  %6531 = vmatprep.subr.bf16.mxu1 %v10265_v28  ;;  %v3897_v21 = vld [vmem:[#allocation15 + $0xc0] sm:$0xff]  ;;  %v3900_v28 = vld [vmem:[#allocation15 + $0xd8] sm:$0xff] }
 0x9a6   :  { %v6552_v22 = vpack.c.bf16 %v3900_v28, %v3897_v21  ;;  %v3928_v26 = vld [vmem:[#allocation15 + $0x1b8] sm:$0xff]  ;;  %v3934_v21 = vld [vmem:[#allocation15 + $0x1e8] sm:$0xff]  ;;  %v3937_v28 = vld [vmem:[#allocation15 + $0x200] sm:$0xff] }
 0x9a7   :  { %v6574_v14 = vpack.c.bf16 %v3937_v28, %v3934_v21 }
 0x9a8   :  { %6469 = vmatpush1.bf16.msra.mxu0 %v10266_v1  ;;  %6533 = vmatpush1.bf16.msra.mxu1 %v10267_v30  ;;  %v3903_v1 = vld [vmem:[#allocation15 + $0xf0] sm:$0xff]  ;;  %v3906_v30 = vld [vmem:[#allocation15 + $0x108] sm:$0xff] }
 0x9a9   :  { %6535 = vmatprep.subr.bf16.mxu0 %v6534_v43  ;;  %6599 = vmatprep.subr.bf16.mxu1 %v6598_v29  ;;  %v3899_v43 = vld [vmem:[#allocation15 + $0xd0] sm:$0xff]  ;;  %v6614_v29 = vpack.c.bf16 %v3950_v57, %v3947_v31  ;;  %v6556_v60 = vpack.c.bf16 %v3906_v30, %v3903_v1  ;;  %v6568_v57 = vpack.c.bf16 %v3924_v24, %v3921_v15  ;;  %v10272_v1 = vld [vmem:[#allocation80_spill] sm:$0xff] }
 0x9aa   :  { %v6616_v7 = vpack.c.bf16 %v3902_v49, %v3899_v43  ;;  %v3931_v31 = vld [vmem:[#allocation15 + $0x1d0] sm:$0xff]  ;;  %v10269_v43 = vld [vmem:[#allocation171_spill] sm:$0xff]  ;;  %v10270_v49 = vld [vmem:[#allocation78_spill] sm:$0xff] }
 0x9ab   :  { %3717 = vmatmul.mubr.f32.vlgmr.msra.gmra.mrb[22].mxu0 %v8990_v61  ;;  %3788 = vmatmul.mubr.f32.vlgmr.msra.gmra.mrb[38].mxu1 %v8990_v61  ;;  %v3966_v15 = vld [vmem:[#allocation15 + $0x2e8] sm:$0xff] }
 0x9ac   :  { %6537 = vmatpush1.bf16.msra.mxu0 %v6536_v9  ;;  %4050 = vmatprep.mubr.f32.mxu0 %v10268_v39  ;;  %v3905_v9 = vld [vmem:[#allocation15 + $0x100] sm:$0xff] }
 0x9ad   :  { %6601 = vmatpush3.bf16.msra.mxu1 %v6600_v55  ;;  %4163 = vmatprep.mubr.f32.mxu1 %v10268_v39  ;;  %v6618_v55 = vpack.c.bf16 %v3956_v51, %v3953_v56  ;;  %v6620_v52 = vpack.c.bf16 %v3908_v10, %v3905_v9  ;;  %v3911_v39 = vld [vmem:[#allocation15 + $0x130] sm:$0xff]  ;;  %v3936_v56 = vld [vmem:[#allocation15 + $0x1f8] sm:$0xff]  ;;  %v3946_v10 = vld [vmem:[#allocation15 + $0x248] sm:$0xff] }
 0x9ae   :  { %6539 = vmatprep.subr.bf16.mxu0 %v6538_v41  ;;  %6603 = vmatprep.subr.bf16.mxu1 %v6602_v5  ;;  %v3959_v41 = vld [vmem:[#allocation15 + $0x2b0] sm:$0xff]  ;;  %v3962_v5 = vld [vmem:[#allocation15 + $0x2c8] sm:$0xff]  ;;  %v3940_v51 = vld [vmem:[#allocation15 + $0x218] sm:$0xff] }
 0x9af   :  { %v3939_v9 = vld [vmem:[#allocation15 + $0x210] sm:$0xff] }
 0x9b0   :  { %6541 = vmatpush1.bf16.msra.mxu0 %v6540_v58  ;;  %v6622_v58 = vpack.c.bf16 %v3962_v5, %v3959_v41  ;;  %v10274_v5 = vld [vmem:[#allocation112_spill] sm:$0xff] }
 0x9b1   :  { %6605 = vmatpush3.bf16.msra.mxu1 %v6604_v33  ;;  %6543 = vmatprep.subr.bf16.mxu0 %v6542_v53  ;;  %v3914_v33 = vld [vmem:[#allocation15 + $0x148] sm:$0xff]  ;;  %v3916_v53 = vld [vmem:[#allocation15 + $0x158] sm:$0xff] }
 0x9b2   :  { %6607 = vmatprep.subr.bf16.mxu1 %v6606_v48  ;;  %v6560_v48 = vpack.c.bf16 %v3912_v18, %v3909_v37  ;;  %v6624_v38 = vpack.c.bf16 %v3914_v33, %v3911_v39  ;;  %v6562_v3 = vpack.c.bf16 %v3919_v11, %v3916_v53  ;;  %v3952_v37 = vld [vmem:[#allocation15 + $0x278] sm:$0xff]  ;;  %v3955_v18 = vld [vmem:[#allocation15 + $0x290] sm:$0xff]  ;;  %v10275_v39 = vld [vmem:[#allocation84_spill] sm:$0xff] }
 0x9b3   :  { %v10276_v33 = vld [vmem:[#allocation114_spill] sm:$0xff]  ;;  %v6586_v53 = vpack.c.bf16 %v3955_v18, %v3952_v37  ;;  %v3951_v11 = vld [vmem:[#allocation15 + $0x270] sm:$0xff] }
 0x9b4   :  { %6545 = vmatpush1.bf16.msra.mxu0 %v6544_v13  ;;  %v6626_v13 = vpack.c.bf16 %v3968_v54, %v3965_v32  ;;  %v3954_v32 = vld [vmem:[#allocation15 + $0x288] sm:$0xff] }
 0x9b5   :  { %6609 = vmatpush3.bf16.msra.mxu1 %v6608_v25  ;;  %6547 = vmatprep.subr.bf16.mxu0 %v6546_v36  ;;  %v3920_v25 = vld [vmem:[#allocation15 + $0x178] sm:$0xff]  ;;  %v3922_v36 = vld [vmem:[#allocation15 + $0x188] sm:$0xff] }
 0x9b6   :  { %6611 = vmatprep.subr.bf16.mxu1 %v6610_v63  ;;  %v6628_v27 = vpack.c.bf16 %v3920_v25, %v3917_v44  ;;  %v6566_v63 = vpack.c.bf16 %v3925_v8, %v3922_v36  ;;  %v3958_v54 = vld [vmem:[#allocation15 + $0x2a8] sm:$0xff]  ;;  %v3957_v44 = vld [vmem:[#allocation15 + $0x2a0] sm:$0xff]  ;;  %v3964_v25 = vld [vmem:[#allocation15 + $0x2d8] sm:$0xff] }
 0x9b7   :  { %v3967_v36 = vld [vmem:[#allocation15 + $0x2f0] sm:$0xff]  ;;  %v10279_v8 = vld [vmem:[#allocation92_spill] sm:$0xff] }
 0x9b8   :  { %6549 = vmatpush1.bf16.msra.mxu0 %v6548_v45  ;;  %v6570_v45 = vpack.c.bf16 %v3931_v31, %v3928_v26  ;;  %v10280_v26 = vld [vmem:[#allocation163_spill] sm:$0xff]  ;;  %v10281_v31 = vld [vmem:[#allocation160_spill] sm:$0xff] }
 0x9b9   :  { %6613 = vmatpush3.bf16.msra.mxu1 %v6612_v17  ;;  %6551 = vmatprep.subr.bf16.mxu0 %v6550_v46  ;;  %v3927_v17 = vld [vmem:[#allocation15 + $0x1b0] sm:$0xff]  ;;  %v3930_v46 = vld [vmem:[#allocation15 + $0x1c8] sm:$0xff] }
 0x9ba   :  { %6615 = vmatprep.subr.bf16.mxu1 %v6614_v29  ;;  %v6572_v29 = vpack.c.bf16 %v3930_v46, %v3927_v17  ;;  %v10283_v17 = vld [vmem:[#allocation161_spill] sm:$0xff] }
 0x9bc   :  { %6553 = vmatpush1.bf16.msra.mxu0 %v6552_v22  ;;  %v3943_v22 = vld [vmem:[#allocation15 + $0x230] sm:$0xff] }
 0x9bd   :  { %6617 = vmatpush3.bf16.msra.mxu1 %v6616_v7  ;;  %6555 = vmatprep.subr.bf16.mxu0 %v6554_v12  ;;  %v10271_v7 = vld [vmem:[#allocation109_spill] sm:$0xff]  ;;  %v6576_v12 = vpack.c.bf16 %v3936_v56, %v3933_v6  ;;  %v6578_v30 = vpack.c.bf16 %v3943_v22, %v3940_v51 }
 0x9be   :  { %6619 = vmatprep.subr.bf16.mxu1 %v6618_v55  ;;  %v3942_v55 = vld [vmem:[#allocation15 + $0x228] sm:$0xff] }
 0x9bf   :  { %v6580_v41 = vpack.c.bf16 %v3942_v55, %v3939_v9 }
 0x9c0   :  { %6557 = vmatpush1.bf16.msra.mxu0 %v6556_v60  ;;  %v6582_v60 = vpack.c.bf16 %v3949_v20, %v3946_v10 }
 0x9c1   :  { %6621 = vmatpush3.bf16.msra.mxu1 %v6620_v52  ;;  %6559 = vmatprep.subr.bf16.mxu0 %v6558_v42  ;;  %v3945_v52 = vld [vmem:[#allocation15 + $0x240] sm:$0xff]  ;;  %v3948_v42 = vld [vmem:[#allocation15 + $0x258] sm:$0xff] }
 0x9c2   :  { %6623 = vmatprep.subr.bf16.mxu1 %v6622_v58  ;;  %v6584_v58 = vpack.c.bf16 %v3948_v42, %v3945_v52 }
 0x9c4   :  { %6561 = vmatpush1.bf16.msra.mxu0 %v6560_v48  ;;  %v3961_v48 = vld [vmem:[#allocation15 + $0x2c0] sm:$0xff] }
 0x9c5   :  { %6625 = vmatpush3.bf16.msra.mxu1 %v6624_v38  ;;  %6563 = vmatprep.subr.bf16.mxu0 %v6562_v3  ;;  %v10277_v38 = vld [vmem:[#allocation86_spill] sm:$0xff]  ;;  %v6588_v3 = vpack.c.bf16 %v3954_v32, %v3951_v11  ;;  %v6590_v40 = vpack.c.bf16 %v3961_v48, %v3958_v54 }
 0x9c6   :  { %6627 = vmatprep.subr.bf16.mxu1 %v6626_v13  ;;  %v3960_v13 = vld [vmem:[#allocation15 + $0x2b8] sm:$0xff] }
 0x9c8   :  { %6565 = vmatpush1.bf16.msra.mxu0 %v6564_v62  ;;  %v6592_v62 = vpack.c.bf16 %v3960_v13, %v3957_v44 }
 0x9c9   :  { %6629 = vmatpush3.bf16.msra.mxu1 %v6628_v27  ;;  %6567 = vmatprep.subr.bf16.mxu0 %v6566_v63  ;;  %v6594_v27 = vpack.c.bf16 %v3967_v36, %v3964_v25  ;;  %v3963_v63 = vld [vmem:[#allocation15 + $0x2d0] sm:$0xff] }
 0x9ca   :  { %v6596_v24 = vpack.c.bf16 %v3966_v15, %v3963_v63 }
 0x9cc   :  { %4164 = vmatmul.mubr.f32.vlgmr.msra.gmra.mrb[40].mxu1 %v10269_v43  ;;  %6569 = vmatpush1.bf16.msra.mxu0 %v6568_v57  ;;  %v372_v57 = vadd.f32 %v10281_v31, %v10280_v26 }
 0x9cd   :  { %4168 = vmatprep.mubr.f32.mxu1 %v10270_v49  ;;  %6571 = vmatprep.subr.bf16.mxu0 %v6570_v45  ;;  %v10282_v45 = vld [vmem:[#allocation165_spill] sm:$0xff] }
 0x9ce   :  { %v374_v46 = vadd.f32 %v10283_v17, %v10282_v45 }
 0x9d0   :  { %4169 = vmatmul.mubr.f32.gmra.mrb[42].mxu1 %v10271_v7  ;;  %6573 = vmatpush1.bf16.msra.mxu0 %v6572_v29 }
 0x9d1   :  { %4173 = vmatprep.mubr.f32.mxu1 %v10272_v1  ;;  %6575 = vmatprep.subr.bf16.mxu0 %v6574_v14 }
 0x9d4   :  { %4174 = vmatmul.mubr.f32.gmra.mrb[44].mxu1 %v10273_v16  ;;  %6577 = vmatpush1.bf16.msra.mxu0 %v6576_v12 }
 0x9d5   :  { %4178 = vmatprep.mubr.f32.mxu1 %v10274_v5  ;;  %6579 = vmatprep.subr.bf16.mxu0 %v6578_v30 }
 0x9d8   :  { %4179 = vmatmul.mubr.f32.gmra.mrb[46].mxu1 %v10275_v39  ;;  %6581 = vmatpush1.bf16.msra.mxu0 %v6580_v41 }
 0x9d9   :  { %4183 = vmatprep.mubr.f32.mxu1 %v10276_v33  ;;  %6583 = vmatprep.subr.bf16.mxu0 %v6582_v60 }
 0x9dc   :  { %4184 = vmatmul.mubr.f32.gmra.mrb[48].mxu1 %v10277_v38  ;;  %6585 = vmatpush1.bf16.msra.mxu0 %v6584_v58 }
 0x9dd   :  { %4188 = vmatprep.mubr.f32.mxu1 %v10278_v50  ;;  %6587 = vmatprep.subr.bf16.mxu0 %v6586_v53 }
 0x9e0   :  { %4189 = vmatmul.mubr.f32.gmra.mrb[50].mxu1 %v10279_v8  ;;  %6589 = vmatpush1.bf16.msra.mxu0 %v6588_v3 }
 0x9e1   :  { %4193 = vmatprep.mubr.f32.mxu1 %v8988_v2  ;;  %6591 = vmatprep.subr.bf16.mxu0 %v6590_v40 }
 0x9e4   :  { %4194 = vmatmul.mubr.f32.gmra.mrb[52].mxu1 %v8990_v61  ;;  %6593 = vmatpush1.bf16.msra.mxu0 %v6592_v62 }
 0x9e5   :  { %6595 = vmatprep.subr.bf16.mxu0 %v6594_v27  ;;  %v10284_v27 = vld [vmem:[#allocation162_spill] sm:$0xff] }
 0x9e6   :  { %v10285_v63 = vsub.s32 2, %v10284_v27 }
 0x9e8   :  { %6597 = vmatpush1.bf16.msra.mxu0 %v6596_v24 }
 0x9eb   :  { %4051 = vmatmul.mubr.f32.vlgmr.msra.gmra.mrb[32].mxu0 %v10269_v43 }
 0x9ec   :  { %4056 = vmatprep.mubr.f32.mxu0 %v10270_v49 }
 0x9ef   :  { %4057 = vmatmul.mubr.f32.gmra.mrb[34].mxu0 %v10271_v7 }
 0x9f0   :  { %4062 = vmatprep.mubr.f32.mxu0 %v10272_v1 }
 0x9f3   :  { %4063 = vmatmul.mubr.f32.gmra.mrb[36].mxu0 %v10273_v16 }
 0x9f4   :  { %4068 = vmatprep.mubr.f32.mxu0 %v10274_v5 }
 0x9f7   :  { %4069 = vmatmul.mubr.f32.gmra.mrb[38].mxu0 %v10275_v39 }
 0x9f8   :  { %4074 = vmatprep.mubr.f32.mxu0 %v10276_v33 }
 0x9fb   :  { %4075 = vmatmul.mubr.f32.gmra.mrb[40].mxu0 %v10277_v38 }
 0x9fc   :  { %4080 = vmatprep.mubr.f32.mxu0 %v10278_v50 }
 0x9ff   :  { %4081 = vmatmul.mubr.f32.gmra.mrb[42].mxu0 %v10279_v8 }
 0xa00   :  { %4086 = vmatprep.mubr.f32.mxu0 %v8988_v2 }
 0xa03   :  { %4087 = vmatmul.mubr.f32.gmra.mrb[44].mxu0 %v8990_v61 }
 0xa3e   :  { %v3576_v21 = vpop.f32.mrb[30].mxu0  ;;  %v3647_v28 = vpop.f32.mrb[22].mxu1 }
 0xa3f   :  { %v3794_v43 = vadd.f32 %v3576_v21, %v372_v57  ;;  %v3578_v29 = vpop.f32.mrb[31].mxu0  ;;  %v3649_v49 = vpop.f32.mrb[23].mxu1  ;;  %v6676_v6 = vadd.f32 %v3647_v28, %v9762_v35 }
 0xa40   :  { %v3795_v14 = vadd.f32 %v3578_v29, %v374_v46  ;;  %v6677_v56 = vadd.f32 %v3649_v49, %v9764_v23 }
 0xa41   :  { %v4360_v51 = vmul.f32 -1.442695, %v3794_v43  ;;  %v4362_v2 = vmul.f32 -1.442695, %v6676_v6 }
 0xa42   :  { %v4361_v22 = vmul.f32 -1.442695, %v3795_v14  ;;  %v4363_v61 = vmul.f32 -1.442695, %v6677_v56 }
 0xa43   :  { %7006 = vpow2.f32 %v4360_v51 }
 0xa44   :  { %7008 = vpow2.f32 %v4362_v2 }
 0xa45   :  { %7010 = vpow2.f32 %v4361_v22 }
 0xa46   :  { %7012 = vpow2.f32 %v4363_v61 }
 0xa4d   :  { %v7007_v7 = vpop.eup %7006 }
 0xa4e   :  { %v7009_v12 = vpop.eup %7008  ;;  %v3808_v9 = vadd.f32 1.0, %v7007_v7 }
 0xa4f   :  { %v7011_v1 = vpop.eup %7010  ;;  %v3820_v55 = vadd.f32 1.0, %v7009_v12 }
 0xa50   :  { %v7013_v30 = vpop.eup %7012  ;;  %v3809_v10 = vadd.f32 1.0, %v7011_v1  ;;  %7014 = vrcp.f32 %v3808_v9 }
 0xa51   :  { %v3821_v20 = vadd.f32 1.0, %v7013_v30  ;;  %7016 = vrcp.f32 %v3820_v55 }
 0xa52   :  { %7018 = vrcp.f32 %v3809_v10 }
 0xa53   :  { %7020 = vrcp.f32 %v3821_v20 }
 0xa5a   :  { %v7015_v39 = vpop.eup %7014 }
 0xa5b   :  { %v7017_v58 = vpop.eup %7016 }
 0xa5c   :  { %v7019_v33 = vpop.eup %7018 }
 0xa5d   :  { %v7021_v53 = vpop.eup %7020 }
 0xa7e   :  { %v3718_v35 = vpop.f32.mrb[22].mxu0  ;;  %v3789_v23 = vpop.f32.mrb[38].mxu1 }
 0xa7f   :  { %v6692_v16 = vadd.f32 %v3718_v35, %v9765_v59  ;;  %v6708_v41 = vadd.f32 %v3789_v23, %v10049_v47  ;;  %v3720_v5 = vpop.f32.mrb[23].mxu0  ;;  %v3791_v60 = vpop.f32.mrb[39].mxu1  ;;  %v3840_v47 = vmul.f32 %v7017_v58, %v8982_v4  ;;  %v3969_v4 = vld [vmem:[%s9187_s7] sm:$0x7]  ;;  %v10286_v35 = vsub.s32 0, %v10284_v27  ;;  %s7261_s7 = smov [#allocation18]  }
 0xa80   :  { %v6693_v52 = vadd.f32 %v3720_v5, %v10146_v34  ;;  %v6709_v42 = vadd.f32 %v3791_v60, %v8040_v19  ;;  %v3841_v34 = vmul.f32 %v7021_v53, %v8984_v0  ;;  %v9107_v15 = vrot.slane %v3969_v4, %v10285_v63  ;;  %s4257_s27 = sshll.u32 %s7261_s7, 4  ;;  %s4258_s27 = int_to_ptr.vmem [resolvable:$true] %s4257_s27 }
 0xa81   :  { %7022 = vtanh.f32 %v6692_v16  ;;  %v4364_v37 = vmul.f32 -1.442695, %v6708_v41  ;;  %v9118_v23 = vrot.slane %v3969_v4, %v10286_v35  ;;  %v10287_v16 = vsub.s32 1, %v10284_v27  ;;  %s7170_s28 = scalar_lea.vmem %s4258_s27, 256  ;;  %p7175_p7 = scmp.lt.s32.totalorder %s4258_s27, %s4258_s27 }
 0xa82   :  { %7024 = vtanh.f32 %v6693_v52  ;;  %v4365_v18 = vmul.f32 -1.442695, %v6709_v42  ;;  %p7171_p6 = scmp.ne.s32.totalorder %s4258_s27, %s7170_s28  ;;  %p7176_p8 = scmp.lt.s32.totalorder %s7170_s28, %s7170_s28 }
 0xa83   :  { %7026 = vpow2.f32 %v4364_v37  ;;  %v9122_v41 = vrot.slane %v3969_v4, %v10287_v16 }
 0xa84   :  { %7028 = vpow2.f32 %v4365_v18  ;;  %p7177_p9 = por %p7176_p8, %p7175_p7 }
 0xa86   :  { %p7178_p10 = pnand %p7177_p9, %p7171_p6 }
 0xa8b   :  { %v7023_v59 = vpop.eup %7022 }
 0xa8c   :  { %v7025_v11 = vpop.eup %7024  ;;  %v3842_v32 = vmul.f32 %v7023_v59, %v7015_v39 }
 0xa8d   :  { %v7027_v54 = vpop.eup %7026  ;;  %v3843_v48 = vmul.f32 %v7025_v11, %v7019_v33 }
 0xa8e   :  { %v7029_v19 = vpop.eup %7028  ;;  %v3844_v38 = vadd.f32 %v3842_v32, %v3840_v47  ;;  %v3834_v3 = vadd.f32 1.0, %v7027_v54 }
 0xa8f   :  { %v3845_v50 = vadd.f32 %v3843_v48, %v3841_v34  ;;  %v3835_v40 = vadd.f32 1.0, %v7029_v19 }
 0xa90   :  { %4237 = vst [vmem:[#allocation20] sm:$0xff] %v3844_v38  ;;  %7030 = vrcp.f32 %v3834_v3 }
 0xa91   :  { %4238 = vst [vmem:[#allocation20 + $0x8] sm:$0xff] %v3845_v50  ;;  %7032 = vrcp.f32 %v3835_v40 }
 0xa92   :  { %7034 = vtanh.f32 %v3845_v50 }
 0xa93   :  { %7036 = vtanh.f32 %v3844_v38 }
 0xa9a   :  { %v7031_v44 = vpop.eup %7030 }
 0xa9b   :  { %v7033_v13 = vpop.eup %7032 }
 0xa9c   :  { %v7035_v25 = vpop.eup %7034 }
 0xa9d   :  { %v7037_v0 = vpop.eup %7036  ;;  %v3849_v36 = vmul.f32 %v7035_v25, %v7033_v13 }
 0xa9e   :  { %v3848_v8 = vmul.f32 %v7037_v0, %v7031_v44 }
 0xa9f   :  { %4092 = vmatprep.mubr.f32.mxu0 %v3849_v36  ;;  %4234 = vst [vmem:[#allocation18 + $0x8] sm:$0xff] %v3849_v36  ;;  %v4398_v62 = vpop.f32.mrb[40].mxu1  ;;  %4198 = vmatprep.mubr.f32.mxu1 %v3849_v36 }
 0xaa0   :  { %4093 = vmatmul.mubr.f32.gmra.mrb[46].mxu0 %v3848_v8  ;;  %4233 = vst [vmem:[#allocation18] sm:$0xff] %v3848_v8  ;;  %v4399_v24 = vpop.f32.mrb[41].mxu1  ;;  %4199 = vmatmul.mubr.f32.gmra.mrb[54].mxu1 %v3848_v8 }
 0xaa1   :  { %v4400_v26 = vadd.f32 %v4399_v24, %v4398_v62 }
 0xaa3   :  { %v4166_v31 = vadd.f32 %v4400_v26, %v9107_v15  ;;  %v4401_v57 = vpop.f32.mrb[42].mxu1 }
 0xaa4   :  { %v4402_v45 = vpop.f32.mrb[43].mxu1 }
 0xaa5   :  { %4206 = vst [vmem:[#allocation17 + $0x10] sm:$0xff] %v4166_v31  ;;  %v4403_v17 = vadd.f32 %v4402_v45, %v4401_v57 }
 0xaa7   :  { %v4171_v46 = vadd.f32 %v4403_v17, %v9107_v15  ;;  %v4404_v21 = vpop.f32.mrb[44].mxu1 }
 0xaa8   :  { %v4405_v28 = vpop.f32.mrb[45].mxu1 }
 0xaa9   :  { %4209 = vst [vmem:[#allocation17 + $0x28] sm:$0xff] %v4171_v46  ;;  %v4406_v43 = vadd.f32 %v4405_v28, %v4404_v21 }
 0xaab   :  { %v4176_v29 = vadd.f32 %v4406_v43, %v9107_v15  ;;  %v4407_v49 = vpop.f32.mrb[46].mxu1 }
 0xaac   :  { %v4408_v14 = vpop.f32.mrb[47].mxu1 }
 0xaad   :  { %4212 = vst [vmem:[#allocation17 + $0x40] sm:$0xff] %v4176_v29  ;;  %v4409_v6 = vadd.f32 %v4408_v14, %v4407_v49 }
 0xaaf   :  { %v4181_v56 = vadd.f32 %v4409_v6, %v9107_v15  ;;  %v4410_v51 = vpop.f32.mrb[48].mxu1 }
 0xab0   :  { %v4411_v2 = vpop.f32.mrb[49].mxu1 }
 0xab1   :  { %4215 = vst [vmem:[#allocation17 + $0x58] sm:$0xff] %v4181_v56  ;;  %v4412_v22 = vadd.f32 %v4411_v2, %v4410_v51 }
 0xab3   :  { %v4186_v61 = vadd.f32 %v4412_v22, %v9107_v15  ;;  %v4413_v7 = vpop.f32.mrb[50].mxu1 }
 0xab4   :  { %v4414_v12 = vpop.f32.mrb[51].mxu1 }
 0xab5   :  { %4218 = vst [vmem:[#allocation17 + $0x70] sm:$0xff] %v4186_v61  ;;  %v4415_v1 = vadd.f32 %v4414_v12, %v4413_v7 }
 0xab7   :  { %v4191_v30 = vadd.f32 %v4415_v1, %v9107_v15  ;;  %v4416_v9 = vpop.f32.mrb[52].mxu1 }
 0xab8   :  { %v4417_v55 = vpop.f32.mrb[53].mxu1 }
 0xab9   :  { %4221 = vst [vmem:[#allocation17 + $0x88] sm:$0xff] %v4191_v30  ;;  %v4418_v10 = vadd.f32 %v4417_v55, %v4416_v9 }
 0xabb   :  { %v4196_v20 = vadd.f32 %v4418_v10, %v9107_v15 }
 0xabd   :  { %4224 = vst [vmem:[#allocation17 + $0xa0] sm:$0xff] %v4196_v20 }
 0xabe   :  { %v4052_v5 = vpop.f32.mrb[32].mxu0 }
 0xabf   :  { %v4053_v60 = vadd.f32 %v4052_v5, %v9118_v23  ;;  %v4054_v52 = vpop.f32.mrb[33].mxu0 }
 0xac0   :  { %v4055_v42 = vadd.f32 %v4054_v52, %v9122_v41 }
 0xac1   :  { %4204 = vst [vmem:[#allocation17] sm:$0xff] %v4053_v60 }
 0xac2   :  { %4205 = vst [vmem:[#allocation17 + $0x8] sm:$0xff] %v4055_v42  ;;  %v4058_v37 = vpop.f32.mrb[34].mxu0 }
 0xac3   :  { %v4059_v18 = vadd.f32 %v4058_v37, %v9118_v23  ;;  %v4060_v39 = vpop.f32.mrb[35].mxu0 }
 0xac4   :  { %v4061_v58 = vadd.f32 %v4060_v39, %v9122_v41 }
 0xac5   :  { %4207 = vst [vmem:[#allocation17 + $0x18] sm:$0xff] %v4059_v18 }
 0xac6   :  { %4208 = vst [vmem:[#allocation17 + $0x20] sm:$0xff] %v4061_v58  ;;  %v4064_v33 = vpop.f32.mrb[36].mxu0 }
 0xac7   :  { %v4065_v53 = vadd.f32 %v4064_v33, %v9118_v23  ;;  %v4066_v59 = vpop.f32.mrb[37].mxu0 }
 0xac8   :  { %v4067_v11 = vadd.f32 %v4066_v59, %v9122_v41 }
 0xac9   :  { %4210 = vst [vmem:[#allocation17 + $0x30] sm:$0xff] %v4065_v53 }
 0xaca   :  { %4211 = vst [vmem:[#allocation17 + $0x38] sm:$0xff] %v4067_v11  ;;  %v4070_v47 = vpop.f32.mrb[38].mxu0 }
 0xacb   :  { %v4071_v32 = vadd.f32 %v4070_v47, %v9118_v23  ;;  %v4072_v54 = vpop.f32.mrb[39].mxu0 }
 0xacc   :  { %v4073_v34 = vadd.f32 %v4072_v54, %v9122_v41 }
 0xacd   :  { %4213 = vst [vmem:[#allocation17 + $0x48] sm:$0xff] %v4071_v32 }
 0xace   :  { %4214 = vst [vmem:[#allocation17 + $0x50] sm:$0xff] %v4073_v34  ;;  %v4076_v48 = vpop.f32.mrb[40].mxu0 }
 0xacf   :  { %v4077_v19 = vadd.f32 %v4076_v48, %v9118_v23  ;;  %v4078_v38 = vpop.f32.mrb[41].mxu0 }
 0xad0   :  { %v4079_v3 = vadd.f32 %v4078_v38, %v9122_v41 }
 0xad1   :  { %4216 = vst [vmem:[#allocation17 + $0x60] sm:$0xff] %v4077_v19 }
 0xad2   :  { %4217 = vst [vmem:[#allocation17 + $0x68] sm:$0xff] %v4079_v3  ;;  %v4082_v50 = vpop.f32.mrb[42].mxu0 }
 0xad3   :  { %v4083_v40 = vadd.f32 %v4082_v50, %v9118_v23  ;;  %v4084_v44 = vpop.f32.mrb[43].mxu0 }
 0xad4   :  { %v4085_v13 = vadd.f32 %v4084_v44, %v9122_v41 }
 0xad5   :  { %4219 = vst [vmem:[#allocation17 + $0x78] sm:$0xff] %v4083_v40 }
 0xad6   :  { %4220 = vst [vmem:[#allocation17 + $0x80] sm:$0xff] %v4085_v13  ;;  %v4088_v25 = vpop.f32.mrb[44].mxu0 }
 0xad7   :  { %v4089_v4 = vadd.f32 %v4088_v25, %v9118_v23  ;;  %v4090_v0 = vpop.f32.mrb[45].mxu0 }
 0xad8   :  { %v4091_v36 = vadd.f32 %v4090_v0, %v9122_v41 }
 0xad9   :  { %4222 = vst [vmem:[#allocation17 + $0x90] sm:$0xff] %v4089_v4 }
 0xada   :  { %4223 = vst [vmem:[#allocation17 + $0x98] sm:$0xff] %v4091_v36 }
 0xadb   :  { %7181 = shalt.err (!%p7178_p10)
}
 0xadc   :  { %s7182_s29 = scalar_lea.hbm %s9189_s9, 256 }
 0xadd   :  { %p7183_p11 = scmp.ne.s32.totalorder %s9189_s9, %s7182_s29  ;;  %p7186_p12 = scmp.lt.u32.totalorder %s7182_s29, %s9189_s9 }
 0xadf   :  { %p7188_p13 = pnand %p7186_p12, %p7183_p11 }
 0xae1   :  { %7191 = shalt.err (!%p7188_p13)
}
 0xae2   :  { %4260 = dma.vmem_to_hbm [thread:$0]  %s4258_s27, 256, %s9189_s9, [#allocation19]  }
 0xae3   :  { %s7262_s18 = smov [#allocation20]  }
 0xae4   :  { %s4267_s19 = sshll.u32 %s7262_s18, 4  ;;  %s4268_s19 = int_to_ptr.vmem [resolvable:$true] %s4267_s19 }
 0xae5   :  { %s7192_s21 = scalar_lea.vmem %s4268_s19, 256  ;;  %p7197_p1 = scmp.lt.s32.totalorder %s4268_s19, %s4268_s19 }
 0xae6   :  { %p7193_p0 = scmp.ne.s32.totalorder %s4268_s19, %s7192_s21  ;;  %p7198_p2 = scmp.lt.s32.totalorder %s7192_s21, %s7192_s21 }
 0xae8   :  { %p7199_p3 = por %p7198_p2, %p7197_p1 }
 0xaea   :  { %p7200_p4 = pnand %p7199_p3, %p7193_p0 }
 0xaec   :  { %7203 = shalt.err (!%p7200_p4)
}
 0xaed   :  { %s7204_s24 = scalar_lea.hbm %s9190_s10, 256 }
 0xaee   :  { %p7205_p5 = scmp.ne.s32.totalorder %s9190_s10, %s7204_s24  ;;  %p7208_p6 = scmp.lt.u32.totalorder %s7204_s24, %s9190_s10 }
 0xaf0   :  { %p7210_p7 = pnand %p7208_p6, %p7205_p5 }
 0xaf2   :  { %7213 = shalt.err (!%p7210_p7)
}
 0xaf3   :  { %4270 = dma.vmem_to_hbm [thread:$0]  %s4268_s19, 256, %s9190_s10, [#allocation19]  }
 0xaf4   :  { %s7263_s25 = smov [#allocation17]  }
 0xaf5   :  { %s4244_s4 = sshll.u32 %s7263_s25, 4  ;;  %s4245_s4 = int_to_ptr.vmem [resolvable:$true] %s4244_s4 }
 0xaf6   :  { %s7214_s26 = scalar_lea.vmem %s4245_s4, 3072  ;;  %p7219_p9 = scmp.lt.s32.totalorder %s4245_s4, %s4245_s4 }
 0xaf7   :  { %p7215_p8 = scmp.ne.s32.totalorder %s4245_s4, %s7214_s26  ;;  %p7220_p10 = scmp.lt.s32.totalorder %s7214_s26, %s7214_s26 }
 0xaf9   :  { %p7221_p11 = por %p7220_p10, %p7219_p9 }
 0xafb   :  { %p7222_p12 = pnand %p7221_p11, %p7215_p8 }
 0xb73   :  { %v4094_v8 = vpop.f32.mrb[46].mxu0  ;;  %v4419_v62 = vpop.f32.mrb[54].mxu1 }
 0xb74   :  { %v4095_v27 = vadd.f32 %v4094_v8, %v9118_v23  ;;  %v4096_v63 = vpop.f32.mrb[47].mxu0  ;;  %v4420_v24 = vpop.f32.mrb[55].mxu1 }
 0xb75   :  { %v4097_v26 = vadd.f32 %v4096_v63, %v9122_v41  ;;  %v4421_v31 = vadd.f32 %v4420_v24, %v4419_v62 }
 0xb76   :  { %4225 = vst [vmem:[#allocation17 + $0xa8] sm:$0xff] %v4095_v27 }
 0xb77   :  { %4226 = vst [vmem:[#allocation17 + $0xb0] sm:$0xff] %v4097_v26  ;;  %v4201_v57 = vadd.f32 %v4421_v31, %v9107_v15 }
 0xb79   :  { %4227 = vst [vmem:[#allocation17 + $0xb8] sm:$0xff] %v4201_v57 }
 0xb7a   :  { %7225 = shalt.err (!%p7222_p12)
}
 0xb7b   :  { %s7226_s27 = scalar_lea.hbm %s9188_s8, 3072 }
 0xb7c   :  { %p7227_p13 = scmp.ne.s32.totalorder %s9188_s8, %s7226_s27  ;;  %p7230_p0 = scmp.lt.u32.totalorder %s7226_s27, %s9188_s8 }
 0xb7e   :  { %p7232_p1 = pnand %p7230_p0, %p7227_p13 }
 0xb80   :  { %7235 = shalt.err (!%p7232_p1)
}
 0xb81   :  { %4250 = dma.vmem_to_hbm [thread:$0]  %s4245_s4, 3072, %s9188_s8, [#allocation8], %s7258_s5, %s7258_s5, %s7259_s1  }
 0xb82   :  { %7244 = dma.done.wait [#allocation8], 3072  }
 0xb83   :  { %7245 = vsyncadd [#allocation8], 4294964224 }
 0xb84   :  { %7246 = dma.done.wait [#allocation19], 512  }
 0xb85   :  { %7247 = vsyncadd [#allocation19], 4294966784 }
 0xb86   :  { %4280 = vsyncpa [#allocation7], 1 }
 0xb87   :  { %4281 = vsyncpa [#allocation10], 1 }
 0xb88   :  { %4282 = vsyncpa [#allocation13], 1 }
 0xb89   :  { %4283 = vsyncpa [#allocation16], 1 }
 0xb8a   :  { %4284 = vsyncpa [#allocation8], 1 }
 0xb8b   :  { %4285 = vsyncpa [#allocation19], 1 }

</bundles_post_ra>
